<compile_context>
chip_gen: v5e
topology: v5e:2x2
jax: 0.10.0
libtpu: 0.0.40
codegen_flags: <defaults>
</compile_context>

<pallas_src>
import functools

import jax
import jax.numpy as jnp
from jax.experimental import pallas as pl
from jax.experimental.pallas import tpu as pltpu

LANE = 128
SUBLANE = 8


def _round_up(x, m):
    return ((x + m - 1) // m) * m


# ----------------------------------------------------------------------------
# Fused kernel: 2-layer LSTM recurrence + LayerNorm + Linear head, single call.
# ----------------------------------------------------------------------------
def _fused_lstm_classifier_kernel(
        # inputs
        x_ref, wih0_ref, whh0_ref, b0_ref,
        wih1_hbm, whh1_hbm, b1_ref,
        gamma_ref, beta_ref, fcw_ref, fcb_ref,
        # outputs
        out_ref,
        # scratch
        seq1_ref, wih1_vmem, whh1_vmem, dma_sems,
        *, T, Bp, H):
    # Kick off the layer-1 weight DMA immediately so it overlaps layer-0 compute.
    cp_wih1 = pltpu.make_async_copy(wih1_hbm, wih1_vmem, dma_sems.at[0])
    cp_whh1 = pltpu.make_async_copy(whh1_hbm, whh1_vmem, dma_sems.at[1])
    cp_wih1.start()
    cp_whh1.start()

    def lstm_layer(seq_bf16, wih_bf16, whh_bf16, bias_f32, store_hs):
        # Input projection hoisted out of the serial recurrence: one big bf16 matmul.
        gx = jnp.dot(seq_bf16, wih_bf16,
                     preferred_element_type=jnp.float32) + bias_f32      # (T*Bp, 4H) f32
        h = jnp.zeros((Bp, H), jnp.float32)
        c = jnp.zeros((Bp, H), jnp.float32)
        for t in range(T):                       # T static & small -> fully unrolled
            gates = gx[t * Bp:(t + 1) * Bp, :] + jnp.dot(
                h.astype(jnp.bfloat16), whh_bf16,
                preferred_element_type=jnp.float32)                      # (Bp, 4H) f32
            i_g = jax.nn.sigmoid(gates[:, 0 * H:1 * H])
            f_g = jax.nn.sigmoid(gates[:, 1 * H:2 * H])
            g_g = jnp.tanh(gates[:, 2 * H:3 * H])
            o_g = jax.nn.sigmoid(gates[:, 3 * H:4 * H])
            c = f_g * c + i_g * g_g
            h = o_g * jnp.tanh(c)
            if store_hs:
                # Aligned (8,128) f32 tile store; frees vregs, no concatenate at layer end.
                seq1_ref[pl.ds(t * Bp, Bp), :] = h
        return h

    # ---- Layer 0: padded (T*Bp, Dp) feature slab -------------------------------------
    lstm_layer(x_ref[...].astype(jnp.bfloat16),
               wih0_ref[...], whh0_ref[...], b0_ref[...], store_hs=True)

    # ---- Layer 1: weights must have landed by now ------------------------------------
    cp_wih1.wait()
    cp_whh1.wait()
    h = lstm_layer(seq1_ref[...].astype(jnp.bfloat16),
                   wih1_vmem[...], whh1_vmem[...], b1_ref[...], store_hs=False)

    # ---- Classifier head on hn[-1]: LayerNorm (f32) + Linear (bf16 matmul, f32 acc) --
    mean = jnp.mean(h, axis=-1, keepdims=True)
    var = jnp.mean(jnp.square(h - mean), axis=-1, keepdims=True)
    hn = (h - mean) * jax.lax.rsqrt(var + 1e-5)
    hn = hn * gamma_ref[...] + beta_ref[...]
    logits = jnp.dot(hn.astype(jnp.bfloat16), fcw_ref[...],
                     preferred_element_type=jnp.float32) + fcb_ref[...]
    out_ref[...] = logits.astype(out_ref.dtype)          # (Bp, Cp) lane-dense store


# ----------------------------------------------------------------------------
# One-time parameter packing (transpose / pad / bias fold / bf16 cast).
# Run once; do NOT redo per forward call.
# ----------------------------------------------------------------------------
def prepare_params(params):
    lstm = params["lstm"]
    assert len(lstm) == 2, "kernel is specialized for num_layers=2"
    H = lstm[0]["w_hh"].shape[1]
    D = lstm[0]["w_ih"].shape[1]
    C = params["fc_w"].shape[0]
    Dp = _round_up(D, LANE)          # 258 -> 384 : lane-dense K for the layer-0 matmul
    Cp = _round_up(C, LANE)          # 5   -> 128 : lane-dense logits store

    def pack_layer(layer, d_in, d_pad):
        wih_t = jnp.asarray(layer["w_ih"], jnp.float32).T                # (d_in, 4H)
        if d_pad > d_in:
            wih_t = jnp.pad(wih_t, ((0, d_pad - d_in), (0, 0)))          # zero rows: no-op
        whh_t = jnp.asarray(layer["w_hh"], jnp.float32).T                # (H, 4H)
        bias = (jnp.asarray(layer["b_ih"], jnp.float32)
                + jnp.asarray(layer["b_hh"], jnp.float32)).reshape(1, 4 * H)
        return wih_t.astype(jnp.bfloat16), whh_t.astype(jnp.bfloat16), bias

    wih0, whh0, b0 = pack_layer(lstm[0], D, Dp)
    wih1, whh1, b1 = pack_layer(lstm[1], H, H)

    fcw = jnp.zeros((H, Cp), jnp.float32).at[:, :C].set(
        jnp.asarray(params["fc_w"], jnp.float32).T).astype(jnp.bfloat16)
    fcb = jnp.zeros((1, Cp), jnp.float32).at[:, :C].set(
        jnp.asarray(params["fc_b"], jnp.float32).reshape(1, C))

    return {
        "wih0": wih0, "whh0": whh0, "b0": b0,
        "wih1": wih1, "whh1": whh1, "b1": b1,
        "gamma": jnp.asarray(params["ln_gamma"], jnp.float32).reshape(1, H),
        "beta": jnp.asarray(params["ln_beta"], jnp.float32).reshape(1, H),
        "fcw": fcw, "fcb": fcb,
    }


# ----------------------------------------------------------------------------
# Per-call wrapper: pad/reshape x + single pallas_call.  `packed` from prepare_params.
# ----------------------------------------------------------------------------
def skeleton_lstm_classifier(x_btd, packed, *, num_classes):
    """x_btd: (B, T, input_dim) batch-first, like the PyTorch module. Returns (B, C)."""
    x = jnp.asarray(x_btd, jnp.float32)
    B, T, D = x.shape
    Dp = packed["wih0"].shape[0]
    H = packed["whh0"].shape[0]
    Cp = packed["fcw"].shape[1]
    Bp = _round_up(max(B, SUBLANE), SUBLANE)     # batch padded to the f32 sublane tile

    # Time-major, batch padded to Bp, features zero-padded to Dp -> (T*Bp, Dp).
    x_tbd = jnp.swapaxes(x, 0, 1)                                         # (T, B, D)
    x_pad = jnp.pad(x_tbd, ((0, 0), (0, Bp - B), (0, Dp - D))).reshape(T * Bp, Dp)

    kernel = functools.partial(_fused_lstm_classifier_kernel, T=T, Bp=Bp, H=H)
    vmem = pl.BlockSpec(memory_space=pltpu.MemorySpace.VMEM)
    hbm = pl.BlockSpec(memory_space=pl.ANY)       # layer-1 weights: manual overlapped DMA

    out_pad = pl.pallas_call(
        kernel,
        out_shape=jax.ShapeDtypeStruct((Bp, Cp), jnp.float32),
        in_specs=[vmem,                 # x
                  vmem, vmem, vmem,     # layer-0 w_ih^T / w_hh^T / bias
                  hbm, hbm, vmem,       # layer-1 w_ih^T / w_hh^T (HBM) / bias
                  vmem, vmem, vmem, vmem],  # gamma, beta, fc_w^T, fc_b
        out_specs=vmem,
        scratch_shapes=[
            pltpu.VMEM((T * Bp, H), jnp.float32),     # layer-0 hidden sequence
            pltpu.VMEM((H, 4 * H), jnp.bfloat16),     # layer-1 w_ih landing buffer
            pltpu.VMEM((H, 4 * H), jnp.bfloat16),     # layer-1 w_hh landing buffer
            pltpu.SemaphoreType.DMA((2,)),
        ],
    )(x_pad, packed["wih0"], packed["whh0"], packed["b0"],
      packed["wih1"], packed["whh1"], packed["b1"],
      packed["gamma"], packed["beta"], packed["fcw"], packed["fcb"])
    return out_pad[:B, :num_classes]


# ----------------------------------------------------------------------------
# Pure-JAX f32 reference (correctness check)
# ----------------------------------------------------------------------------
def _lstm_layer_ref(x_tbd, w_ih, w_hh, b_ih, b_hh):
    _, B, _ = x_tbd.shape
    H = w_hh.shape[1]

    def step(carry, x_t):
        h, c = carry
        gates = x_t @ w_ih.T + h @ w_hh.T + b_ih + b_hh
        i = jax.nn.sigmoid(gates[:, :H])
        f = jax.nn.sigmoid(gates[:, H:2 * H])
        g = jnp.tanh(gates[:, 2 * H:3 * H])
        o = jax.nn.sigmoid(gates[:, 3 * H:4 * H])
        c = f * c + i * g
        h = o * jnp.tanh(c)
        return (h, c), h

    init = (jnp.zeros((B, H), jnp.float32), jnp.zeros((B, H), jnp.float32))
    _, hs = jax.lax.scan(step, init, x_tbd)
    return hs


def _reference_forward(x_btd, params):
    h = jnp.swapaxes(jnp.asarray(x_btd, jnp.float32), 0, 1)
    for layer in params["lstm"]:
        h = _lstm_layer_ref(h, layer["w_ih"], layer["w_hh"],
                            layer["b_ih"], layer["b_hh"])
    hl = h[-1]
    mean = jnp.mean(hl, axis=-1, keepdims=True)
    var = jnp.mean(jnp.square(hl - mean), axis=-1, keepdims=True)
    hn = (hl - mean) * jax.lax.rsqrt(var + 1e-5) * params["ln_gamma"] + params["ln_beta"]
    return hn @ params["fc_w"].T + params["fc_b"]


# ----------------------------------------------------------------------------
# Deterministic parameter init (synthetic; shapes match nn.LSTM / LayerNorm / Linear)
# ----------------------------------------------------------------------------
def init_params(key, input_dim, hidden_dim, num_layers, num_classes):
    params = {"lstm": []}
    for layer in range(num_layers):
        d_in = input_dim if layer == 0 else hidden_dim
        key, k1, k2, k3, k4 = jax.random.split(key, 5)
        params["lstm"].append({
            "w_ih": 0.05 * jax.random.normal(k1, (4 * hidden_dim, d_in), jnp.float32),
            "w_hh": 0.05 * jax.random.normal(k2, (4 * hidden_dim, hidden_dim), jnp.float32),
            "b_ih": 0.05 * jax.random.normal(k3, (4 * hidden_dim,), jnp.float32),
            "b_hh": 0.05 * jax.random.normal(k4, (4 * hidden_dim,), jnp.float32),
        })
    key, k5, k6 = jax.random.split(key, 3)
    params["ln_gamma"] = jnp.ones((hidden_dim,), jnp.float32)
    params["ln_beta"] = jnp.zeros((hidden_dim,), jnp.float32)
    params["fc_w"] = 0.05 * jax.random.normal(k5, (num_classes, hidden_dim), jnp.float32)
    params["fc_b"] = 0.05 * jax.random.normal(k6, (num_classes,), jnp.float32)
    return params


if __name__ == "__main__":
    B, T = 2, 8
    INPUT_DIM, HIDDEN_DIM, NUM_LAYERS, NUM_CLASSES = 258, 128, 2, 5

    key = jax.random.PRNGKey(0)
    key, kx = jax.random.split(key)
    x = jax.random.normal(kx, (B, T, INPUT_DIM), jnp.float32)
    params = init_params(key, INPUT_DIM, HIDDEN_DIM, NUM_LAYERS, NUM_CLASSES)

    # One-time weight packing (kept out of the per-call path).
    packed = prepare_params(params)
    fwd = jax.jit(functools.partial(skeleton_lstm_classifier, num_classes=NUM_CLASSES))

    out = jax.block_until_ready(fwd(x, packed))
    ref = jax.block_until_ready(_reference_forward(x, params))

    assert out.shape == (B, NUM_CLASSES)
    max_err = float(jnp.max(jnp.abs(out - ref)))
    # bf16 weights/activations on the MXU (f32 accumulate): loosened tolerance vs f32 ref.
    assert jnp.allclose(out, ref, atol=5e-2, rtol=5e-2), (max_err, out, ref)

    print("KERNEL_OK")
</pallas_src>

<mosaic_0001>
module attributes {stable_mosaic.version = 11 : i64} {
  func.func @_fused_lstm_classifier_kernel(%arg0: memref<64x384xf32, #tpu.memory_space<vmem>>, %arg1: memref<384x512xbf16, #tpu.memory_space<vmem>>, %arg2: memref<128x512xbf16, #tpu.memory_space<vmem>>, %arg3: memref<1x512xf32, #tpu.memory_space<vmem>>, %arg4: memref<128x512xbf16, #tpu.memory_space<any>>, %arg5: memref<128x512xbf16, #tpu.memory_space<any>>, %arg6: memref<1x512xf32, #tpu.memory_space<vmem>>, %arg7: memref<1x128xf32, #tpu.memory_space<vmem>>, %arg8: memref<1x128xf32, #tpu.memory_space<vmem>>, %arg9: memref<128x128xbf16, #tpu.memory_space<vmem>>, %arg10: memref<1x128xf32, #tpu.memory_space<vmem>>, %arg11: memref<8x128xf32, #tpu.memory_space<vmem>>, %arg12: memref<64x128xf32, #tpu.memory_space<vmem>>, %arg13: memref<128x512xbf16, #tpu.memory_space<vmem>>, %arg14: memref<128x512xbf16, #tpu.memory_space<vmem>>, %arg15: memref<2x!tpu.dma_semaphore, #tpu.memory_space<semaphore_mem>>) attributes {dimension_semantics = [], scalar_prefetch = 0 : i64, scratch_operands = 4 : i64, tpu.core_type = #tpu.core_type<tc>} {
    %c0_i32 = arith.constant 0 : i32
    %0 = tpu.memref_slice %arg15[%c0_i32] : memref<2x!tpu.dma_semaphore, #tpu.memory_space<semaphore_mem>> -> memref<1x!tpu.dma_semaphore, #tpu.memory_space<semaphore_mem>>
    %1 = tpu.memref_squeeze %0 : memref<1x!tpu.dma_semaphore, #tpu.memory_space<semaphore_mem>> -> memref<!tpu.dma_semaphore, #tpu.memory_space<semaphore_mem>>
    tpu.enqueue_dma source(%arg4 : memref<128x512xbf16, #tpu.memory_space<any>>) target(%arg13 : memref<128x512xbf16, #tpu.memory_space<vmem>>) target_semaphore(%1 : memref<!tpu.dma_semaphore, #tpu.memory_space<semaphore_mem>>)
    %c1_i32 = arith.constant 1 : i32
    %2 = tpu.memref_slice %arg15[%c1_i32] : memref<2x!tpu.dma_semaphore, #tpu.memory_space<semaphore_mem>> -> memref<1x!tpu.dma_semaphore, #tpu.memory_space<semaphore_mem>>
    %3 = tpu.memref_squeeze %2 : memref<1x!tpu.dma_semaphore, #tpu.memory_space<semaphore_mem>> -> memref<!tpu.dma_semaphore, #tpu.memory_space<semaphore_mem>>
    tpu.enqueue_dma source(%arg5 : memref<128x512xbf16, #tpu.memory_space<any>>) target(%arg14 : memref<128x512xbf16, #tpu.memory_space<vmem>>) target_semaphore(%3 : memref<!tpu.dma_semaphore, #tpu.memory_space<semaphore_mem>>)
    %c0 = arith.constant 0 : index
    %c0_0 = arith.constant 0 : index
    %4 = vector.load %arg0[%c0, %c0_0] : memref<64x384xf32, #tpu.memory_space<vmem>>, vector<64x384xf32>
    %5 = arith.truncf %4 : vector<64x384xf32> to vector<64x384xbf16>
    %c0_1 = arith.constant 0 : index
    %c0_2 = arith.constant 0 : index
    %6 = vector.load %arg1[%c0_1, %c0_2] : memref<384x512xbf16, #tpu.memory_space<vmem>>, vector<384x512xbf16>
    %c0_3 = arith.constant 0 : index
    %c0_4 = arith.constant 0 : index
    %7 = vector.load %arg2[%c0_3, %c0_4] : memref<128x512xbf16, #tpu.memory_space<vmem>>, vector<128x512xbf16>
    %c0_5 = arith.constant 0 : index
    %c0_6 = arith.constant 0 : index
    %8 = vector.load %arg3[%c0_5, %c0_6] : memref<1x512xf32, #tpu.memory_space<vmem>>, vector<1x512xf32>
    %cst = arith.constant dense<0.000000e+00> : vector<64x512xf32>
    %9 = tpu.matmul %5, %6, %cst {dimension_numbers = #tpu.dot_dimension_numbers<[1], [0], [0], [1], [0, 0, 1, 1], [], []>} : vector<64x384xbf16>, vector<384x512xbf16>, vector<64x512xf32> -> vector<64x512xf32>
    %10 = vector.broadcast %8 : vector<1x512xf32> to vector<64x512xf32>
    %11 = arith.addf %9, %10 : vector<64x512xf32>
    %cst_7 = arith.constant 0.000000e+00 : f32
    %12 = vector.broadcast %cst_7 : f32 to vector<8x128xf32>
    %cst_8 = arith.constant 0.000000e+00 : f32
    %13 = vector.broadcast %cst_8 : f32 to vector<8x128xf32>
    %14 = vector.extract_strided_slice %11 {offsets = [0, 0], sizes = [8, 512], strides = [1, 1]} : vector<64x512xf32> to vector<8x512xf32>
    %15 = arith.truncf %12 : vector<8x128xf32> to vector<8x128xbf16>
    %cst_9 = arith.constant dense<0.000000e+00> : vector<8x512xf32>
    %16 = tpu.matmul %15, %7, %cst_9 {dimension_numbers = #tpu.dot_dimension_numbers<[1], [0], [0], [1], [0, 0, 1, 1], [], []>} : vector<8x128xbf16>, vector<128x512xbf16>, vector<8x512xf32> -> vector<8x512xf32>
    %17 = arith.addf %14, %16 : vector<8x512xf32>
    %18 = vector.extract_strided_slice %17 {offsets = [0, 0], sizes = [8, 128], strides = [1, 1]} : vector<8x512xf32> to vector<8x128xf32>
    %19 = arith.negf %18 : vector<8x128xf32>
    %20 = math.exp %19 : vector<8x128xf32>
    %cst_10 = arith.constant 1.000000e+00 : f32
    %21 = vector.broadcast %cst_10 : f32 to vector<8x128xf32>
    %22 = arith.addf %21, %20 : vector<8x128xf32>
    %23 = arith.divf %21, %22 : vector<8x128xf32>
    %24 = vector.extract_strided_slice %17 {offsets = [0, 128], sizes = [8, 128], strides = [1, 1]} : vector<8x512xf32> to vector<8x128xf32>
    %25 = arith.negf %24 : vector<8x128xf32>
    %26 = math.exp %25 : vector<8x128xf32>
    %cst_11 = arith.constant 1.000000e+00 : f32
    %27 = vector.broadcast %cst_11 : f32 to vector<8x128xf32>
    %28 = arith.addf %27, %26 : vector<8x128xf32>
    %29 = arith.divf %27, %28 : vector<8x128xf32>
    %30 = vector.extract_strided_slice %17 {offsets = [0, 256], sizes = [8, 128], strides = [1, 1]} : vector<8x512xf32> to vector<8x128xf32>
    %31 = math.tanh %30 : vector<8x128xf32>
    %32 = vector.extract_strided_slice %17 {offsets = [0, 384], sizes = [8, 128], strides = [1, 1]} : vector<8x512xf32> to vector<8x128xf32>
    %33 = arith.negf %32 : vector<8x128xf32>
    %34 = math.exp %33 : vector<8x128xf32>
    %cst_12 = arith.constant 1.000000e+00 : f32
    %35 = vector.broadcast %cst_12 : f32 to vector<8x128xf32>
    %36 = arith.addf %35, %34 : vector<8x128xf32>
    %37 = arith.divf %35, %36 : vector<8x128xf32>
    %38 = arith.mulf %29, %13 : vector<8x128xf32>
    %39 = arith.mulf %23, %31 : vector<8x128xf32>
    %40 = arith.addf %38, %39 : vector<8x128xf32>
    %41 = math.tanh %40 : vector<8x128xf32>
    %42 = arith.mulf %37, %41 : vector<8x128xf32>
    %c0_13 = arith.constant 0 : index
    %c0_14 = arith.constant 0 : index
    %43 = vector.load %arg12[%c0_13, %c0_14] : memref<64x128xf32, #tpu.memory_space<vmem>>, vector<8x128xf32>
    tpu.vector_store %arg12[%c0_13, %c0_14], %42 {strides = array<i32>} : memref<64x128xf32, #tpu.memory_space<vmem>>, vector<8x128xf32>,
    %44 = vector.extract_strided_slice %11 {offsets = [8, 0], sizes = [8, 512], strides = [1, 1]} : vector<64x512xf32> to vector<8x512xf32>
    %45 = arith.truncf %42 : vector<8x128xf32> to vector<8x128xbf16>
    %cst_15 = arith.constant dense<0.000000e+00> : vector<8x512xf32>
    %46 = tpu.matmul %45, %7, %cst_15 {dimension_numbers = #tpu.dot_dimension_numbers<[1], [0], [0], [1], [0, 0, 1, 1], [], []>} : vector<8x128xbf16>, vector<128x512xbf16>, vector<8x512xf32> -> vector<8x512xf32>
    %47 = arith.addf %44, %46 : vector<8x512xf32>
    %48 = vector.extract_strided_slice %47 {offsets = [0, 0], sizes = [8, 128], strides = [1, 1]} : vector<8x512xf32> to vector<8x128xf32>
    %49 = arith.negf %48 : vector<8x128xf32>
    %50 = math.exp %49 : vector<8x128xf32>
    %cst_16 = arith.constant 1.000000e+00 : f32
    %51 = vector.broadcast %cst_16 : f32 to vector<8x128xf32>
    %52 = arith.addf %51, %50 : vector<8x128xf32>
    %53 = arith.divf %51, %52 : vector<8x128xf32>
    %54 = vector.extract_strided_slice %47 {offsets = [0, 128], sizes = [8, 128], strides = [1, 1]} : vector<8x512xf32> to vector<8x128xf32>
    %55 = arith.negf %54 : vector<8x128xf32>
    %56 = math.exp %55 : vector<8x128xf32>
    %cst_17 = arith.constant 1.000000e+00 : f32
    %57 = vector.broadcast %cst_17 : f32 to vector<8x128xf32>
    %58 = arith.addf %57, %56 : vector<8x128xf32>
    %59 = arith.divf %57, %58 : vector<8x128xf32>
    %60 = vector.extract_strided_slice %47 {offsets = [0, 256], sizes = [8, 128], strides = [1, 1]} : vector<8x512xf32> to vector<8x128xf32>
    %61 = math.tanh %60 : vector<8x128xf32>
    %62 = vector.extract_strided_slice %47 {offsets = [0, 384], sizes = [8, 128], strides = [1, 1]} : vector<8x512xf32> to vector<8x128xf32>
    %63 = arith.negf %62 : vector<8x128xf32>
    %64 = math.exp %63 : vector<8x128xf32>
    %cst_18 = arith.constant 1.000000e+00 : f32
    %65 = vector.broadcast %cst_18 : f32 to vector<8x128xf32>
    %66 = arith.addf %65, %64 : vector<8x128xf32>
    %67 = arith.divf %65, %66 : vector<8x128xf32>
    %68 = arith.mulf %59, %40 : vector<8x128xf32>
    %69 = arith.mulf %53, %61 : vector<8x128xf32>
    %70 = arith.addf %68, %69 : vector<8x128xf32>
    %71 = math.tanh %70 : vector<8x128xf32>
    %72 = arith.mulf %67, %71 : vector<8x128xf32>
    %c8 = arith.constant 8 : index
    %c0_19 = arith.constant 0 : index
    %73 = vector.load %arg12[%c8, %c0_19] : memref<64x128xf32, #tpu.memory_space<vmem>>, vector<8x128xf32>
    tpu.vector_store %arg12[%c8, %c0_19], %72 {strides = array<i32>} : memref<64x128xf32, #tpu.memory_space<vmem>>, vector<8x128xf32>,
    %74 = vector.extract_strided_slice %11 {offsets = [16, 0], sizes = [8, 512], strides = [1, 1]} : vector<64x512xf32> to vector<8x512xf32>
    %75 = arith.truncf %72 : vector<8x128xf32> to vector<8x128xbf16>
    %cst_20 = arith.constant dense<0.000000e+00> : vector<8x512xf32>
    %76 = tpu.matmul %75, %7, %cst_20 {dimension_numbers = #tpu.dot_dimension_numbers<[1], [0], [0], [1], [0, 0, 1, 1], [], []>} : vector<8x128xbf16>, vector<128x512xbf16>, vector<8x512xf32> -> vector<8x512xf32>
    %77 = arith.addf %74, %76 : vector<8x512xf32>
    %78 = vector.extract_strided_slice %77 {offsets = [0, 0], sizes = [8, 128], strides = [1, 1]} : vector<8x512xf32> to vector<8x128xf32>
    %79 = arith.negf %78 : vector<8x128xf32>
    %80 = math.exp %79 : vector<8x128xf32>
    %cst_21 = arith.constant 1.000000e+00 : f32
    %81 = vector.broadcast %cst_21 : f32 to vector<8x128xf32>
    %82 = arith.addf %81, %80 : vector<8x128xf32>
    %83 = arith.divf %81, %82 : vector<8x128xf32>
    %84 = vector.extract_strided_slice %77 {offsets = [0, 128], sizes = [8, 128], strides = [1, 1]} : vector<8x512xf32> to vector<8x128xf32>
    %85 = arith.negf %84 : vector<8x128xf32>
    %86 = math.exp %85 : vector<8x128xf32>
    %cst_22 = arith.constant 1.000000e+00 : f32
    %87 = vector.broadcast %cst_22 : f32 to vector<8x128xf32>
    %88 = arith.addf %87, %86 : vector<8x128xf32>
    %89 = arith.divf %87, %88 : vector<8x128xf32>
    %90 = vector.extract_strided_slice %77 {offsets = [0, 256], sizes = [8, 128], strides = [1, 1]} : vector<8x512xf32> to vector<8x128xf32>
    %91 = math.tanh %90 : vector<8x128xf32>
    %92 = vector.extract_strided_slice %77 {offsets = [0, 384], sizes = [8, 128], strides = [1, 1]} : vector<8x512xf32> to vector<8x128xf32>
    %93 = arith.negf %92 : vector<8x128xf32>
    %94 = math.exp %93 : vector<8x128xf32>
    %cst_23 = arith.constant 1.000000e+00 : f32
    %95 = vector.broadcast %cst_23 : f32 to vector<8x128xf32>
    %96 = arith.addf %95, %94 : vector<8x128xf32>
    %97 = arith.divf %95, %96 : vector<8x128xf32>
    %98 = arith.mulf %89, %70 : vector<8x128xf32>
    %99 = arith.mulf %83, %91 : vector<8x128xf32>
    %100 = arith.addf %98, %99 : vector<8x128xf32>
    %101 = math.tanh %100 : vector<8x128xf32>
    %102 = arith.mulf %97, %101 : vector<8x128xf32>
    %c16 = arith.constant 16 : index
    %c0_24 = arith.constant 0 : index
    %103 = vector.load %arg12[%c16, %c0_24] : memref<64x128xf32, #tpu.memory_space<vmem>>, vector<8x128xf32>
    tpu.vector_store %arg12[%c16, %c0_24], %102 {strides = array<i32>} : memref<64x128xf32, #tpu.memory_space<vmem>>, vector<8x128xf32>,
    %104 = vector.extract_strided_slice %11 {offsets = [24, 0], sizes = [8, 512], strides = [1, 1]} : vector<64x512xf32> to vector<8x512xf32>
    %105 = arith.truncf %102 : vector<8x128xf32> to vector<8x128xbf16>
    %cst_25 = arith.constant dense<0.000000e+00> : vector<8x512xf32>
    %106 = tpu.matmul %105, %7, %cst_25 {dimension_numbers = #tpu.dot_dimension_numbers<[1], [0], [0], [1], [0, 0, 1, 1], [], []>} : vector<8x128xbf16>, vector<128x512xbf16>, vector<8x512xf32> -> vector<8x512xf32>
    %107 = arith.addf %104, %106 : vector<8x512xf32>
    %108 = vector.extract_strided_slice %107 {offsets = [0, 0], sizes = [8, 128], strides = [1, 1]} : vector<8x512xf32> to vector<8x128xf32>
    %109 = arith.negf %108 : vector<8x128xf32>
    %110 = math.exp %109 : vector<8x128xf32>
    %cst_26 = arith.constant 1.000000e+00 : f32
    %111 = vector.broadcast %cst_26 : f32 to vector<8x128xf32>
    %112 = arith.addf %111, %110 : vector<8x128xf32>
    %113 = arith.divf %111, %112 : vector<8x128xf32>
    %114 = vector.extract_strided_slice %107 {offsets = [0, 128], sizes = [8, 128], strides = [1, 1]} : vector<8x512xf32> to vector<8x128xf32>
    %115 = arith.negf %114 : vector<8x128xf32>
    %116 = math.exp %115 : vector<8x128xf32>
    %cst_27 = arith.constant 1.000000e+00 : f32
    %117 = vector.broadcast %cst_27 : f32 to vector<8x128xf32>
    %118 = arith.addf %117, %116 : vector<8x128xf32>
    %119 = arith.divf %117, %118 : vector<8x128xf32>
    %120 = vector.extract_strided_slice %107 {offsets = [0, 256], sizes = [8, 128], strides = [1, 1]} : vector<8x512xf32> to vector<8x128xf32>
    %121 = math.tanh %120 : vector<8x128xf32>
    %122 = vector.extract_strided_slice %107 {offsets = [0, 384], sizes = [8, 128], strides = [1, 1]} : vector<8x512xf32> to vector<8x128xf32>
    %123 = arith.negf %122 : vector<8x128xf32>
    %124 = math.exp %123 : vector<8x128xf32>
    %cst_28 = arith.constant 1.000000e+00 : f32
    %125 = vector.broadcast %cst_28 : f32 to vector<8x128xf32>
    %126 = arith.addf %125, %124 : vector<8x128xf32>
    %127 = arith.divf %125, %126 : vector<8x128xf32>
    %128 = arith.mulf %119, %100 : vector<8x128xf32>
    %129 = arith.mulf %113, %121 : vector<8x128xf32>
    %130 = arith.addf %128, %129 : vector<8x128xf32>
    %131 = math.tanh %130 : vector<8x128xf32>
    %132 = arith.mulf %127, %131 : vector<8x128xf32>
    %c24 = arith.constant 24 : index
    %c0_29 = arith.constant 0 : index
    %133 = vector.load %arg12[%c24, %c0_29] : memref<64x128xf32, #tpu.memory_space<vmem>>, vector<8x128xf32>
    tpu.vector_store %arg12[%c24, %c0_29], %132 {strides = array<i32>} : memref<64x128xf32, #tpu.memory_space<vmem>>, vector<8x128xf32>,
    %134 = vector.extract_strided_slice %11 {offsets = [32, 0], sizes = [8, 512], strides = [1, 1]} : vector<64x512xf32> to vector<8x512xf32>
    %135 = arith.truncf %132 : vector<8x128xf32> to vector<8x128xbf16>
    %cst_30 = arith.constant dense<0.000000e+00> : vector<8x512xf32>
    %136 = tpu.matmul %135, %7, %cst_30 {dimension_numbers = #tpu.dot_dimension_numbers<[1], [0], [0], [1], [0, 0, 1, 1], [], []>} : vector<8x128xbf16>, vector<128x512xbf16>, vector<8x512xf32> -> vector<8x512xf32>
    %137 = arith.addf %134, %136 : vector<8x512xf32>
    %138 = vector.extract_strided_slice %137 {offsets = [0, 0], sizes = [8, 128], strides = [1, 1]} : vector<8x512xf32> to vector<8x128xf32>
    %139 = arith.negf %138 : vector<8x128xf32>
    %140 = math.exp %139 : vector<8x128xf32>
    %cst_31 = arith.constant 1.000000e+00 : f32
    %141 = vector.broadcast %cst_31 : f32 to vector<8x128xf32>
    %142 = arith.addf %141, %140 : vector<8x128xf32>
    %143 = arith.divf %141, %142 : vector<8x128xf32>
    %144 = vector.extract_strided_slice %137 {offsets = [0, 128], sizes = [8, 128], strides = [1, 1]} : vector<8x512xf32> to vector<8x128xf32>
    %145 = arith.negf %144 : vector<8x128xf32>
    %146 = math.exp %145 : vector<8x128xf32>
    %cst_32 = arith.constant 1.000000e+00 : f32
    %147 = vector.broadcast %cst_32 : f32 to vector<8x128xf32>
    %148 = arith.addf %147, %146 : vector<8x128xf32>
    %149 = arith.divf %147, %148 : vector<8x128xf32>
    %150 = vector.extract_strided_slice %137 {offsets = [0, 256], sizes = [8, 128], strides = [1, 1]} : vector<8x512xf32> to vector<8x128xf32>
    %151 = math.tanh %150 : vector<8x128xf32>
    %152 = vector.extract_strided_slice %137 {offsets = [0, 384], sizes = [8, 128], strides = [1, 1]} : vector<8x512xf32> to vector<8x128xf32>
    %153 = arith.negf %152 : vector<8x128xf32>
    %154 = math.exp %153 : vector<8x128xf32>
    %cst_33 = arith.constant 1.000000e+00 : f32
    %155 = vector.broadcast %cst_33 : f32 to vector<8x128xf32>
    %156 = arith.addf %155, %154 : vector<8x128xf32>
    %157 = arith.divf %155, %156 : vector<8x128xf32>
    %158 = arith.mulf %149, %130 : vector<8x128xf32>
    %159 = arith.mulf %143, %151 : vector<8x128xf32>
    %160 = arith.addf %158, %159 : vector<8x128xf32>
    %161 = math.tanh %160 : vector<8x128xf32>
    %162 = arith.mulf %157, %161 : vector<8x128xf32>
    %c32 = arith.constant 32 : index
    %c0_34 = arith.constant 0 : index
    %163 = vector.load %arg12[%c32, %c0_34] : memref<64x128xf32, #tpu.memory_space<vmem>>, vector<8x128xf32>
    tpu.vector_store %arg12[%c32, %c0_34], %162 {strides = array<i32>} : memref<64x128xf32, #tpu.memory_space<vmem>>, vector<8x128xf32>,
    %164 = vector.extract_strided_slice %11 {offsets = [40, 0], sizes = [8, 512], strides = [1, 1]} : vector<64x512xf32> to vector<8x512xf32>
    %165 = arith.truncf %162 : vector<8x128xf32> to vector<8x128xbf16>
    %cst_35 = arith.constant dense<0.000000e+00> : vector<8x512xf32>
    %166 = tpu.matmul %165, %7, %cst_35 {dimension_numbers = #tpu.dot_dimension_numbers<[1], [0], [0], [1], [0, 0, 1, 1], [], []>} : vector<8x128xbf16>, vector<128x512xbf16>, vector<8x512xf32> -> vector<8x512xf32>
    %167 = arith.addf %164, %166 : vector<8x512xf32>
    %168 = vector.extract_strided_slice %167 {offsets = [0, 0], sizes = [8, 128], strides = [1, 1]} : vector<8x512xf32> to vector<8x128xf32>
    %169 = arith.negf %168 : vector<8x128xf32>
    %170 = math.exp %169 : vector<8x128xf32>
    %cst_36 = arith.constant 1.000000e+00 : f32
    %171 = vector.broadcast %cst_36 : f32 to vector<8x128xf32>
    %172 = arith.addf %171, %170 : vector<8x128xf32>
    %173 = arith.divf %171, %172 : vector<8x128xf32>
    %174 = vector.extract_strided_slice %167 {offsets = [0, 128], sizes = [8, 128], strides = [1, 1]} : vector<8x512xf32> to vector<8x128xf32>
    %175 = arith.negf %174 : vector<8x128xf32>
    %176 = math.exp %175 : vector<8x128xf32>
    %cst_37 = arith.constant 1.000000e+00 : f32
    %177 = vector.broadcast %cst_37 : f32 to vector<8x128xf32>
    %178 = arith.addf %177, %176 : vector<8x128xf32>
    %179 = arith.divf %177, %178 : vector<8x128xf32>
    %180 = vector.extract_strided_slice %167 {offsets = [0, 256], sizes = [8, 128], strides = [1, 1]} : vector<8x512xf32> to vector<8x128xf32>
    %181 = math.tanh %180 : vector<8x128xf32>
    %182 = vector.extract_strided_slice %167 {offsets = [0, 384], sizes = [8, 128], strides = [1, 1]} : vector<8x512xf32> to vector<8x128xf32>
    %183 = arith.negf %182 : vector<8x128xf32>
    %184 = math.exp %183 : vector<8x128xf32>
    %cst_38 = arith.constant 1.000000e+00 : f32
    %185 = vector.broadcast %cst_38 : f32 to vector<8x128xf32>
    %186 = arith.addf %185, %184 : vector<8x128xf32>
    %187 = arith.divf %185, %186 : vector<8x128xf32>
    %188 = arith.mulf %179, %160 : vector<8x128xf32>
    %189 = arith.mulf %173, %181 : vector<8x128xf32>
    %190 = arith.addf %188, %189 : vector<8x128xf32>
    %191 = math.tanh %190 : vector<8x128xf32>
    %192 = arith.mulf %187, %191 : vector<8x128xf32>
    %c40 = arith.constant 40 : index
    %c0_39 = arith.constant 0 : index
    %193 = vector.load %arg12[%c40, %c0_39] : memref<64x128xf32, #tpu.memory_space<vmem>>, vector<8x128xf32>
    tpu.vector_store %arg12[%c40, %c0_39], %192 {strides = array<i32>} : memref<64x128xf32, #tpu.memory_space<vmem>>, vector<8x128xf32>,
    %194 = vector.extract_strided_slice %11 {offsets = [48, 0], sizes = [8, 512], strides = [1, 1]} : vector<64x512xf32> to vector<8x512xf32>
    %195 = arith.truncf %192 : vector<8x128xf32> to vector<8x128xbf16>
    %cst_40 = arith.constant dense<0.000000e+00> : vector<8x512xf32>
    %196 = tpu.matmul %195, %7, %cst_40 {dimension_numbers = #tpu.dot_dimension_numbers<[1], [0], [0], [1], [0, 0, 1, 1], [], []>} : vector<8x128xbf16>, vector<128x512xbf16>, vector<8x512xf32> -> vector<8x512xf32>
    %197 = arith.addf %194, %196 : vector<8x512xf32>
    %198 = vector.extract_strided_slice %197 {offsets = [0, 0], sizes = [8, 128], strides = [1, 1]} : vector<8x512xf32> to vector<8x128xf32>
    %199 = arith.negf %198 : vector<8x128xf32>
    %200 = math.exp %199 : vector<8x128xf32>
    %cst_41 = arith.constant 1.000000e+00 : f32
    %201 = vector.broadcast %cst_41 : f32 to vector<8x128xf32>
    %202 = arith.addf %201, %200 : vector<8x128xf32>
    %203 = arith.divf %201, %202 : vector<8x128xf32>
    %204 = vector.extract_strided_slice %197 {offsets = [0, 128], sizes = [8, 128], strides = [1, 1]} : vector<8x512xf32> to vector<8x128xf32>
    %205 = arith.negf %204 : vector<8x128xf32>
    %206 = math.exp %205 : vector<8x128xf32>
    %cst_42 = arith.constant 1.000000e+00 : f32
    %207 = vector.broadcast %cst_42 : f32 to vector<8x128xf32>
    %208 = arith.addf %207, %206 : vector<8x128xf32>
    %209 = arith.divf %207, %208 : vector<8x128xf32>
    %210 = vector.extract_strided_slice %197 {offsets = [0, 256], sizes = [8, 128], strides = [1, 1]} : vector<8x512xf32> to vector<8x128xf32>
    %211 = math.tanh %210 : vector<8x128xf32>
    %212 = vector.extract_strided_slice %197 {offsets = [0, 384], sizes = [8, 128], strides = [1, 1]} : vector<8x512xf32> to vector<8x128xf32>
    %213 = arith.negf %212 : vector<8x128xf32>
    %214 = math.exp %213 : vector<8x128xf32>
    %cst_43 = arith.constant 1.000000e+00 : f32
    %215 = vector.broadcast %cst_43 : f32 to vector<8x128xf32>
    %216 = arith.addf %215, %214 : vector<8x128xf32>
    %217 = arith.divf %215, %216 : vector<8x128xf32>
    %218 = arith.mulf %209, %190 : vector<8x128xf32>
    %219 = arith.mulf %203, %211 : vector<8x128xf32>
    %220 = arith.addf %218, %219 : vector<8x128xf32>
    %221 = math.tanh %220 : vector<8x128xf32>
    %222 = arith.mulf %217, %221 : vector<8x128xf32>
    %c48 = arith.constant 48 : index
    %c0_44 = arith.constant 0 : index
    %223 = vector.load %arg12[%c48, %c0_44] : memref<64x128xf32, #tpu.memory_space<vmem>>, vector<8x128xf32>
    tpu.vector_store %arg12[%c48, %c0_44], %222 {strides = array<i32>} : memref<64x128xf32, #tpu.memory_space<vmem>>, vector<8x128xf32>,
    %224 = vector.extract_strided_slice %11 {offsets = [56, 0], sizes = [8, 512], strides = [1, 1]} : vector<64x512xf32> to vector<8x512xf32>
    %225 = arith.truncf %222 : vector<8x128xf32> to vector<8x128xbf16>
    %cst_45 = arith.constant dense<0.000000e+00> : vector<8x512xf32>
    %226 = tpu.matmul %225, %7, %cst_45 {dimension_numbers = #tpu.dot_dimension_numbers<[1], [0], [0], [1], [0, 0, 1, 1], [], []>} : vector<8x128xbf16>, vector<128x512xbf16>, vector<8x512xf32> -> vector<8x512xf32>
    %227 = arith.addf %224, %226 : vector<8x512xf32>
    %228 = vector.extract_strided_slice %227 {offsets = [0, 0], sizes = [8, 128], strides = [1, 1]} : vector<8x512xf32> to vector<8x128xf32>
    %229 = arith.negf %228 : vector<8x128xf32>
    %230 = math.exp %229 : vector<8x128xf32>
    %cst_46 = arith.constant 1.000000e+00 : f32
    %231 = vector.broadcast %cst_46 : f32 to vector<8x128xf32>
    %232 = arith.addf %231, %230 : vector<8x128xf32>
    %233 = arith.divf %231, %232 : vector<8x128xf32>
    %234 = vector.extract_strided_slice %227 {offsets = [0, 128], sizes = [8, 128], strides = [1, 1]} : vector<8x512xf32> to vector<8x128xf32>
    %235 = arith.negf %234 : vector<8x128xf32>
    %236 = math.exp %235 : vector<8x128xf32>
    %cst_47 = arith.constant 1.000000e+00 : f32
    %237 = vector.broadcast %cst_47 : f32 to vector<8x128xf32>
    %238 = arith.addf %237, %236 : vector<8x128xf32>
    %239 = arith.divf %237, %238 : vector<8x128xf32>
    %240 = vector.extract_strided_slice %227 {offsets = [0, 256], sizes = [8, 128], strides = [1, 1]} : vector<8x512xf32> to vector<8x128xf32>
    %241 = math.tanh %240 : vector<8x128xf32>
    %242 = vector.extract_strided_slice %227 {offsets = [0, 384], sizes = [8, 128], strides = [1, 1]} : vector<8x512xf32> to vector<8x128xf32>
    %243 = arith.negf %242 : vector<8x128xf32>
    %244 = math.exp %243 : vector<8x128xf32>
    %cst_48 = arith.constant 1.000000e+00 : f32
    %245 = vector.broadcast %cst_48 : f32 to vector<8x128xf32>
    %246 = arith.addf %245, %244 : vector<8x128xf32>
    %247 = arith.divf %245, %246 : vector<8x128xf32>
    %248 = arith.mulf %239, %220 : vector<8x128xf32>
    %249 = arith.mulf %233, %241 : vector<8x128xf32>
    %250 = arith.addf %248, %249 : vector<8x128xf32>
    %251 = math.tanh %250 : vector<8x128xf32>
    %252 = arith.mulf %247, %251 : vector<8x128xf32>
    %c56 = arith.constant 56 : index
    %c0_49 = arith.constant 0 : index
    %253 = vector.load %arg12[%c56, %c0_49] : memref<64x128xf32, #tpu.memory_space<vmem>>, vector<8x128xf32>
    tpu.vector_store %arg12[%c56, %c0_49], %252 {strides = array<i32>} : memref<64x128xf32, #tpu.memory_space<vmem>>, vector<8x128xf32>,
    %c0_i32_50 = arith.constant 0 : i32
    %254 = tpu.memref_slice %arg15[%c0_i32_50] : memref<2x!tpu.dma_semaphore, #tpu.memory_space<semaphore_mem>> -> memref<1x!tpu.dma_semaphore, #tpu.memory_space<semaphore_mem>>
    %255 = tpu.memref_squeeze %254 : memref<1x!tpu.dma_semaphore, #tpu.memory_space<semaphore_mem>> -> memref<!tpu.dma_semaphore, #tpu.memory_space<semaphore_mem>>
    tpu.wait_dma2 semaphore(%255 : memref<!tpu.dma_semaphore, #tpu.memory_space<semaphore_mem>>) src(%arg4 : memref<128x512xbf16, #tpu.memory_space<any>>) dst(%arg13 : memref<128x512xbf16, #tpu.memory_space<vmem>>)
    %c1_i32_51 = arith.constant 1 : i32
    %256 = tpu.memref_slice %arg15[%c1_i32_51] : memref<2x!tpu.dma_semaphore, #tpu.memory_space<semaphore_mem>> -> memref<1x!tpu.dma_semaphore, #tpu.memory_space<semaphore_mem>>
    %257 = tpu.memref_squeeze %256 : memref<1x!tpu.dma_semaphore, #tpu.memory_space<semaphore_mem>> -> memref<!tpu.dma_semaphore, #tpu.memory_space<semaphore_mem>>
    tpu.wait_dma2 semaphore(%257 : memref<!tpu.dma_semaphore, #tpu.memory_space<semaphore_mem>>) src(%arg5 : memref<128x512xbf16, #tpu.memory_space<any>>) dst(%arg14 : memref<128x512xbf16, #tpu.memory_space<vmem>>)
    %c0_52 = arith.constant 0 : index
    %c0_53 = arith.constant 0 : index
    %258 = vector.load %arg12[%c0_52, %c0_53] : memref<64x128xf32, #tpu.memory_space<vmem>>, vector<64x128xf32>
    %259 = arith.truncf %258 : vector<64x128xf32> to vector<64x128xbf16>
    %c0_54 = arith.constant 0 : index
    %c0_55 = arith.constant 0 : index
    %260 = vector.load %arg13[%c0_54, %c0_55] : memref<128x512xbf16, #tpu.memory_space<vmem>>, vector<128x512xbf16>
    %c0_56 = arith.constant 0 : index
    %c0_57 = arith.constant 0 : index
    %261 = vector.load %arg14[%c0_56, %c0_57] : memref<128x512xbf16, #tpu.memory_space<vmem>>, vector<128x512xbf16>
    %c0_58 = arith.constant 0 : index
    %c0_59 = arith.constant 0 : index
    %262 = vector.load %arg6[%c0_58, %c0_59] : memref<1x512xf32, #tpu.memory_space<vmem>>, vector<1x512xf32>
    %cst_60 = arith.constant dense<0.000000e+00> : vector<64x512xf32>
    %263 = tpu.matmul %259, %260, %cst_60 {dimension_numbers = #tpu.dot_dimension_numbers<[1], [0], [0], [1], [0, 0, 1, 1], [], []>} : vector<64x128xbf16>, vector<128x512xbf16>, vector<64x512xf32> -> vector<64x512xf32>
    %264 = vector.broadcast %262 : vector<1x512xf32> to vector<64x512xf32>
    %265 = arith.addf %263, %264 : vector<64x512xf32>
    %cst_61 = arith.constant 0.000000e+00 : f32
    %266 = vector.broadcast %cst_61 : f32 to vector<8x128xf32>
    %cst_62 = arith.constant 0.000000e+00 : f32
    %267 = vector.broadcast %cst_62 : f32 to vector<8x128xf32>
    %268 = vector.extract_strided_slice %265 {offsets = [0, 0], sizes = [8, 512], strides = [1, 1]} : vector<64x512xf32> to vector<8x512xf32>
    %269 = arith.truncf %266 : vector<8x128xf32> to vector<8x128xbf16>
    %cst_63 = arith.constant dense<0.000000e+00> : vector<8x512xf32>
    %270 = tpu.matmul %269, %261, %cst_63 {dimension_numbers = #tpu.dot_dimension_numbers<[1], [0], [0], [1], [0, 0, 1, 1], [], []>} : vector<8x128xbf16>, vector<128x512xbf16>, vector<8x512xf32> -> vector<8x512xf32>
    %271 = arith.addf %268, %270 : vector<8x512xf32>
    %272 = vector.extract_strided_slice %271 {offsets = [0, 0], sizes = [8, 128], strides = [1, 1]} : vector<8x512xf32> to vector<8x128xf32>
    %273 = arith.negf %272 : vector<8x128xf32>
    %274 = math.exp %273 : vector<8x128xf32>
    %cst_64 = arith.constant 1.000000e+00 : f32
    %275 = vector.broadcast %cst_64 : f32 to vector<8x128xf32>
    %276 = arith.addf %275, %274 : vector<8x128xf32>
    %277 = arith.divf %275, %276 : vector<8x128xf32>
    %278 = vector.extract_strided_slice %271 {offsets = [0, 128], sizes = [8, 128], strides = [1, 1]} : vector<8x512xf32> to vector<8x128xf32>
    %279 = arith.negf %278 : vector<8x128xf32>
    %280 = math.exp %279 : vector<8x128xf32>
    %cst_65 = arith.constant 1.000000e+00 : f32
    %281 = vector.broadcast %cst_65 : f32 to vector<8x128xf32>
    %282 = arith.addf %281, %280 : vector<8x128xf32>
    %283 = arith.divf %281, %282 : vector<8x128xf32>
    %284 = vector.extract_strided_slice %271 {offsets = [0, 256], sizes = [8, 128], strides = [1, 1]} : vector<8x512xf32> to vector<8x128xf32>
    %285 = math.tanh %284 : vector<8x128xf32>
    %286 = vector.extract_strided_slice %271 {offsets = [0, 384], sizes = [8, 128], strides = [1, 1]} : vector<8x512xf32> to vector<8x128xf32>
    %287 = arith.negf %286 : vector<8x128xf32>
    %288 = math.exp %287 : vector<8x128xf32>
    %cst_66 = arith.constant 1.000000e+00 : f32
    %289 = vector.broadcast %cst_66 : f32 to vector<8x128xf32>
    %290 = arith.addf %289, %288 : vector<8x128xf32>
    %291 = arith.divf %289, %290 : vector<8x128xf32>
    %292 = arith.mulf %283, %267 : vector<8x128xf32>
    %293 = arith.mulf %277, %285 : vector<8x128xf32>
    %294 = arith.addf %292, %293 : vector<8x128xf32>
    %295 = math.tanh %294 : vector<8x128xf32>
    %296 = arith.mulf %291, %295 : vector<8x128xf32>
    %297 = vector.extract_strided_slice %265 {offsets = [8, 0], sizes = [8, 512], strides = [1, 1]} : vector<64x512xf32> to vector<8x512xf32>
    %298 = arith.truncf %296 : vector<8x128xf32> to vector<8x128xbf16>
    %cst_67 = arith.constant dense<0.000000e+00> : vector<8x512xf32>
    %299 = tpu.matmul %298, %261, %cst_67 {dimension_numbers = #tpu.dot_dimension_numbers<[1], [0], [0], [1], [0, 0, 1, 1], [], []>} : vector<8x128xbf16>, vector<128x512xbf16>, vector<8x512xf32> -> vector<8x512xf32>
    %300 = arith.addf %297, %299 : vector<8x512xf32>
    %301 = vector.extract_strided_slice %300 {offsets = [0, 0], sizes = [8, 128], strides = [1, 1]} : vector<8x512xf32> to vector<8x128xf32>
    %302 = arith.negf %301 : vector<8x128xf32>
    %303 = math.exp %302 : vector<8x128xf32>
    %cst_68 = arith.constant 1.000000e+00 : f32
    %304 = vector.broadcast %cst_68 : f32 to vector<8x128xf32>
    %305 = arith.addf %304, %303 : vector<8x128xf32>
    %306 = arith.divf %304, %305 : vector<8x128xf32>
    %307 = vector.extract_strided_slice %300 {offsets = [0, 128], sizes = [8, 128], strides = [1, 1]} : vector<8x512xf32> to vector<8x128xf32>
    %308 = arith.negf %307 : vector<8x128xf32>
    %309 = math.exp %308 : vector<8x128xf32>
    %cst_69 = arith.constant 1.000000e+00 : f32
    %310 = vector.broadcast %cst_69 : f32 to vector<8x128xf32>
    %311 = arith.addf %310, %309 : vector<8x128xf32>
    %312 = arith.divf %310, %311 : vector<8x128xf32>
    %313 = vector.extract_strided_slice %300 {offsets = [0, 256], sizes = [8, 128], strides = [1, 1]} : vector<8x512xf32> to vector<8x128xf32>
    %314 = math.tanh %313 : vector<8x128xf32>
    %315 = vector.extract_strided_slice %300 {offsets = [0, 384], sizes = [8, 128], strides = [1, 1]} : vector<8x512xf32> to vector<8x128xf32>
    %316 = arith.negf %315 : vector<8x128xf32>
    %317 = math.exp %316 : vector<8x128xf32>
    %cst_70 = arith.constant 1.000000e+00 : f32
    %318 = vector.broadcast %cst_70 : f32 to vector<8x128xf32>
    %319 = arith.addf %318, %317 : vector<8x128xf32>
    %320 = arith.divf %318, %319 : vector<8x128xf32>
    %321 = arith.mulf %312, %294 : vector<8x128xf32>
    %322 = arith.mulf %306, %314 : vector<8x128xf32>
    %323 = arith.addf %321, %322 : vector<8x128xf32>
    %324 = math.tanh %323 : vector<8x128xf32>
    %325 = arith.mulf %320, %324 : vector<8x128xf32>
    %326 = vector.extract_strided_slice %265 {offsets = [16, 0], sizes = [8, 512], strides = [1, 1]} : vector<64x512xf32> to vector<8x512xf32>
    %327 = arith.truncf %325 : vector<8x128xf32> to vector<8x128xbf16>
    %cst_71 = arith.constant dense<0.000000e+00> : vector<8x512xf32>
    %328 = tpu.matmul %327, %261, %cst_71 {dimension_numbers = #tpu.dot_dimension_numbers<[1], [0], [0], [1], [0, 0, 1, 1], [], []>} : vector<8x128xbf16>, vector<128x512xbf16>, vector<8x512xf32> -> vector<8x512xf32>
    %329 = arith.addf %326, %328 : vector<8x512xf32>
    %330 = vector.extract_strided_slice %329 {offsets = [0, 0], sizes = [8, 128], strides = [1, 1]} : vector<8x512xf32> to vector<8x128xf32>
    %331 = arith.negf %330 : vector<8x128xf32>
    %332 = math.exp %331 : vector<8x128xf32>
    %cst_72 = arith.constant 1.000000e+00 : f32
    %333 = vector.broadcast %cst_72 : f32 to vector<8x128xf32>
    %334 = arith.addf %333, %332 : vector<8x128xf32>
    %335 = arith.divf %333, %334 : vector<8x128xf32>
    %336 = vector.extract_strided_slice %329 {offsets = [0, 128], sizes = [8, 128], strides = [1, 1]} : vector<8x512xf32> to vector<8x128xf32>
    %337 = arith.negf %336 : vector<8x128xf32>
    %338 = math.exp %337 : vector<8x128xf32>
    %cst_73 = arith.constant 1.000000e+00 : f32
    %339 = vector.broadcast %cst_73 : f32 to vector<8x128xf32>
    %340 = arith.addf %339, %338 : vector<8x128xf32>
    %341 = arith.divf %339, %340 : vector<8x128xf32>
    %342 = vector.extract_strided_slice %329 {offsets = [0, 256], sizes = [8, 128], strides = [1, 1]} : vector<8x512xf32> to vector<8x128xf32>
    %343 = math.tanh %342 : vector<8x128xf32>
    %344 = vector.extract_strided_slice %329 {offsets = [0, 384], sizes = [8, 128], strides = [1, 1]} : vector<8x512xf32> to vector<8x128xf32>
    %345 = arith.negf %344 : vector<8x128xf32>
    %346 = math.exp %345 : vector<8x128xf32>
    %cst_74 = arith.constant 1.000000e+00 : f32
    %347 = vector.broadcast %cst_74 : f32 to vector<8x128xf32>
    %348 = arith.addf %347, %346 : vector<8x128xf32>
    %349 = arith.divf %347, %348 : vector<8x128xf32>
    %350 = arith.mulf %341, %323 : vector<8x128xf32>
    %351 = arith.mulf %335, %343 : vector<8x128xf32>
    %352 = arith.addf %350, %351 : vector<8x128xf32>
    %353 = math.tanh %352 : vector<8x128xf32>
    %354 = arith.mulf %349, %353 : vector<8x128xf32>
    %355 = vector.extract_strided_slice %265 {offsets = [24, 0], sizes = [8, 512], strides = [1, 1]} : vector<64x512xf32> to vector<8x512xf32>
    %356 = arith.truncf %354 : vector<8x128xf32> to vector<8x128xbf16>
    %cst_75 = arith.constant dense<0.000000e+00> : vector<8x512xf32>
    %357 = tpu.matmul %356, %261, %cst_75 {dimension_numbers = #tpu.dot_dimension_numbers<[1], [0], [0], [1], [0, 0, 1, 1], [], []>} : vector<8x128xbf16>, vector<128x512xbf16>, vector<8x512xf32> -> vector<8x512xf32>
    %358 = arith.addf %355, %357 : vector<8x512xf32>
    %359 = vector.extract_strided_slice %358 {offsets = [0, 0], sizes = [8, 128], strides = [1, 1]} : vector<8x512xf32> to vector<8x128xf32>
    %360 = arith.negf %359 : vector<8x128xf32>
    %361 = math.exp %360 : vector<8x128xf32>
    %cst_76 = arith.constant 1.000000e+00 : f32
    %362 = vector.broadcast %cst_76 : f32 to vector<8x128xf32>
    %363 = arith.addf %362, %361 : vector<8x128xf32>
    %364 = arith.divf %362, %363 : vector<8x128xf32>
    %365 = vector.extract_strided_slice %358 {offsets = [0, 128], sizes = [8, 128], strides = [1, 1]} : vector<8x512xf32> to vector<8x128xf32>
    %366 = arith.negf %365 : vector<8x128xf32>
    %367 = math.exp %366 : vector<8x128xf32>
    %cst_77 = arith.constant 1.000000e+00 : f32
    %368 = vector.broadcast %cst_77 : f32 to vector<8x128xf32>
    %369 = arith.addf %368, %367 : vector<8x128xf32>
    %370 = arith.divf %368, %369 : vector<8x128xf32>
    %371 = vector.extract_strided_slice %358 {offsets = [0, 256], sizes = [8, 128], strides = [1, 1]} : vector<8x512xf32> to vector<8x128xf32>
    %372 = math.tanh %371 : vector<8x128xf32>
    %373 = vector.extract_strided_slice %358 {offsets = [0, 384], sizes = [8, 128], strides = [1, 1]} : vector<8x512xf32> to vector<8x128xf32>
    %374 = arith.negf %373 : vector<8x128xf32>
    %375 = math.exp %374 : vector<8x128xf32>
    %cst_78 = arith.constant 1.000000e+00 : f32
    %376 = vector.broadcast %cst_78 : f32 to vector<8x128xf32>
    %377 = arith.addf %376, %375 : vector<8x128xf32>
    %378 = arith.divf %376, %377 : vector<8x128xf32>
    %379 = arith.mulf %370, %352 : vector<8x128xf32>
    %380 = arith.mulf %364, %372 : vector<8x128xf32>
    %381 = arith.addf %379, %380 : vector<8x128xf32>
    %382 = math.tanh %381 : vector<8x128xf32>
    %383 = arith.mulf %378, %382 : vector<8x128xf32>
    %384 = vector.extract_strided_slice %265 {offsets = [32, 0], sizes = [8, 512], strides = [1, 1]} : vector<64x512xf32> to vector<8x512xf32>
    %385 = arith.truncf %383 : vector<8x128xf32> to vector<8x128xbf16>
    %cst_79 = arith.constant dense<0.000000e+00> : vector<8x512xf32>
    %386 = tpu.matmul %385, %261, %cst_79 {dimension_numbers = #tpu.dot_dimension_numbers<[1], [0], [0], [1], [0, 0, 1, 1], [], []>} : vector<8x128xbf16>, vector<128x512xbf16>, vector<8x512xf32> -> vector<8x512xf32>
    %387 = arith.addf %384, %386 : vector<8x512xf32>
    %388 = vector.extract_strided_slice %387 {offsets = [0, 0], sizes = [8, 128], strides = [1, 1]} : vector<8x512xf32> to vector<8x128xf32>
    %389 = arith.negf %388 : vector<8x128xf32>
    %390 = math.exp %389 : vector<8x128xf32>
    %cst_80 = arith.constant 1.000000e+00 : f32
    %391 = vector.broadcast %cst_80 : f32 to vector<8x128xf32>
    %392 = arith.addf %391, %390 : vector<8x128xf32>
    %393 = arith.divf %391, %392 : vector<8x128xf32>
    %394 = vector.extract_strided_slice %387 {offsets = [0, 128], sizes = [8, 128], strides = [1, 1]} : vector<8x512xf32> to vector<8x128xf32>
    %395 = arith.negf %394 : vector<8x128xf32>
    %396 = math.exp %395 : vector<8x128xf32>
    %cst_81 = arith.constant 1.000000e+00 : f32
    %397 = vector.broadcast %cst_81 : f32 to vector<8x128xf32>
    %398 = arith.addf %397, %396 : vector<8x128xf32>
    %399 = arith.divf %397, %398 : vector<8x128xf32>
    %400 = vector.extract_strided_slice %387 {offsets = [0, 256], sizes = [8, 128], strides = [1, 1]} : vector<8x512xf32> to vector<8x128xf32>
    %401 = math.tanh %400 : vector<8x128xf32>
    %402 = vector.extract_strided_slice %387 {offsets = [0, 384], sizes = [8, 128], strides = [1, 1]} : vector<8x512xf32> to vector<8x128xf32>
    %403 = arith.negf %402 : vector<8x128xf32>
    %404 = math.exp %403 : vector<8x128xf32>
    %cst_82 = arith.constant 1.000000e+00 : f32
    %405 = vector.broadcast %cst_82 : f32 to vector<8x128xf32>
    %406 = arith.addf %405, %404 : vector<8x128xf32>
    %407 = arith.divf %405, %406 : vector<8x128xf32>
    %408 = arith.mulf %399, %381 : vector<8x128xf32>
    %409 = arith.mulf %393, %401 : vector<8x128xf32>
    %410 = arith.addf %408, %409 : vector<8x128xf32>
    %411 = math.tanh %410 : vector<8x128xf32>
    %412 = arith.mulf %407, %411 : vector<8x128xf32>
    %413 = vector.extract_strided_slice %265 {offsets = [40, 0], sizes = [8, 512], strides = [1, 1]} : vector<64x512xf32> to vector<8x512xf32>
    %414 = arith.truncf %412 : vector<8x128xf32> to vector<8x128xbf16>
    %cst_83 = arith.constant dense<0.000000e+00> : vector<8x512xf32>
    %415 = tpu.matmul %414, %261, %cst_83 {dimension_numbers = #tpu.dot_dimension_numbers<[1], [0], [0], [1], [0, 0, 1, 1], [], []>} : vector<8x128xbf16>, vector<128x512xbf16>, vector<8x512xf32> -> vector<8x512xf32>
    %416 = arith.addf %413, %415 : vector<8x512xf32>
    %417 = vector.extract_strided_slice %416 {offsets = [0, 0], sizes = [8, 128], strides = [1, 1]} : vector<8x512xf32> to vector<8x128xf32>
    %418 = arith.negf %417 : vector<8x128xf32>
    %419 = math.exp %418 : vector<8x128xf32>
    %cst_84 = arith.constant 1.000000e+00 : f32
    %420 = vector.broadcast %cst_84 : f32 to vector<8x128xf32>
    %421 = arith.addf %420, %419 : vector<8x128xf32>
    %422 = arith.divf %420, %421 : vector<8x128xf32>
    %423 = vector.extract_strided_slice %416 {offsets = [0, 128], sizes = [8, 128], strides = [1, 1]} : vector<8x512xf32> to vector<8x128xf32>
    %424 = arith.negf %423 : vector<8x128xf32>
    %425 = math.exp %424 : vector<8x128xf32>
    %cst_85 = arith.constant 1.000000e+00 : f32
    %426 = vector.broadcast %cst_85 : f32 to vector<8x128xf32>
    %427 = arith.addf %426, %425 : vector<8x128xf32>
    %428 = arith.divf %426, %427 : vector<8x128xf32>
    %429 = vector.extract_strided_slice %416 {offsets = [0, 256], sizes = [8, 128], strides = [1, 1]} : vector<8x512xf32> to vector<8x128xf32>
    %430 = math.tanh %429 : vector<8x128xf32>
    %431 = vector.extract_strided_slice %416 {offsets = [0, 384], sizes = [8, 128], strides = [1, 1]} : vector<8x512xf32> to vector<8x128xf32>
    %432 = arith.negf %431 : vector<8x128xf32>
    %433 = math.exp %432 : vector<8x128xf32>
    %cst_86 = arith.constant 1.000000e+00 : f32
    %434 = vector.broadcast %cst_86 : f32 to vector<8x128xf32>
    %435 = arith.addf %434, %433 : vector<8x128xf32>
    %436 = arith.divf %434, %435 : vector<8x128xf32>
    %437 = arith.mulf %428, %410 : vector<8x128xf32>
    %438 = arith.mulf %422, %430 : vector<8x128xf32>
    %439 = arith.addf %437, %438 : vector<8x128xf32>
    %440 = math.tanh %439 : vector<8x128xf32>
    %441 = arith.mulf %436, %440 : vector<8x128xf32>
    %442 = vector.extract_strided_slice %265 {offsets = [48, 0], sizes = [8, 512], strides = [1, 1]} : vector<64x512xf32> to vector<8x512xf32>
    %443 = arith.truncf %441 : vector<8x128xf32> to vector<8x128xbf16>
    %cst_87 = arith.constant dense<0.000000e+00> : vector<8x512xf32>
    %444 = tpu.matmul %443, %261, %cst_87 {dimension_numbers = #tpu.dot_dimension_numbers<[1], [0], [0], [1], [0, 0, 1, 1], [], []>} : vector<8x128xbf16>, vector<128x512xbf16>, vector<8x512xf32> -> vector<8x512xf32>
    %445 = arith.addf %442, %444 : vector<8x512xf32>
    %446 = vector.extract_strided_slice %445 {offsets = [0, 0], sizes = [8, 128], strides = [1, 1]} : vector<8x512xf32> to vector<8x128xf32>
    %447 = arith.negf %446 : vector<8x128xf32>
    %448 = math.exp %447 : vector<8x128xf32>
    %cst_88 = arith.constant 1.000000e+00 : f32
    %449 = vector.broadcast %cst_88 : f32 to vector<8x128xf32>
    %450 = arith.addf %449, %448 : vector<8x128xf32>
    %451 = arith.divf %449, %450 : vector<8x128xf32>
    %452 = vector.extract_strided_slice %445 {offsets = [0, 128], sizes = [8, 128], strides = [1, 1]} : vector<8x512xf32> to vector<8x128xf32>
    %453 = arith.negf %452 : vector<8x128xf32>
    %454 = math.exp %453 : vector<8x128xf32>
    %cst_89 = arith.constant 1.000000e+00 : f32
    %455 = vector.broadcast %cst_89 : f32 to vector<8x128xf32>
    %456 = arith.addf %455, %454 : vector<8x128xf32>
    %457 = arith.divf %455, %456 : vector<8x128xf32>
    %458 = vector.extract_strided_slice %445 {offsets = [0, 256], sizes = [8, 128], strides = [1, 1]} : vector<8x512xf32> to vector<8x128xf32>
    %459 = math.tanh %458 : vector<8x128xf32>
    %460 = vector.extract_strided_slice %445 {offsets = [0, 384], sizes = [8, 128], strides = [1, 1]} : vector<8x512xf32> to vector<8x128xf32>
    %461 = arith.negf %460 : vector<8x128xf32>
    %462 = math.exp %461 : vector<8x128xf32>
    %cst_90 = arith.constant 1.000000e+00 : f32
    %463 = vector.broadcast %cst_90 : f32 to vector<8x128xf32>
    %464 = arith.addf %463, %462 : vector<8x128xf32>
    %465 = arith.divf %463, %464 : vector<8x128xf32>
    %466 = arith.mulf %457, %439 : vector<8x128xf32>
    %467 = arith.mulf %451, %459 : vector<8x128xf32>
    %468 = arith.addf %466, %467 : vector<8x128xf32>
    %469 = math.tanh %468 : vector<8x128xf32>
    %470 = arith.mulf %465, %469 : vector<8x128xf32>
    %471 = vector.extract_strided_slice %265 {offsets = [56, 0], sizes = [8, 512], strides = [1, 1]} : vector<64x512xf32> to vector<8x512xf32>
    %472 = arith.truncf %470 : vector<8x128xf32> to vector<8x128xbf16>
    %cst_91 = arith.constant dense<0.000000e+00> : vector<8x512xf32>
    %473 = tpu.matmul %472, %261, %cst_91 {dimension_numbers = #tpu.dot_dimension_numbers<[1], [0], [0], [1], [0, 0, 1, 1], [], []>} : vector<8x128xbf16>, vector<128x512xbf16>, vector<8x512xf32> -> vector<8x512xf32>
    %474 = arith.addf %471, %473 : vector<8x512xf32>
    %475 = vector.extract_strided_slice %474 {offsets = [0, 0], sizes = [8, 128], strides = [1, 1]} : vector<8x512xf32> to vector<8x128xf32>
    %476 = arith.negf %475 : vector<8x128xf32>
    %477 = math.exp %476 : vector<8x128xf32>
    %cst_92 = arith.constant 1.000000e+00 : f32
    %478 = vector.broadcast %cst_92 : f32 to vector<8x128xf32>
    %479 = arith.addf %478, %477 : vector<8x128xf32>
    %480 = arith.divf %478, %479 : vector<8x128xf32>
    %481 = vector.extract_strided_slice %474 {offsets = [0, 128], sizes = [8, 128], strides = [1, 1]} : vector<8x512xf32> to vector<8x128xf32>
    %482 = arith.negf %481 : vector<8x128xf32>
    %483 = math.exp %482 : vector<8x128xf32>
    %cst_93 = arith.constant 1.000000e+00 : f32
    %484 = vector.broadcast %cst_93 : f32 to vector<8x128xf32>
    %485 = arith.addf %484, %483 : vector<8x128xf32>
    %486 = arith.divf %484, %485 : vector<8x128xf32>
    %487 = vector.extract_strided_slice %474 {offsets = [0, 256], sizes = [8, 128], strides = [1, 1]} : vector<8x512xf32> to vector<8x128xf32>
    %488 = math.tanh %487 : vector<8x128xf32>
    %489 = vector.extract_strided_slice %474 {offsets = [0, 384], sizes = [8, 128], strides = [1, 1]} : vector<8x512xf32> to vector<8x128xf32>
    %490 = arith.negf %489 : vector<8x128xf32>
    %491 = math.exp %490 : vector<8x128xf32>
    %cst_94 = arith.constant 1.000000e+00 : f32
    %492 = vector.broadcast %cst_94 : f32 to vector<8x128xf32>
    %493 = arith.addf %492, %491 : vector<8x128xf32>
    %494 = arith.divf %492, %493 : vector<8x128xf32>
    %495 = arith.mulf %486, %468 : vector<8x128xf32>
    %496 = arith.mulf %480, %488 : vector<8x128xf32>
    %497 = arith.addf %495, %496 : vector<8x128xf32>
    %498 = math.tanh %497 : vector<8x128xf32>
    %499 = arith.mulf %494, %498 : vector<8x128xf32>
    %cst_95 = arith.constant dense<0.000000e+00> : vector<8xf32>
    %500 = vector.multi_reduction <add>, %499, %cst_95 [1] : vector<8x128xf32> to vector<8xf32>
    %501 = vector.shape_cast %500 : vector<8xf32> to vector<8x1xf32>
    %cst_96 = arith.constant 1.280000e+02 : f32
    %502 = vector.broadcast %cst_96 : f32 to vector<8x1xf32>
    %503 = arith.divf %501, %502 : vector<8x1xf32>
    %504 = vector.broadcast %503 : vector<8x1xf32> to vector<8x128xf32>
    %505 = arith.subf %499, %504 : vector<8x128xf32>
    %506 = arith.mulf %505, %505 : vector<8x128xf32>
    %cst_97 = arith.constant dense<0.000000e+00> : vector<8xf32>
    %507 = vector.multi_reduction <add>, %506, %cst_97 [1] : vector<8x128xf32> to vector<8xf32>
    %508 = vector.shape_cast %507 : vector<8xf32> to vector<8x1xf32>
    %cst_98 = arith.constant 1.280000e+02 : f32
    %509 = vector.broadcast %cst_98 : f32 to vector<8x1xf32>
    %510 = arith.divf %508, %509 : vector<8x1xf32>
    %511 = vector.broadcast %503 : vector<8x1xf32> to vector<8x128xf32>
    %512 = arith.subf %499, %511 : vector<8x128xf32>
    %cst_99 = arith.constant 9.99999974E-6 : f32
    %513 = vector.broadcast %cst_99 : f32 to vector<8x1xf32>
    %514 = arith.addf %510, %513 : vector<8x1xf32>
    %515 = math.rsqrt %514 : vector<8x1xf32>
    %516 = vector.broadcast %515 : vector<8x1xf32> to vector<8x128xf32>
    %517 = arith.mulf %512, %516 : vector<8x128xf32>
    %c0_100 = arith.constant 0 : index
    %c0_101 = arith.constant 0 : index
    %518 = vector.load %arg7[%c0_100, %c0_101] : memref<1x128xf32, #tpu.memory_space<vmem>>, vector<1x128xf32>
    %519 = vector.broadcast %518 : vector<1x128xf32> to vector<8x128xf32>
    %520 = arith.mulf %517, %519 : vector<8x128xf32>
    %c0_102 = arith.constant 0 : index
    %c0_103 = arith.constant 0 : index
    %521 = vector.load %arg8[%c0_102, %c0_103] : memref<1x128xf32, #tpu.memory_space<vmem>>, vector<1x128xf32>
    %522 = vector.broadcast %521 : vector<1x128xf32> to vector<8x128xf32>
    %523 = arith.addf %520, %522 : vector<8x128xf32>
    %524 = arith.truncf %523 : vector<8x128xf32> to vector<8x128xbf16>
    %c0_104 = arith.constant 0 : index
    %c0_105 = arith.constant 0 : index
    %525 = vector.load %arg9[%c0_104, %c0_105] : memref<128x128xbf16, #tpu.memory_space<vmem>>, vector<128x128xbf16>
    %cst_106 = arith.constant dense<0.000000e+00> : vector<8x128xf32>
    %526 = tpu.matmul %524, %525, %cst_106 {dimension_numbers = #tpu.dot_dimension_numbers<[1], [0], [0], [1], [0, 0, 1, 1], [], []>} : vector<8x128xbf16>, vector<128x128xbf16>, vector<8x128xf32> -> vector<8x128xf32>
    %c0_107 = arith.constant 0 : index
    %c0_108 = arith.constant 0 : index
    %527 = vector.load %arg10[%c0_107, %c0_108] : memref<1x128xf32, #tpu.memory_space<vmem>>, vector<1x128xf32>
    %528 = vector.broadcast %527 : vector<1x128xf32> to vector<8x128xf32>
    %529 = arith.addf %526, %528 : vector<8x128xf32>
    %c0_109 = arith.constant 0 : index
    %c0_110 = arith.constant 0 : index
    %530 = vector.load %arg11[%c0_109, %c0_110] : memref<8x128xf32, #tpu.memory_space<vmem>>, vector<8x128xf32>
    tpu.vector_store %arg11[%c0_109, %c0_110], %529 {strides = array<i32>} : memref<8x128xf32, #tpu.memory_space<vmem>>, vector<8x128xf32>,
    return
  }
}

</mosaic_0001>

<bundles_post_ra>
// kernel: skeleton_lstm_classifier.1
= control target key start
LH: loop header
LB: loop body
LE: loop exit
PB: predicated region body
PF: predicated region fallthrough
CT: control target
= control target key end

     0   :  { %16 = vsyncpa [#allocation7], 0  ;;  %s5230_s20 = smov [#allocation6]   ;;  %s5231_s22 = smov 256   ;;  %s6751_s0 = inlined_call_operand.vmem [shape: f32[64,384], index: 0, kind: input, shape index: {}]   ;;  %s6752_s1 = inlined_call_operand.hbm [shape: bf16[384,512], index: 1, kind: input, shape index: {}]   ;;  %s6753_s2 = inlined_call_operand.vmem [shape: bf16[128,512], index: 2, kind: input, shape index: {}]   ;;  %s6754_s3 = inlined_call_operand.vmem [shape: f32[1,512], index: 3, kind: input, shape index: {}]   ;;  %s6755_s4 = inlined_call_operand.hbm [shape: bf16[128,512], index: 4, kind: input, shape index: {}]   ;;  %s6756_s5 = inlined_call_operand.hbm [shape: bf16[128,512], index: 5, kind: input, shape index: {}]   ;;  %s6757_s6 = inlined_call_operand.vmem [shape: f32[1,512], index: 6, kind: input, shape index: {}]   ;;  %s6758_s7 = inlined_call_operand.vmem [shape: f32[1,128], index: 7, kind: input, shape index: {}]   ;;  %s6759_s8 = inlined_call_operand.vmem [shape: f32[1,128], index: 8, kind: input, shape index: {}]   ;;  %s6760_s9 = inlined_call_operand.vmem [shape: bf16[128,128], index: 9, kind: input, shape index: {}]   ;;  %s6761_s10 = inlined_call_operand.vmem [shape: f32[1,128], index: 10, kind: input, shape index: {}]   ;;  %s6762_s11 = inlined_call_operand.vmem [shape: f32[8,128], index: 11, kind: output, shape index: {}]  }
   0x1   :  { %s23_s19 = sshll.u32 %s6752_s1, 4  ;;  %s25_s21 = sshll.u32 %s5230_s20, 4  ;;  %s24_s19 = int_to_ptr.hbm [resolvable:$true] %s23_s19  ;;  %s26_s21 = int_to_ptr.vmem [resolvable:$true] %s25_s21 }
   0x2   :  { %s5232_s23 = smov 16  }
   0x3   :  { %31 = dma.hbm_to_vmem [thread:$0]  %s24_s19, 12288, %s26_s21, [#allocation7], %s5231_s22, %s5231_s22, %s5232_s23  }
   0x4   :  { %5224 = dma.done.wait [#allocation7], 12288  }
   0x5   :  { %5225 = vsyncadd [#allocation7], 4294955008  ;;  %v3946_v0 = vld [vmem:[#allocation6 + $0xe0] sm:$0xf]  ;;  %v4712_v1 = vld [vmem:[#allocation6 + $0xec] sm:$0xf0] }
   0x6   :  { %v4074_v2 = vld [vmem:[#allocation6 + $0x1e0] sm:$0xf]  ;;  %v3947_v3 = vor.u32 %v4712_v1, %v3946_v0  ;;  %v4744_v4 = vld [vmem:[#allocation6 + $0x1ec] sm:$0xf0]  ;;  %v4710_v9 = vld [vmem:[#allocation6 + $0xe4] sm:$0xf] }
   0x7   :  { %v4202_v5 = vld [vmem:[#allocation6 + $0x2e0] sm:$0xf]  ;;  %v4776_v6 = vld [vmem:[#allocation6 + $0x2ec] sm:$0xf0]  ;;  %v4075_v7 = vor.u32 %v4744_v4, %v4074_v2  ;;  %v3948_v10 = vld [vmem:[#allocation6 + $0xf0] sm:$0xf0] }
   0x8   :  { %v4203_v8 = vor.u32 %v4776_v6, %v4202_v5  ;;  %v3930_v11 = vld [vmem:[#allocation6 + $0xc0] sm:$0xf]  ;;  %732 = vmatpush.bf16.msra.mxu0 %v3947_v3  ;;  %v3951_v12 = vor.u32 %v4710_v9, %v3948_v10  ;;  %v4708_v13 = vld [vmem:[#allocation6 + $0xcc] sm:$0xf0]  ;;  %v4706_v20 = vld [vmem:[#allocation6 + $0xc4] sm:$0xf] }
   0x9   :  { %v4058_v14 = vld [vmem:[#allocation6 + $0x1c0] sm:$0xf]  ;;  %v4740_v15 = vld [vmem:[#allocation6 + $0x1cc] sm:$0xf0]  ;;  %761 = vmatpush.bf16.msra.mxu1 %v4075_v7  ;;  %v3931_v16 = vor.u32 %v4708_v13, %v3930_v11  ;;  %v3932_v22 = vld [vmem:[#allocation6 + $0xd0] sm:$0xf0] }
   0xa   :  { %790 = vmatpush.bf16.msra.mxu2 %v4203_v8  ;;  %v4059_v17 = vor.u32 %v4740_v15, %v4058_v14  ;;  %v4186_v18 = vld [vmem:[#allocation6 + $0x2c0] sm:$0xf]  ;;  %v4772_v19 = vld [vmem:[#allocation6 + $0x2cc] sm:$0xf0]  ;;  %819 = vmatpush.bf16.msra.mxu3 %v3951_v12  ;;  %v3935_v25 = vor.u32 %v4706_v20, %v3932_v22  ;;  %v4702_v31 = vld [vmem:[#allocation6 + $0xa4] sm:$0xf] }
   0xb   :  { %v4187_v21 = vor.u32 %v4772_v19, %v4186_v18  ;;  %v3914_v23 = vld [vmem:[#allocation6 + $0xa0] sm:$0xf]  ;;  %v4704_v24 = vld [vmem:[#allocation6 + $0xac] sm:$0xf0]  ;;  %v3916_v32 = vld [vmem:[#allocation6 + $0xb0] sm:$0xf0] }
   0xc   :  { %v4042_v26 = vld [vmem:[#allocation6 + $0x1a0] sm:$0xf]  ;;  %v4736_v27 = vld [vmem:[#allocation6 + $0x1ac] sm:$0xf0]  ;;  %733 = vmatpush.bf16.msra.mxu0 %v3931_v16  ;;  %v3915_v29 = vor.u32 %v4704_v24, %v3914_v23  ;;  %v3919_v38 = vor.u32 %v4702_v31, %v3916_v32  ;;  %v4698_v42 = vld [vmem:[#allocation6 + $0x84] sm:$0xf] }
   0xd   :  { %v4170_v28 = vld [vmem:[#allocation6 + $0x2a0] sm:$0xf]  ;;  %v4768_v30 = vld [vmem:[#allocation6 + $0x2ac] sm:$0xf0]  ;;  %762 = vmatpush.bf16.msra.mxu1 %v4059_v17  ;;  %v4043_v33 = vor.u32 %v4736_v27, %v4042_v26  ;;  %v3900_v43 = vld [vmem:[#allocation6 + $0x90] sm:$0xf0] }
   0xe   :  { %791 = vmatpush.bf16.msra.mxu2 %v4187_v21  ;;  %v4171_v34 = vor.u32 %v4768_v30, %v4170_v28  ;;  %v3898_v35 = vld [vmem:[#allocation6 + $0x80] sm:$0xf]  ;;  %v4700_v36 = vld [vmem:[#allocation6 + $0x8c] sm:$0xf0]  ;;  %820 = vmatpush.bf16.msra.mxu3 %v3935_v25  ;;  %v3903_v50 = vor.u32 %v4698_v42, %v3900_v43  ;;  %v4694_v54 = vld [vmem:[#allocation6 + $0x64] sm:$0xf] }
   0xf   :  { %v4026_v37 = vld [vmem:[#allocation6 + $0x180] sm:$0xf]  ;;  %v4732_v39 = vld [vmem:[#allocation6 + $0x18c] sm:$0xf0]  ;;  %v3899_v44 = vor.u32 %v4700_v36, %v3898_v35  ;;  %v3884_v55 = vld [vmem:[#allocation6 + $0x70] sm:$0xf0] }
  0x10   :  { %v4154_v40 = vld [vmem:[#allocation6 + $0x280] sm:$0xf]  ;;  %v4764_v41 = vld [vmem:[#allocation6 + $0x28c] sm:$0xf0]  ;;  %734 = vmatpush.bf16.msra.mxu0 %v3915_v29  ;;  %v4027_v45 = vor.u32 %v4732_v39, %v4026_v37  ;;  %v3887_v62 = vor.u32 %v4694_v54, %v3884_v55  ;;  %v4690_v2 = vld [vmem:[#allocation6 + $0x44] sm:$0xf] }
  0x11   :  { %763 = vmatpush.bf16.msra.mxu1 %v4043_v33  ;;  %v4155_v46 = vor.u32 %v4764_v41, %v4154_v40  ;;  %v3882_v47 = vld [vmem:[#allocation6 + $0x60] sm:$0xf]  ;;  %v4696_v48 = vld [vmem:[#allocation6 + $0x6c] sm:$0xf0]  ;;  %v3868_v3 = vld [vmem:[#allocation6 + $0x50] sm:$0xf0] }
  0x12   :  { %792 = vmatpush.bf16.msra.mxu2 %v4171_v34  ;;  %v4010_v49 = vld [vmem:[#allocation6 + $0x160] sm:$0xf]  ;;  %821 = vmatpush.bf16.msra.mxu3 %v3919_v38  ;;  %v4728_v51 = vld [vmem:[#allocation6 + $0x16c] sm:$0xf0]  ;;  %v3883_v56 = vor.u32 %v4696_v48, %v3882_v47  ;;  %v3871_v10 = vor.u32 %v4690_v2, %v3868_v3  ;;  %v4686_v14 = vld [vmem:[#allocation6 + $0x24] sm:$0xf] }
  0x13   :  { %v4138_v52 = vld [vmem:[#allocation6 + $0x260] sm:$0xf]  ;;  %v4760_v53 = vld [vmem:[#allocation6 + $0x26c] sm:$0xf0]  ;;  %v4011_v57 = vor.u32 %v4728_v51, %v4010_v49  ;;  %v3852_v15 = vld [vmem:[#allocation6 + $0x30] sm:$0xf0] }
  0x14   :  { %735 = vmatpush.bf16.msra.mxu0 %v3899_v44  ;;  %v4139_v58 = vor.u32 %v4760_v53, %v4138_v52  ;;  %v3866_v59 = vld [vmem:[#allocation6 + $0x40] sm:$0xf]  ;;  %v4692_v60 = vld [vmem:[#allocation6 + $0x4c] sm:$0xf0]  ;;  %v3855_v25 = vor.u32 %v4686_v14, %v3852_v15  ;;  %v4682_v26 = vld [vmem:[#allocation6 + $0x4] sm:$0xf] }
  0x15   :  { %764 = vmatpush.bf16.msra.mxu1 %v4027_v45  ;;  %v3994_v61 = vld [vmem:[#allocation6 + $0x140] sm:$0xf]  ;;  %v4724_v63 = vld [vmem:[#allocation6 + $0x14c] sm:$0xf0]  ;;  %v3867_v4 = vor.u32 %v4692_v60, %v3866_v59  ;;  %v3836_v27 = vld [vmem:[#allocation6 + $0x10] sm:$0xf0] }
  0x16   :  { %793 = vmatpush.bf16.msra.mxu2 %v4155_v46  ;;  %822 = vmatpush.bf16.msra.mxu3 %v3903_v50  ;;  %v4122_v0 = vld [vmem:[#allocation6 + $0x240] sm:$0xf]  ;;  %v4756_v1 = vld [vmem:[#allocation6 + $0x24c] sm:$0xf0]  ;;  %v3995_v5 = vor.u32 %v4724_v63, %v3994_v61  ;;  %v81_v29 = vld [vmem:[%s6751_s0 + $0x18] sm:$0xff]  ;;  %v3839_v41 = vor.u32 %v4682_v26, %v3836_v27  ;;  %s58_s12 = sshll.u32 %s6755_s4, 4  ;;  %s59_s12 = int_to_ptr.hbm [resolvable:$true] %s58_s12 }
  0x17   :  { %v4123_v6 = vor.u32 %v4756_v1, %v4122_v0  ;;  %v3850_v7 = vld [vmem:[#allocation6 + $0x20] sm:$0xf]  ;;  %v4688_v8 = vld [vmem:[#allocation6 + $0x2c] sm:$0xf0]  ;;  %v4742_v30 = vld [vmem:[#allocation6 + $0x1e4] sm:$0xf] }
  0x18   :  { %736 = vmatpush.bf16.msra.mxu0 %v3883_v56  ;;  %v3978_v9 = vld [vmem:[#allocation6 + $0x120] sm:$0xf]  ;;  %v4720_v11 = vld [vmem:[#allocation6 + $0x12c] sm:$0xf0]  ;;  %v3851_v16 = vor.u32 %v4688_v8, %v3850_v7  ;;  %v4076_v31 = vld [vmem:[#allocation6 + $0x1f0] sm:$0xf0] }
  0x19   :  { %765 = vmatpush.bf16.msra.mxu1 %v4011_v57  ;;  %v4106_v12 = vld [vmem:[#allocation6 + $0x220] sm:$0xf]  ;;  %v4752_v13 = vld [vmem:[#allocation6 + $0x22c] sm:$0xf0]  ;;  %v3979_v20 = vor.u32 %v4720_v11, %v3978_v9  ;;  %v79_v33 = vld [vmem:[%s6751_s0 + $0x8] sm:$0xff]  ;;  %v4079_v42 = vor.u32 %v4742_v30, %v4076_v31  ;;  %s5234_s13 = smov [#allocation3]  }
  0x1a   :  { %794 = vmatpush.bf16.msra.mxu2 %v4139_v58  ;;  %823 = vmatpush.bf16.msra.mxu3 %v3887_v62  ;;  %v3834_v17 = vld [vmem:[#allocation6] sm:$0xf]  ;;  %v4684_v18 = vld [vmem:[#allocation6 + $0xc] sm:$0xf0]  ;;  %v4107_v21 = vor.u32 %v4752_v13, %v4106_v12  ;;  %v4774_v34 = vld [vmem:[#allocation6 + $0x2e4] sm:$0xf] }
  0x1b   :  { %v3962_v19 = vld [vmem:[#allocation6 + $0x100] sm:$0xf]  ;;  %v4716_v22 = vld [vmem:[#allocation6 + $0x10c] sm:$0xf0]  ;;  %v3835_v32 = vor.u32 %v4684_v18, %v3834_v17  ;;  %v4204_v35 = vld [vmem:[#allocation6 + $0x2f0] sm:$0xf0] }
  0x1c   :  { %737 = vmatpush.bf16.msra.mxu0 %v3867_v4  ;;  %v4090_v23 = vld [vmem:[#allocation6 + $0x200] sm:$0xf]  ;;  %v4748_v24 = vld [vmem:[#allocation6 + $0x20c] sm:$0xf0]  ;;  %v3963_v36 = vor.u32 %v4716_v22, %v3962_v19  ;;  %v83_v40 = vld [vmem:[%s6751_s0 + $0x28] sm:$0xff]  ;;  %v4207_v47 = vor.u32 %v4774_v34, %v4204_v35  ;;  %s60_s14 = sshll.u32 %s5234_s13, 4  ;;  %s61_s14 = int_to_ptr.vmem [resolvable:$true] %s60_s14 }
  0x1d   :  { %766 = vmatpush.bf16.msra.mxu1 %v3995_v5  ;;  %v78_v28 = vld [vmem:[%s6751_s0] sm:$0xff]  ;;  %v4091_v37 = vor.u32 %v4748_v24, %v4090_v23  ;;  %v80_v39 = vld [vmem:[%s6751_s0 + $0x10] sm:$0xff]  ;;  %v4082_v43 = vld [vmem:[#allocation6 + $0x1e8] sm:$0xf]  ;;  %63 = dma.hbm_to_vmem [thread:$0]  %s59_s12, 4096, %s61_s14, [#allocation5] }
  0x1e   :  { %795 = vmatpush.bf16.msra.mxu2 %v4123_v6  ;;  %824 = vmatpush.bf16.msra.mxu3 %v3871_v10  ;;  %v82_v38 = vld [vmem:[%s6751_s0 + $0x20] sm:$0xff]  ;;  %v3954_v44 = vld [vmem:[#allocation6 + $0xe8] sm:$0xf]  ;;  %v4713_v45 = vld [vmem:[#allocation6 + $0xf4] sm:$0xf0]  ;;  %v5318_v46 = vpack.c.bf16 %v81_v29, %v78_v28  ;;  %v5322_v52 = vpack.c.bf16 %v83_v40, %v80_v39  ;;  %s72_s16 = sshll.u32 %s6756_s5, 4  ;;  %s73_s16 = int_to_ptr.hbm [resolvable:$true] %s72_s16 }
  0x1f   :  { %v4745_v48 = vld [vmem:[#allocation6 + $0x1f4] sm:$0xf0]  ;;  %v4738_v49 = vld [vmem:[#allocation6 + $0x1c4] sm:$0xf]  ;;  %v4060_v50 = vld [vmem:[#allocation6 + $0x1d0] sm:$0xf0]  ;;  %v5320_v51 = vpack.c.bf16 %v82_v38, %v79_v33  ;;  %v3955_v55 = vor.u32 %v4713_v45, %v3954_v44 }
  0x20   :  { %738 = vmatpush.bf16.msra.mxu0 %v3851_v16  ;;  %v4770_v53 = vld [vmem:[#allocation6 + $0x2c4] sm:$0xf]  ;;  %v4188_v54 = vld [vmem:[#allocation6 + $0x2d0] sm:$0xf0]  ;;  %v4083_v56 = vor.u32 %v4745_v48, %v4082_v43  ;;  %v4063_v57 = vor.u32 %v4738_v49, %v4060_v50  ;;  %v4066_v58 = vld [vmem:[#allocation6 + $0x1c8] sm:$0xf] }
  0x21   :  { %767 = vmatpush.bf16.msra.mxu1 %v3979_v20  ;;  %v3938_v59 = vld [vmem:[#allocation6 + $0xc8] sm:$0xf]  ;;  %v4709_v60 = vld [vmem:[#allocation6 + $0xd4] sm:$0xf0]  ;;  %v4191_v61 = vor.u32 %v4770_v53, %v4188_v54  ;;  %v4734_v63 = vld [vmem:[#allocation6 + $0x1a4] sm:$0xf] }
  0x22   :  { %796 = vmatpush.bf16.msra.mxu2 %v4107_v21  ;;  %825 = vmatpush.bf16.msra.mxu3 %v3855_v25  ;;  %v4741_v62 = vld [vmem:[#allocation6 + $0x1d4] sm:$0xf0]  ;;  %v4044_v0 = vld [vmem:[#allocation6 + $0x1b0] sm:$0xf0]  ;;  %v4766_v1 = vld [vmem:[#allocation6 + $0x2a4] sm:$0xf]  ;;  %v3939_v3 = vor.u32 %v4709_v60, %v3938_v59 }
  0x23   :  { %v4172_v2 = vld [vmem:[#allocation6 + $0x2b0] sm:$0xf0]  ;;  %v4067_v4 = vor.u32 %v4741_v62, %v4066_v58  ;;  %v4047_v5 = vor.u32 %v4734_v63, %v4044_v0  ;;  %v4050_v6 = vld [vmem:[#allocation6 + $0x1a8] sm:$0xf]  ;;  %v4705_v8 = vld [vmem:[#allocation6 + $0xb4] sm:$0xf0] }
  0x24   :  { %739 = vmatpush.bf16.msra.mxu0 %v3835_v32  ;;  %v3922_v7 = vld [vmem:[#allocation6 + $0xa8] sm:$0xf]  ;;  %v4175_v9 = vor.u32 %v4766_v1, %v4172_v2  ;;  %v4737_v10 = vld [vmem:[#allocation6 + $0x1b4] sm:$0xf0]  ;;  %v4730_v11 = vld [vmem:[#allocation6 + $0x184] sm:$0xf] }
  0x25   :  { %768 = vmatpush.bf16.msra.mxu1 %v3963_v36  ;;  %v4028_v12 = vld [vmem:[#allocation6 + $0x190] sm:$0xf0]  ;;  %v4762_v13 = vld [vmem:[#allocation6 + $0x284] sm:$0xf]  ;;  %v3923_v15 = vor.u32 %v4705_v8, %v3922_v7  ;;  %v87_v17 = vld [vmem:[%s6751_s0 + $0x48] sm:$0xff]  ;;  %v4051_v18 = vor.u32 %v4737_v10, %v4050_v6  ;;  %s5235_s17 = smov [#allocation4]  }
  0x26   :  { %797 = vmatpush.bf16.msra.mxu2 %v4091_v37  ;;  %826 = vmatpush.bf16.msra.mxu3 %v3839_v41  ;;  %v4156_v14 = vld [vmem:[#allocation6 + $0x290] sm:$0xf0]  ;;  %v4031_v19 = vor.u32 %v4730_v11, %v4028_v12  ;;  %v4034_v20 = vld [vmem:[#allocation6 + $0x188] sm:$0xf]  ;;  %v4701_v22 = vld [vmem:[#allocation6 + $0x94] sm:$0xf0] }
  0x27   :  { %740 = vmatmul.bf16.vlgmr.msra.gmra.mxu0 %v5318_v46  ;;  %v84_v16 = vld [vmem:[%s6751_s0 + $0x30] sm:$0xff]  ;;  %v3906_v21 = vld [vmem:[#allocation6 + $0x88] sm:$0xf]  ;;  %v4159_v23 = vor.u32 %v4762_v13, %v4156_v14  ;;  %v4733_v24 = vld [vmem:[#allocation6 + $0x194] sm:$0xf0]  ;;  %s74_s18 = sshll.u32 %s5235_s17, 4  ;;  %s75_s18 = int_to_ptr.vmem [resolvable:$true] %s74_s18 }
  0x28   :  { %848 = vmatpush.bf16.msrb.mxu0 %v4079_v42  ;;  %769 = vmatmul.bf16.vlgmr.msra.gmra.mxu1 %v5320_v51  ;;  %v4726_v25 = vld [vmem:[#allocation6 + $0x164] sm:$0xf]  ;;  %v4012_v26 = vld [vmem:[#allocation6 + $0x170] sm:$0xf0]  ;;  %v85_v27 = vld [vmem:[%s6751_s0 + $0x38] sm:$0xff]  ;;  %v3907_v33 = vor.u32 %v4701_v22, %v3906_v21  ;;  %v4035_v34 = vor.u32 %v4733_v24, %v4034_v20  ;;  %v5346_v39 = vpack.c.bf16 %v87_v17, %v84_v16 }
  0x29   :  { %877 = vmatpush.bf16.msrb.mxu1 %v4207_v47  ;;  %798 = vmatmul.bf16.vlgmr.msra.gmra.mxu2 %v5322_v52  ;;  %v4758_v28 = vld [vmem:[#allocation6 + $0x264] sm:$0xf]  ;;  %v4140_v29 = vld [vmem:[#allocation6 + $0x270] sm:$0xf0]  ;;  %v89_v32 = vld [vmem:[%s6751_s0 + $0x58] sm:$0xff]  ;;  %v4015_v35 = vor.u32 %v4726_v25, %v4012_v26 }
  0x2a   :  { %827 = vmatmul.bf16.vlgmr.msra.gmra.mxu3 %v5318_v46  ;;  %906 = vmatpush.bf16.msrb.mxu2 %v3955_v55  ;;  %v88_v30 = vld [vmem:[%s6751_s0 + $0x50] sm:$0xff]  ;;  %v86_v31 = vld [vmem:[%s6751_s0 + $0x40] sm:$0xff]  ;;  %v4018_v36 = vld [vmem:[#allocation6 + $0x168] sm:$0xf]  ;;  %v4143_v40 = vor.u32 %v4758_v28, %v4140_v29  ;;  %77 = dma.hbm_to_vmem [thread:$0]  %s73_s16, 4096, %s75_s18, [#allocation5 + $0x1] }
  0x2b   :  { %935 = vmatpush.bf16.msrb.mxu3 %v4083_v56  ;;  %v3890_v37 = vld [vmem:[#allocation6 + $0x68] sm:$0xf]  ;;  %v4697_v38 = vld [vmem:[#allocation6 + $0x74] sm:$0xf0]  ;;  %v4722_v42 = vld [vmem:[#allocation6 + $0x144] sm:$0xf]  ;;  %v5348_v44 = vpack.c.bf16 %v88_v30, %v85_v27  ;;  %v5350_v45 = vpack.c.bf16 %v89_v32, %v86_v31 }
  0x2c   :  { %849 = vmatpush.bf16.msrb.mxu0 %v4063_v57  ;;  %v4729_v41 = vld [vmem:[#allocation6 + $0x174] sm:$0xf0]  ;;  %v3996_v43 = vld [vmem:[#allocation6 + $0x150] sm:$0xf0]  ;;  %v4754_v47 = vld [vmem:[#allocation6 + $0x244] sm:$0xf]  ;;  %v3891_v49 = vor.u32 %v4697_v38, %v3890_v37 }
  0x2d   :  { %878 = vmatpush.bf16.msrb.mxu1 %v4191_v61  ;;  %v4124_v48 = vld [vmem:[#allocation6 + $0x250] sm:$0xf0]  ;;  %v4019_v50 = vor.u32 %v4729_v41, %v4018_v36  ;;  %v3999_v53 = vor.u32 %v4722_v42, %v3996_v43  ;;  %v4002_v55 = vld [vmem:[#allocation6 + $0x148] sm:$0xf]  ;;  %v4725_v56 = vld [vmem:[#allocation6 + $0x154] sm:$0xf0] }
  0x2e   :  { %907 = vmatpush.bf16.msrb.mxu2 %v3939_v3  ;;  %v4127_v54 = vor.u32 %v4754_v47, %v4124_v48  ;;  %v4718_v57 = vld [vmem:[#allocation6 + $0x124] sm:$0xf]  ;;  %v3980_v58 = vld [vmem:[#allocation6 + $0x130] sm:$0xf0]  ;;  %v4003_v60 = vor.u32 %v4725_v56, %v4002_v55  ;;  %v3874_v63 = vld [vmem:[#allocation6 + $0x48] sm:$0xf] }
  0x2f   :  { %936 = vmatpush.bf16.msrb.mxu3 %v4067_v4  ;;  %v4750_v59 = vld [vmem:[#allocation6 + $0x224] sm:$0xf]  ;;  %v3983_v61 = vor.u32 %v4718_v57, %v3980_v58  ;;  %v4108_v62 = vld [vmem:[#allocation6 + $0x230] sm:$0xf0]  ;;  %v4693_v0 = vld [vmem:[#allocation6 + $0x54] sm:$0xf0] }
  0x30   :  { %850 = vmatpush.bf16.msrb.mxu0 %v4047_v5  ;;  %v4111_v1 = vor.u32 %v4750_v59, %v4108_v62  ;;  %v3875_v2 = vor.u32 %v4693_v0, %v3874_v63  ;;  %v3986_v3 = vld [vmem:[#allocation6 + $0x128] sm:$0xf]  ;;  %v4721_v4 = vld [vmem:[#allocation6 + $0x134] sm:$0xf0]  ;;  %v4714_v5 = vld [vmem:[#allocation6 + $0x104] sm:$0xf] }
  0x31   :  { %879 = vmatpush.bf16.msrb.mxu1 %v4175_v9  ;;  %v3964_v6 = vld [vmem:[#allocation6 + $0x110] sm:$0xf0]  ;;  %v4746_v7 = vld [vmem:[#allocation6 + $0x204] sm:$0xf]  ;;  %v3858_v9 = vld [vmem:[#allocation6 + $0x28] sm:$0xf]  ;;  %v3987_v11 = vor.u32 %v4721_v4, %v3986_v3 }
  0x32   :  { %908 = vmatpush.bf16.msrb.mxu2 %v3923_v15  ;;  %v4092_v8 = vld [vmem:[#allocation6 + $0x210] sm:$0xf0]  ;;  %v4689_v10 = vld [vmem:[#allocation6 + $0x34] sm:$0xf0]  ;;  %v3967_v12 = vor.u32 %v4714_v5, %v3964_v6  ;;  %v3842_v14 = vld [vmem:[#allocation6 + $0x8] sm:$0xf] }
  0x33   :  { %937 = vmatpush.bf16.msrb.mxu3 %v4051_v18  ;;  %v3859_v13 = vor.u32 %v4689_v10, %v3858_v9  ;;  %v4685_v15 = vld [vmem:[#allocation6 + $0x14] sm:$0xf0]  ;;  %v4095_v16 = vor.u32 %v4746_v7, %v4092_v8  ;;  %v3970_v17 = vld [vmem:[#allocation6 + $0x108] sm:$0xf]  ;;  %v94_v22 = vld [vmem:[%s6751_s0 + $0x80] sm:$0xff] }
  0x34   :  { %851 = vmatpush.bf16.msrb.mxu0 %v4031_v19  ;;  %v4717_v18 = vld [vmem:[#allocation6 + $0x114] sm:$0xf0]  ;;  %v90_v19 = vld [vmem:[%s6751_s0 + $0x60] sm:$0xff]  ;;  %v91_v21 = vld [vmem:[%s6751_s0 + $0x68] sm:$0xff]  ;;  %v3843_v25 = vor.u32 %v4685_v15, %v3842_v14 }
  0x35   :  { %880 = vmatpush.bf16.msrb.mxu1 %v4159_v23  ;;  %v93_v20 = vld [vmem:[%s6751_s0 + $0x78] sm:$0xff]  ;;  %v92_v23 = vld [vmem:[%s6751_s0 + $0x70] sm:$0xff]  ;;  %v95_v24 = vld [vmem:[%s6751_s0 + $0x88] sm:$0xff]  ;;  %v3971_v26 = vor.u32 %v4717_v18, %v3970_v17  ;;  %v5376_v28 = vpack.c.bf16 %v94_v22, %v91_v21 }
  0x36   :  { %909 = vmatpush.bf16.msrb.mxu2 %v3907_v33  ;;  %v5374_v27 = vpack.c.bf16 %v93_v20, %v90_v19  ;;  %v5378_v29 = vpack.c.bf16 %v95_v24, %v92_v23  ;;  %v4210_v30 = vld [vmem:[#allocation6 + $0x2e8] sm:$0xf]  ;;  %v4777_v31 = vld [vmem:[#allocation6 + $0x2f4] sm:$0xf0]  ;;  %v4711_v32 = vld [vmem:[#allocation6 + $0xec] sm:$0xf] }
  0x37   :  { %938 = vmatpush.bf16.msrb.mxu3 %v4035_v34  ;;  %745 = vmatmul.bf16.gmra.mxu0 %v5346_v39  ;;  %v4211_v33 = vor.u32 %v4777_v31, %v4210_v30  ;;  %v3956_v34 = vld [vmem:[#allocation6 + $0xf8] sm:$0xf0]  ;;  %v4773_v41 = vld [vmem:[#allocation6 + $0x2d4] sm:$0xf0]  ;;  %v4707_v42 = vld [vmem:[#allocation6 + $0xcc] sm:$0xf] }
  0x38   :  { %852 = vmatpush.bf16.msrb.mxu0 %v4015_v35  ;;  %774 = vmatmul.bf16.gmra.mxu1 %v5348_v44  ;;  %v4775_v35 = vld [vmem:[#allocation6 + $0x2ec] sm:$0xf]  ;;  %v4212_v36 = vld [vmem:[#allocation6 + $0x2f8] sm:$0xf0]  ;;  %v3959_v37 = vor.u32 %v4711_v32, %v3956_v34  ;;  %v96_v57 = vld [vmem:[%s6751_s0 + $0x90] sm:$0xff] }
  0x39   :  { %881 = vmatpush.bf16.msrb.mxu1 %v4143_v40  ;;  %803 = vmatmul.bf16.gmra.mxu2 %v5350_v45  ;;  %v4215_v38 = vor.u32 %v4775_v35, %v4212_v36  ;;  %v4194_v40 = vld [vmem:[#allocation6 + $0x2c8] sm:$0xf]  ;;  %v3940_v47 = vld [vmem:[#allocation6 + $0xd8] sm:$0xf0]  ;;  %v4771_v48 = vld [vmem:[#allocation6 + $0x2cc] sm:$0xf] }
  0x3a   :  { %832 = vmatmul.bf16.gmra.mxu3 %v5346_v39  ;;  %910 = vmatpush.bf16.msrb.mxu2 %v3891_v49  ;;  %v4195_v43 = vor.u32 %v4773_v41, %v4194_v40  ;;  %v4196_v49 = vld [vmem:[#allocation6 + $0x2d8] sm:$0xf0]  ;;  %v99_v58 = vld [vmem:[%s6751_s0 + $0xa8] sm:$0xff]  ;;  %v4769_v3 = vld [vmem:[#allocation6 + $0x2b4] sm:$0xf0] }
  0x3b   :  { %939 = vmatpush.bf16.msrb.mxu3 %v4019_v50  ;;  %v3943_v50 = vor.u32 %v4707_v42, %v3940_v47  ;;  %v4084_v55 = vld [vmem:[#allocation6 + $0x1f8] sm:$0xf0]  ;;  %v5402_v63 = vpack.c.bf16 %v99_v58, %v96_v57  ;;  %v4703_v4 = vld [vmem:[#allocation6 + $0xac] sm:$0xf]  ;;  %v4765_v15 = vld [vmem:[#allocation6 + $0x294] sm:$0xf0] }
  0x3c   :  { %853 = vmatpush.bf16.msrb.mxu0 %v3999_v53  ;;  %v4199_v53 = vor.u32 %v4771_v48, %v4196_v49  ;;  %v97_v59 = vld [vmem:[%s6751_s0 + $0x98] sm:$0xff]  ;;  %v4767_v7 = vld [vmem:[#allocation6 + $0x2ac] sm:$0xf]  ;;  %v4130_v41 = vld [vmem:[#allocation6 + $0x248] sm:$0xf] }
  0x3d   :  { %882 = vmatpush.bf16.msrb.mxu1 %v4127_v54  ;;  %v4743_v54 = vld [vmem:[#allocation6 + $0x1ec] sm:$0xf]  ;;  %v101_v62 = vld [vmem:[%s6751_s0 + $0xb8] sm:$0xff] }
  0x3e   :  { %911 = vmatpush.bf16.msrb.mxu2 %v3875_v2  ;;  %v4087_v56 = vor.u32 %v4743_v54, %v4084_v55  ;;  %v4178_v2 = vld [vmem:[#allocation6 + $0x2a8] sm:$0xf]  ;;  %v3924_v6 = vld [vmem:[#allocation6 + $0xb8] sm:$0xf0]  ;;  %v4763_v20 = vld [vmem:[#allocation6 + $0x28c] sm:$0xf] }
  0x3f   :  { %940 = vmatpush.bf16.msrb.mxu3 %v4003_v60  ;;  %v100_v60 = vld [vmem:[%s6751_s0 + $0xb0] sm:$0xff]  ;;  %v4179_v5 = vor.u32 %v4769_v3, %v4178_v2  ;;  %v4180_v8 = vld [vmem:[#allocation6 + $0x2b8] sm:$0xf0]  ;;  %v3927_v9 = vor.u32 %v4703_v4, %v3924_v6  ;;  %v4735_v22 = vld [vmem:[#allocation6 + $0x1ac] sm:$0xf] }
  0x40   :  { %854 = vmatpush.bf16.msrb.mxu0 %v3983_v61  ;;  %v98_v61 = vld [vmem:[%s6751_s0 + $0xa0] sm:$0xff]  ;;  %v5404_v0 = vpack.c.bf16 %v100_v60, %v97_v59  ;;  %v4183_v10 = vor.u32 %v4767_v7, %v4180_v8  ;;  %v3908_v17 = vld [vmem:[#allocation6 + $0x98] sm:$0xf0]  ;;  %v4761_v30 = vld [vmem:[#allocation6 + $0x274] sm:$0xf0] }
  0x41   :  { %883 = vmatpush.bf16.msrb.mxu1 %v4111_v1  ;;  %v5406_v1 = vpack.c.bf16 %v101_v62, %v98_v61  ;;  %v4164_v21 = vld [vmem:[#allocation6 + $0x298] sm:$0xf0]  ;;  %v4695_v31 = vld [vmem:[#allocation6 + $0x6c] sm:$0xf]  ;;  %v4114_v59 = vld [vmem:[#allocation6 + $0x228] sm:$0xf] }
  0x42   :  { %912 = vmatpush.bf16.msrb.mxu2 %v3859_v13  ;;  %v4162_v13 = vld [vmem:[#allocation6 + $0x288] sm:$0xf]  ;;  %v4167_v23 = vor.u32 %v4763_v20, %v4164_v21  ;;  %v4052_v24 = vld [vmem:[#allocation6 + $0x1b8] sm:$0xf0]  ;;  %v4759_v34 = vld [vmem:[#allocation6 + $0x26c] sm:$0xf] }
  0x43   :  { %941 = vmatpush.bf16.msrb.mxu3 %v3987_v11  ;;  %v4739_v11 = vld [vmem:[#allocation6 + $0x1cc] sm:$0xf]  ;;  %v4163_v18 = vor.u32 %v4765_v15, %v4162_v13  ;;  %v4148_v35 = vld [vmem:[#allocation6 + $0x278] sm:$0xf0]  ;;  %v4753_v60 = vld [vmem:[#allocation6 + $0x234] sm:$0xf0] }
  0x44   :  { %855 = vmatpush.bf16.msrb.mxu0 %v3967_v12  ;;  %v4068_v12 = vld [vmem:[#allocation6 + $0x1d8] sm:$0xf0]  ;;  %v4691_v47 = vld [vmem:[#allocation6 + $0x4c] sm:$0xf]  ;;  %v4115_v62 = vor.u32 %v4753_v60, %v4114_v59  ;;  %v4300_v59 = vld [vmem:[%s6753_s2 + $0xb0] sm:$0xf0] }
  0x45   :  { %884 = vmatpush.bf16.msrb.mxu1 %v4095_v16  ;;  %v4071_v14 = vor.u32 %v4739_v11, %v4068_v12  ;;  %v4699_v16 = vld [vmem:[#allocation6 + $0x8c] sm:$0xf]  ;;  %v4036_v40 = vld [vmem:[#allocation6 + $0x198] sm:$0xf0]  ;;  %v4749_v11 = vld [vmem:[#allocation6 + $0x214] sm:$0xf0] }
  0x46   :  { %913 = vmatpush.bf16.msrb.mxu2 %v3843_v25  ;;  %v3911_v19 = vor.u32 %v4699_v16, %v3908_v17  ;;  %v4055_v25 = vor.u32 %v4735_v22, %v4052_v24  ;;  %v3876_v48 = vld [vmem:[#allocation6 + $0x58] sm:$0xf0]  ;;  %v4727_v55 = vld [vmem:[#allocation6 + $0x16c] sm:$0xf] }
  0x47   :  { %942 = vmatpush.bf16.msrb.mxu3 %v3971_v26  ;;  %750 = vmatmul.bf16.gmra.mxu0 %v5374_v27  ;;  %v4146_v26 = vld [vmem:[#allocation6 + $0x268] sm:$0xf]  ;;  %v4132_v54 = vld [vmem:[#allocation6 + $0x258] sm:$0xf0]  ;;  %v4687_v61 = vld [vmem:[#allocation6 + $0x2c] sm:$0xf] }
  0x48   :  { %779 = vmatmul.bf16.gmra.mxu1 %v5376_v28  ;;  %964 = vmatpush.bf16.msra.mxu0 %v4211_v33  ;;  %v4147_v32 = vor.u32 %v4761_v30, %v4146_v26  ;;  %v3892_v33 = vld [vmem:[#allocation6 + $0x78] sm:$0xf0]  ;;  %v4723_v3 = vld [vmem:[#allocation6 + $0x14c] sm:$0xf]  ;;  %v4808_v26 = vld [vmem:[%s6753_s2 + $0xec] sm:$0xf0] }
  0x49   :  { %808 = vmatmul.bf16.gmra.mxu2 %v5378_v29  ;;  %993 = vmatpush.bf16.msra.mxu1 %v3959_v37  ;;  %v3895_v36 = vor.u32 %v4695_v31, %v3892_v33  ;;  %v4151_v37 = vor.u32 %v4759_v34, %v4148_v35  ;;  %v4020_v57 = vld [vmem:[#allocation6 + $0x178] sm:$0xf0]  ;;  %v4751_v7 = vld [vmem:[#allocation6 + $0x22c] sm:$0xf]  ;;  %v4806_v30 = vld [vmem:[%s6753_s2 + $0xe4] sm:$0xf] }
  0x4a   :  { %837 = vmatmul.bf16.gmra.mxu3 %v5374_v27  ;;  %1022 = vmatpush.bf16.msra.mxu2 %v4087_v56  ;;  %v4023_v58 = vor.u32 %v4727_v55, %v4020_v57  ;;  %v3860_v2 = vld [vmem:[#allocation6 + $0x38] sm:$0xf0]  ;;  %v4683_v12 = vld [vmem:[#allocation6 + $0xc] sm:$0xf]  ;;  %v4298_v55 = vld [vmem:[%s6753_s2 + $0xa0] sm:$0xf] }
  0x4b   :  { %1051 = vmatpush.bf16.msra.mxu3 %v4215_v38  ;;  %v4731_v38 = vld [vmem:[#allocation6 + $0x18c] sm:$0xf]  ;;  %v4004_v4 = vld [vmem:[#allocation6 + $0x158] sm:$0xf0]  ;;  %v4798_v57 = vld [vmem:[%s6753_s2 + $0xa4] sm:$0xf] }
  0x4c   :  { %965 = vmatpush.bf16.msra.mxu0 %v4195_v43  ;;  %v4039_v42 = vor.u32 %v4731_v38, %v4036_v40  ;;  %v4757_v43 = vld [vmem:[#allocation6 + $0x254] sm:$0xf0]  ;;  %v4007_v6 = vor.u32 %v4723_v3, %v4004_v4  ;;  %v4116_v8 = vld [vmem:[#allocation6 + $0x238] sm:$0xf0]  ;;  %v4719_v16 = vld [vmem:[#allocation6 + $0x12c] sm:$0xf]  ;;  %v5505_v60 = vor.u32 %v4798_v57, %v4300_v59 }
  0x4d   :  { %994 = vmatpush.bf16.msra.mxu1 %v3943_v50  ;;  %v4131_v49 = vor.u32 %v4757_v43, %v4130_v41  ;;  %v3879_v50 = vor.u32 %v4691_v47, %v3876_v48  ;;  %v3844_v13 = vld [vmem:[#allocation6 + $0x18] sm:$0xf0]  ;;  %v4747_v21 = vld [vmem:[#allocation6 + $0x20c] sm:$0xf]  ;;  %v4804_v38 = vld [vmem:[%s6753_s2 + $0xcc] sm:$0xf0] }
  0x4e   :  { %1023 = vmatpush.bf16.msra.mxu2 %v4071_v14  ;;  %v3847_v15 = vor.u32 %v4683_v12, %v3844_v13  ;;  %v3988_v17 = vld [vmem:[#allocation6 + $0x138] sm:$0xf0]  ;;  %v4807_v34 = vld [vmem:[%s6753_s2 + $0xec] sm:$0xf]  ;;  %v4802_v40 = vld [vmem:[%s6753_s2 + $0xc4] sm:$0xf] }
  0x4f   :  { %1052 = vmatpush.bf16.msra.mxu3 %v4199_v53  ;;  %v4755_v53 = vld [vmem:[#allocation6 + $0x24c] sm:$0xf]  ;;  %v3972_v20 = vld [vmem:[#allocation6 + $0x118] sm:$0xf0]  ;;  %v4316_v41 = vld [vmem:[%s6753_s2 + $0xd0] sm:$0xf0] }
  0x50   :  { %966 = vmatpush.bf16.msra.mxu0 %v4179_v5  ;;  %v4135_v56 = vor.u32 %v4755_v53, %v4132_v54  ;;  %v3863_v5 = vor.u32 %v4687_v61, %v3860_v2  ;;  %v4340_v35 = vld [vmem:[%s6753_s2 + $0xf8] sm:$0xf0]  ;;  %v5464_v43 = vor.u32 %v4802_v40, %v4316_v41  ;;  %v4803_v47 = vld [vmem:[%s6753_s2 + $0xcc] sm:$0xf]  ;;  %v4809_v53 = vld [vmem:[%s6753_s2 + $0xf4] sm:$0xf0] }
  0x51   :  { %995 = vmatpush.bf16.msra.mxu1 %v3927_v9  ;;  %v4098_v9 = vld [vmem:[#allocation6 + $0x208] sm:$0xf]  ;;  %v4324_v48 = vld [vmem:[%s6753_s2 + $0xd8] sm:$0xf0]  ;;  %v5512_v61 = vld [vmem:[%s6754_s3] sm:$0xf] }
  0x52   :  { %1024 = vmatpush.bf16.msra.mxu2 %v4055_v25  ;;  %v4099_v14 = vor.u32 %v4749_v11, %v4098_v9  ;;  %v4330_v25 = vld [vmem:[%s6753_s2 + $0xe0] sm:$0xf]  ;;  %v4308_v2 = vld [vmem:[%s6753_s2 + $0xb8] sm:$0xf0]  ;;  %v4322_v3 = vld [vmem:[%s6753_s2 + $0xc8] sm:$0xf] }
  0x53   :  { %1053 = vmatpush.bf16.msra.mxu3 %v4183_v10  ;;  %v4119_v10 = vor.u32 %v4751_v7, %v4116_v8  ;;  %v5433_v31 = vor.u32 %v4808_v26, %v4330_v25  ;;  %v4796_v7 = vld [vmem:[%s6753_s2 + $0x8c] sm:$0xf0]  ;;  %v5535_v8 = vperm.slane %v5512_v61, 0  ;;  %v4794_v11 = vld [vmem:[%s6753_s2 + $0x84] sm:$0xf] }
  0x54   :  { %967 = vmatpush.bf16.msra.mxu0 %v4163_v18  ;;  %v3991_v18 = vor.u32 %v4719_v16, %v3988_v17  ;;  %v4284_v12 = vld [vmem:[%s6753_s2 + $0x90] sm:$0xf0]  ;;  %v4791_v41 = vld [vmem:[%s6753_s2 + $0x6c] sm:$0xf] }
  0x55   :  { %996 = vmatpush.bf16.msra.mxu1 %v3911_v19  ;;  %v4715_v19 = vld [vmem:[#allocation6 + $0x10c] sm:$0xf]  ;;  %6773 = vst [vmem:[#allocation17_spill] sm:$0xff] %v5535_v8  ;;  %v5548_v13 = vor.u32 %v4794_v11, %v4284_v12 }
  0x56   :  { %1025 = vmatpush.bf16.msra.mxu2 %v4039_v42  ;;  %v3975_v22 = vor.u32 %v4715_v19, %v3972_v20  ;;  %v4292_v19 = vld [vmem:[%s6753_s2 + $0x98] sm:$0xf0]  ;;  %v4306_v20 = vld [vmem:[%s6753_s2 + $0xa8] sm:$0xf] }
  0x57   :  { %755 = vmatmul.bf16.gmra.mxu0 %v5402_v63  ;;  %1054 = vmatpush.bf16.msra.mxu3 %v4167_v23  ;;  %v4100_v23 = vld [vmem:[#allocation6 + $0x218] sm:$0xf0] }
  0x58   :  { %784 = vmatmul.bf16.gmra.mxu1 %v5404_v0  ;;  %968 = vmatpush.bf16.msra.mxu0 %v4147_v32  ;;  %v4103_v24 = vor.u32 %v4747_v21, %v4100_v23  ;;  %v4332_v32 = vld [vmem:[%s6753_s2 + $0xf0] sm:$0xf0] }
  0x59   :  { %813 = vmatmul.bf16.gmra.mxu2 %v5406_v1  ;;  %997 = vmatpush.bf16.msra.mxu1 %v3895_v36  ;;  %v5438_v33 = vor.u32 %v4806_v30, %v4332_v32  ;;  %v4314_v36 = vld [vmem:[%s6753_s2 + $0xc0] sm:$0xf] }
  0x5a   :  { %842 = vmatmul.bf16.gmra.mxu3 %v5402_v63  ;;  %1026 = vmatpush.bf16.msra.mxu2 %v4023_v58  ;;  %v5462_v42 = vor.u32 %v4804_v38, %v4314_v36 }
  0x5b   :  { %1055 = vmatpush.bf16.msra.mxu3 %v4151_v37  ;;  %v5451_v37 = vor.u32 %v4807_v34, %v4340_v35 }
  0x5c   :  { %969 = vmatpush.bf16.msra.mxu0 %v4131_v49  ;;  %v4338_v49 = vld [vmem:[%s6753_s2 + $0xe8] sm:$0xf] }
  0x5d   :  { %998 = vmatpush.bf16.msra.mxu1 %v3879_v50  ;;  %v5481_v50 = vor.u32 %v4803_v47, %v4324_v48  ;;  %v5487_v54 = vor.u32 %v4809_v53, %v4338_v49  ;;  %v4276_v47 = vld [vmem:[%s6753_s2 + $0x78] sm:$0xf0]  ;;  %v4290_v48 = vld [vmem:[%s6753_s2 + $0x88] sm:$0xf]  ;;  %v4797_v53 = vld [vmem:[%s6753_s2 + $0x94] sm:$0xf0] }
  0x5e   :  { %1027 = vmatpush.bf16.msra.mxu2 %v4007_v6  ;;  %v4282_v6 = vld [vmem:[%s6753_s2 + $0x80] sm:$0xf]  ;;  %v5608_v49 = vor.u32 %v4791_v41, %v4276_v47  ;;  %v5619_v57 = vor.u32 %v4797_v53, %v4290_v48 }
  0x5f   :  { %1056 = vmatpush.bf16.msra.mxu3 %v4135_v56  ;;  %v4800_v56 = vld [vmem:[%s6753_s2 + $0xac] sm:$0xf0] }
  0x60   :  { %970 = vmatpush.bf16.msra.mxu0 %v4115_v62  ;;  %v5499_v58 = vor.u32 %v4800_v56, %v4298_v55  ;;  %v4799_v62 = vld [vmem:[%s6753_s2 + $0xac] sm:$0xf]  ;;  %v4250_v55 = vld [vmem:[%s6753_s2 + $0x40] sm:$0xf]  ;;  %v4788_v56 = vld [vmem:[%s6753_s2 + $0x4c] sm:$0xf0] }
  0x61   :  { %999 = vmatpush.bf16.msra.mxu1 %v3863_v5  ;;  %v5523_v4 = vor.u32 %v4799_v62, %v4308_v2  ;;  %v4805_v5 = vld [vmem:[%s6753_s2 + $0xd4] sm:$0xf0]  ;;  %v5621_v59 = vor.u32 %v4788_v56, %v4250_v55  ;;  %v4786_v62 = vld [vmem:[%s6753_s2 + $0x44] sm:$0xf]  ;;  %v4252_v2 = vld [vmem:[%s6753_s2 + $0x50] sm:$0xf0] }
  0x62   :  { %1028 = vmatpush.bf16.msra.mxu2 %v3991_v18  ;;  %v5537_v9 = vor.u32 %v4805_v5, %v4322_v3  ;;  %v4795_v18 = vld [vmem:[%s6753_s2 + $0x8c] sm:$0xf]  ;;  %v5630_v3 = vor.u32 %v4786_v62, %v4252_v2  ;;  %v5633_v5 = vperm.slane %v5512_v61, 1  ;;  %v4244_v62 = vld [vmem:[%s6753_s2 + $0x38] sm:$0xf0] }
  0x63   :  { %1057 = vmatpush.bf16.msra.mxu3 %v4119_v10  ;;  %v5539_v10 = vor.u32 %v4796_v7, %v4282_v6  ;;  %v5566_v21 = vor.u32 %v4795_v18, %v4292_v19  ;;  %v4787_v18 = vld [vmem:[%s6753_s2 + $0x4c] sm:$0xf]  ;;  %v4260_v19 = vld [vmem:[%s6753_s2 + $0x58] sm:$0xf0]  ;;  %v4218_v2 = vld [vmem:[%s6753_s2] sm:$0xf] }
  0x64   :  { %971 = vmatpush.bf16.msra.mxu0 %v4099_v14  ;;  %6774 = vst [vmem:[#allocation18_spill] sm:$0xff] %v5633_v5  ;;  %v4783_v56 = vld [vmem:[%s6753_s2 + $0x2c] sm:$0xf] }
  0x65   :  { %1000 = vmatpush.bf16.msra.mxu1 %v3847_v15 }
  0x66   :  { %1029 = vmatpush.bf16.msra.mxu2 %v3975_v22  ;;  %v4801_v22 = vld [vmem:[%s6753_s2 + $0xb4] sm:$0xf0] }
  0x67   :  { %856 = vmatmul.bf16.vlgmr.msrb.gmra.mxu0 %v5320_v51  ;;  %1058 = vmatpush.bf16.msra.mxu3 %v4103_v24  ;;  %v5572_v23 = vor.u32 %v4801_v22, %v4306_v20  ;;  %v4266_v24 = vld [vmem:[%s6753_s2 + $0x60] sm:$0xf]  ;;  %v4274_v20 = vld [vmem:[%s6753_s2 + $0x68] sm:$0xf]  ;;  %v5656_v22 = vor.u32 %v4787_v18, %v4260_v19  ;;  %v4785_v19 = vld [vmem:[%s6753_s2 + $0x34] sm:$0xf0] }
  0x68   :  { %885 = vmatmul.bf16.vlgmr.msrb.gmra.mxu1 %v5322_v52  ;;  %1240 = vmatpush.bf16.msrb.mxu0 %v5433_v31  ;;  %v4242_v18 = vld [vmem:[%s6753_s2 + $0x28] sm:$0xf] }
  0x69   :  { %914 = vmatmul.bf16.vlgmr.msrb.gmra.mxu2 %v5318_v46  ;;  %1253 = vmatpush.bf16.msrb.mxu1 %v5438_v33 }
  0x6a   :  { %943 = vmatmul.bf16.vlgmr.msrb.gmra.mxu3 %v5320_v51  ;;  %1266 = vmatpush.bf16.msrb.mxu2 %v5487_v54 }
  0x6b   :  { %1279 = vmatpush.bf16.msrb.mxu3 %v5451_v37 }
  0x6c   :  { %1241 = vmatpush.bf16.msrb.mxu0 %v5462_v42 }
  0x6d   :  { %1254 = vmatpush.bf16.msrb.mxu1 %v5464_v43 }
  0x6e   :  { %1267 = vmatpush.bf16.msrb.mxu2 %v5537_v9 }
  0x6f   :  { %1280 = vmatpush.bf16.msrb.mxu3 %v5481_v50 }
  0x70   :  { %1242 = vmatpush.bf16.msrb.mxu0 %v5499_v58 }
  0x71   :  { %1255 = vmatpush.bf16.msrb.mxu1 %v5505_v60 }
  0x72   :  { %1268 = vmatpush.bf16.msrb.mxu2 %v5572_v23 }
  0x73   :  { %1281 = vmatpush.bf16.msrb.mxu3 %v5523_v4 }
  0x74   :  { %1243 = vmatpush.bf16.msrb.mxu0 %v5539_v10 }
  0x75   :  { %1256 = vmatpush.bf16.msrb.mxu1 %v5548_v13 }
  0x76   :  { %1269 = vmatpush.bf16.msrb.mxu2 %v5619_v57 }
  0x77   :  { %861 = vmatmul.bf16.gmra.mxu0 %v5348_v44  ;;  %1282 = vmatpush.bf16.msrb.mxu3 %v5566_v21 }
  0x78   :  { %890 = vmatmul.bf16.gmra.mxu1 %v5350_v45 }
  0x79   :  { %919 = vmatmul.bf16.gmra.mxu2 %v5346_v39 }
  0x7a   :  { %948 = vmatmul.bf16.gmra.mxu3 %v5348_v44 }
  0x7b   :  { %1283 = vmatpush.bf16.msrb.mxu3 %v5608_v49 }
  0x7f   :  { %1284 = vmatpush.bf16.msrb.mxu3 %v5656_v22 }
  0x87   :  { %866 = vmatmul.bf16.gmra.mxu0 %v5376_v28 }
  0x88   :  { %895 = vmatmul.bf16.gmra.mxu1 %v5378_v29 }
  0x89   :  { %924 = vmatmul.bf16.gmra.mxu2 %v5374_v27 }
  0x8a   :  { %953 = vmatmul.bf16.gmra.mxu3 %v5376_v28 }
  0x97   :  { %871 = vmatmul.bf16.gmra.mxu0 %v5404_v0 }
  0x98   :  { %900 = vmatmul.bf16.gmra.mxu1 %v5406_v1 }
  0x99   :  { %929 = vmatmul.bf16.gmra.mxu2 %v5402_v63 }
  0x9a   :  { %958 = vmatmul.bf16.gmra.mxu3 %v5404_v0 }
  0xa4   :  { %v741_v14 = vpop.f32.mrf.mxu0 }
  0xa5   :  { %v742_v15 = vadd.f32 %v741_v14, %v5535_v8  ;;  %v770_v16 = vpop.f32.mrf.mxu1 }
  0xa7   :  { %v771_v17 = vadd.f32 %v770_v16, %v742_v15  ;;  %972 = vmatmul.bf16.vlgmr.msra.gmra.mxu0 %v5322_v52 }
  0xa8   :  { %1001 = vmatmul.bf16.vlgmr.msra.gmra.mxu1 %v5318_v46  ;;  %v4792_v46 = vld [vmem:[%s6753_s2 + $0x6c] sm:$0xf0] }
  0xa9   :  { %1030 = vmatmul.bf16.vlgmr.msra.gmra.mxu2 %v5320_v51  ;;  %v4790_v51 = vld [vmem:[%s6753_s2 + $0x64] sm:$0xf]  ;;  %v5584_v25 = vor.u32 %v4792_v46, %v4266_v24  ;;  %v4793_v24 = vld [vmem:[%s6753_s2 + $0x74] sm:$0xf0] }
  0xaa   :  { %1059 = vmatmul.bf16.vlgmr.msra.gmra.mxu3 %v5322_v52  ;;  %v4268_v52 = vld [vmem:[%s6753_s2 + $0x70] sm:$0xf0]  ;;  %v5662_v46 = vor.u32 %v4793_v24, %v4274_v20  ;;  %v5733_v20 = vor.u32 %v4785_v19, %v4242_v18 }
  0xab   :  { %v5590_v30 = vor.u32 %v4790_v51, %v4268_v52  ;;  %1244 = vmatpush.bf16.msrb.mxu0 %v5584_v25  ;;  %v4234_v51 = vld [vmem:[%s6753_s2 + $0x20] sm:$0xf] }
  0xac   :  { %v799_v26 = vpop.f32.mrf.mxu2  ;;  %v743_v35 = vpop.f32.mrf.mxu0  ;;  %1270 = vmatpush.bf16.msrb.mxu2 %v5662_v46 }
  0xad   :  { %v5592_v32 = vadd.f32 %v799_v26, %v771_v17  ;;  %v5594_v34 = vpop.f32.mrf.mxu3  ;;  %v744_v36 = vadd.f32 %v743_v35, %v5535_v8  ;;  %v772_v38 = vpop.f32.mrf.mxu1  ;;  %1257 = vmatpush.bf16.msrb.mxu1 %v5590_v30 }
  0xaf   :  { %v773_v40 = vadd.f32 %v772_v38, %v744_v36  ;;  %1245 = vmatpush.bf16.msrb.mxu0 %v5621_v59  ;;  %v4258_v36 = vld [vmem:[%s6753_s2 + $0x48] sm:$0xf]  ;;  %v4789_v38 = vld [vmem:[%s6753_s2 + $0x54] sm:$0xf0] }
  0xb0   :  { %v5693_v48 = vor.u32 %v4789_v38, %v4258_v36  ;;  %v4228_v36 = vld [vmem:[%s6753_s2 + $0x18] sm:$0xf0] }
  0xb1   :  { %1258 = vmatpush.bf16.msrb.mxu1 %v5630_v3 }
  0xb2   :  { %1271 = vmatpush.bf16.msrb.mxu2 %v5693_v48 }
  0xb4   :  { %v801_v6 = vpop.f32.mrf.mxu2  ;;  %v746_v12 = vpop.f32.mrf.mxu0 }
  0xb5   :  { %v5637_v7 = vadd.f32 %v801_v6, %v773_v40  ;;  %v830_v11 = vpop.f32.mrf.mxu3  ;;  %v747_v15 = vadd.f32 %v746_v12, %v5535_v8  ;;  %v775_v16 = vpop.f32.mrf.mxu1  ;;  %v5711_v6 = vor.u32 %v4783_v56, %v4244_v62  ;;  %v4778_v12 = vld [vmem:[%s6753_s2 + $0x4] sm:$0xf] }
  0xb6   :  { %v5641_v14 = vadd.f32 %v830_v11, %v5633_v5  ;;  %v4780_v11 = vld [vmem:[%s6753_s2 + $0xc] sm:$0xf0]  ;;  %1272 = vmatpush.bf16.msrb.mxu2 %v5733_v20 }
  0xb7   :  { %6775 = vst [vmem:[#allocation19_spill] sm:$0xff] %v5637_v7  ;;  %v776_v17 = vadd.f32 %v775_v16, %v747_v15  ;;  %977 = vmatmul.bf16.gmra.mxu0 %v5350_v45  ;;  %v4220_v15 = vld [vmem:[%s6753_s2 + $0x10] sm:$0xf0]  ;;  %v5722_v16 = vor.u32 %v4780_v11, %v4218_v2  ;;  %1285 = vmatpush.bf16.msrb.mxu3 %v5711_v6 }
  0xb8   :  { %6776 = vst [vmem:[#allocation20_spill] sm:$0xff] %v5641_v14  ;;  %1006 = vmatmul.bf16.gmra.mxu1 %v5346_v39  ;;  %v4784_v39 = vld [vmem:[%s6753_s2 + $0x2c] sm:$0xf0] }
  0xb9   :  { %1035 = vmatmul.bf16.gmra.mxu2 %v5348_v44  ;;  %v4782_v44 = vld [vmem:[%s6753_s2 + $0x24] sm:$0xf]  ;;  %v5674_v52 = vor.u32 %v4784_v39, %v4234_v51  ;;  %v4226_v51 = vld [vmem:[%s6753_s2 + $0x8] sm:$0xf]  ;;  %v4781_v39 = vld [vmem:[%s6753_s2 + $0x14] sm:$0xf0] }
  0xba   :  { %1064 = vmatmul.bf16.gmra.mxu3 %v5350_v45  ;;  %v4236_v45 = vld [vmem:[%s6753_s2 + $0x30] sm:$0xf0]  ;;  %v5756_v56 = vor.u32 %v4781_v39, %v4226_v51 }
  0xbb   :  { %v5680_v35 = vor.u32 %v4782_v44, %v4236_v45  ;;  %1246 = vmatpush.bf16.msrb.mxu0 %v5674_v52  ;;  %v4779_v44 = vld [vmem:[%s6753_s2 + $0xc] sm:$0xf] }
  0xbc   :  { %v804_v26 = vpop.f32.mrf.mxu2  ;;  %v5690_v47 = vpop.f32.mrf.mxu0  ;;  %v5758_v62 = vor.u32 %v4779_v44, %v4228_v36  ;;  %1273 = vmatpush.bf16.msrb.mxu2 %v5756_v56 }
  0xbd   :  { %v5688_v40 = vadd.f32 %v804_v26, %v776_v17  ;;  %v833_v41 = vpop.f32.mrf.mxu3  ;;  %6778 = vst [vmem:[#allocation22_spill] sm:$0xff] %v5690_v47  ;;  %v5698_v55 = vpop.f32.mrf.mxu1  ;;  %1259 = vmatpush.bf16.msrb.mxu1 %v5680_v35  ;;  %v5724_v17 = vor.u32 %v4778_v12, %v4220_v15 }
  0xbe   :  { %v5696_v53 = vadd.f32 %v833_v41, %v5633_v5  ;;  %6779 = vst [vmem:[#allocation23_spill] sm:$0xff] %v5698_v55  ;;  %1286 = vmatpush.bf16.msrb.mxu3 %v5758_v62 }
  0xbf   :  { %6777 = vst [vmem:[#allocation21_spill] sm:$0xff] %v5688_v40  ;;  %1247 = vmatpush.bf16.msrb.mxu0 %v5722_v16 }
  0xc0   :  { %6782 = vst [vmem:[#allocation26_spill] sm:$0xff] %v5758_v62  ;;  %1387 = vmatpush.bf16.msra.mxu2 %v5487_v54 }
  0xc1   :  { %1260 = vmatpush.bf16.msrb.mxu1 %v5724_v17 }
  0xc2   :  { %1400 = vmatpush.bf16.msra.mxu3 %v5451_v37 }
  0xc3   :  { %1361 = vmatpush.bf16.msra.mxu0 %v5433_v31 }
  0xc4   :  { %v5735_v24 = vpop.f32.mrf.mxu2  ;;  %v751_v26 = vpop.f32.mrf.mxu0  ;;  %1388 = vmatpush.bf16.msra.mxu2 %v5537_v9 }
  0xc5   :  { %6780 = vst [vmem:[#allocation24_spill] sm:$0xff] %v5735_v24  ;;  %v5748_v45 = vpop.f32.mrf.mxu3  ;;  %v752_v38 = vadd.f32 %v751_v26, %v5535_v8  ;;  %v780_v41 = vpop.f32.mrf.mxu1  ;;  %1374 = vmatpush.bf16.msra.mxu1 %v5438_v33 }
  0xc6   :  { %6781 = vst [vmem:[#allocation25_spill] sm:$0xff] %v5748_v45  ;;  %1401 = vmatpush.bf16.msra.mxu3 %v5481_v50 }
  0xc7   :  { %v781_v2 = vadd.f32 %v780_v41, %v752_v38  ;;  %982 = vmatmul.bf16.gmra.mxu0 %v5378_v29 }
  0xc8   :  { %1011 = vmatmul.bf16.gmra.mxu1 %v5374_v27  ;;  %1362 = vmatpush.bf16.msra.mxu0 %v5462_v42 }
  0xc9   :  { %1040 = vmatmul.bf16.gmra.mxu2 %v5376_v28  ;;  %1375 = vmatpush.bf16.msra.mxu1 %v5464_v43 }
  0xca   :  { %1069 = vmatmul.bf16.gmra.mxu3 %v5378_v29  ;;  %1389 = vmatpush.bf16.msra.mxu2 %v5572_v23 }
  0xcb   :  { %1402 = vmatpush.bf16.msra.mxu3 %v5523_v4 }
  0xcc   :  { %v809_v11 = vpop.f32.mrf.mxu2  ;;  %v5773_v18 = vpop.f32.mrf.mxu0  ;;  %1363 = vmatpush.bf16.msra.mxu0 %v5499_v58 }
  0xcd   :  { %v5771_v12 = vadd.f32 %v809_v11, %v781_v2  ;;  %v838_v15 = vpop.f32.mrf.mxu3  ;;  %6784 = vst [vmem:[#allocation28_spill] sm:$0xff] %v5773_v18  ;;  %v5778_v28 = vpop.f32.mrf.mxu1  ;;  %1376 = vmatpush.bf16.msra.mxu1 %v5505_v60 }
  0xce   :  { %v5776_v27 = vadd.f32 %v838_v15, %v5633_v5  ;;  %6785 = vst [vmem:[#allocation29_spill] sm:$0xff] %v5778_v28  ;;  %1390 = vmatpush.bf16.msra.mxu2 %v5619_v57 }
  0xcf   :  { %6783 = vst [vmem:[#allocation27_spill] sm:$0xff] %v5771_v12  ;;  %1403 = vmatpush.bf16.msra.mxu3 %v5566_v21 }
  0xd0   :  { %1364 = vmatpush.bf16.msra.mxu0 %v5539_v10 }
  0xd1   :  { %1377 = vmatpush.bf16.msra.mxu1 %v5548_v13 }
  0xd2   :  { %1391 = vmatpush.bf16.msra.mxu2 %v5662_v46 }
  0xd3   :  { %1404 = vmatpush.bf16.msra.mxu3 %v5608_v49 }
  0xd4   :  { %v5786_v29 = vpop.f32.mrf.mxu2  ;;  %v756_v51 = vpop.f32.mrf.mxu0  ;;  %1365 = vmatpush.bf16.msra.mxu0 %v5584_v25 }
  0xd5   :  { %6786 = vst [vmem:[#allocation30_spill] sm:$0xff] %v5786_v29  ;;  %v5790_v19 = vpop.f32.mrf.mxu3  ;;  %v757_v39 = vadd.f32 %v756_v51, %v5535_v8  ;;  %v785_v44 = vpop.f32.mrf.mxu1  ;;  %1378 = vmatpush.bf16.msra.mxu1 %v5590_v30 }
  0xd6   :  { %6787 = vst [vmem:[#allocation31_spill] sm:$0xff] %v5790_v19  ;;  %1392 = vmatpush.bf16.msra.mxu2 %v5693_v48 }
  0xd7   :  { %v786_v26 = vadd.f32 %v785_v44, %v757_v39  ;;  %987 = vmatmul.bf16.gmra.mxu0 %v5406_v1  ;;  %1405 = vmatpush.bf16.msra.mxu3 %v5656_v22 }
  0xd8   :  { %1016 = vmatmul.bf16.gmra.mxu1 %v5402_v63  ;;  %1366 = vmatpush.bf16.msra.mxu0 %v5621_v59 }
  0xd9   :  { %1045 = vmatmul.bf16.gmra.mxu2 %v5404_v0  ;;  %1379 = vmatpush.bf16.msra.mxu1 %v5630_v3 }
  0xda   :  { %1074 = vmatmul.bf16.gmra.mxu3 %v5406_v1  ;;  %1393 = vmatpush.bf16.msra.mxu2 %v5733_v20  ;;  %v829_v1 = vadd.f32 %v5594_v34, %v5633_v5  ;;  %v5836_v34 = vperm.slane %v5512_v61, 2 }
  0xdb   :  { %1406 = vmatpush.bf16.msra.mxu3 %v5711_v6 }
  0xdc   :  { %v814_v36 = vpop.f32.mrf.mxu2  ;;  %v5806_v2 = vpop.f32.mrf.mxu0  ;;  %1367 = vmatpush.bf16.msra.mxu0 %v5674_v52 }
  0xdd   :  { %v5804_v38 = vadd.f32 %v814_v36, %v786_v26  ;;  %v843_v41 = vpop.f32.mrf.mxu3  ;;  %6789 = vst [vmem:[#allocation33_spill] sm:$0xff] %v5806_v2  ;;  %v5811_v0 = vpop.f32.mrf.mxu1  ;;  %1380 = vmatpush.bf16.msra.mxu1 %v5680_v35  ;;  %v6763_v36 = vmov 0  }
  0xde   :  { %v5809_v63 = vadd.f32 %v843_v41, %v5633_v5  ;;  %6790 = vst [vmem:[#allocation34_spill] sm:$0xff] %v5811_v0  ;;  %1394 = vmatpush.bf16.msra.mxu2 %v5756_v56 }
  0xdf   :  { %6788 = vst [vmem:[#allocation32_spill] sm:$0xff] %v5804_v38  ;;  %1407 = vmatpush.bf16.msra.mxu3 %v5758_v62 }
  0xe0   :  { %1368 = vmatpush.bf16.msra.mxu0 %v5722_v16 }
  0xe1   :  { %1381 = vmatpush.bf16.msra.mxu1 %v5724_v17 }
  0xe4   :  { %v5822_v11 = vpop.f32.mrf.mxu2  ;;  %v857_v51 = vpop.f32.mrf.mxu0 }
  0xe5   :  { %6791 = vst [vmem:[#allocation35_spill] sm:$0xff] %v5822_v11  ;;  %v5825_v15 = vpop.f32.mrf.mxu3  ;;  %v858_v39 = vadd.f32 %v857_v51, %v829_v1  ;;  %v886_v44 = vpop.f32.mrf.mxu1 }
  0xe6   :  { %6792 = vst [vmem:[#allocation36_spill] sm:$0xff] %v5825_v15 }
  0xe7   :  { %v5830_v26 = vadd.f32 %v886_v44, %v858_v39  ;;  %1248 = vmatmul.bf16.vlgmr.msrb.gmra.mxu0 %v6763_v36 }
  0xe8   :  { %1261 = vmatmul.bf16.vlgmr.msrb.gmra.mxu1 %v6763_v36  ;;  %1482 = vmatpush.bf16.msrb.mxu0 %v5433_v31 }
  0xe9   :  { %1274 = vmatmul.bf16.vlgmr.msrb.gmra.mxu2 %v6763_v36  ;;  %1495 = vmatpush.bf16.msrb.mxu1 %v5438_v33 }
  0xea   :  { %1287 = vmatmul.bf16.vlgmr.msrb.gmra.mxu3 %v6763_v36  ;;  %1508 = vmatpush.bf16.msrb.mxu2 %v5487_v54 }
  0xeb   :  { %1521 = vmatpush.bf16.msrb.mxu3 %v5451_v37 }
  0xec   :  { %v915_v41 = vpop.f32.mrf.mxu2  ;;  %v5844_v39 = vpop.f32.mrf.mxu0  ;;  %1483 = vmatpush.bf16.msrb.mxu0 %v5462_v42 }
  0xed   :  { %v916_v1 = vadd.f32 %v915_v41, %v5836_v34  ;;  %v944_v51 = vpop.f32.mrf.mxu3  ;;  %6793 = vst [vmem:[#allocation37_spill] sm:$0xff] %v5844_v39  ;;  %v5846_v44 = vpop.f32.mrf.mxu1  ;;  %1496 = vmatpush.bf16.msrb.mxu1 %v5464_v43 }
  0xee   :  { %6794 = vst [vmem:[#allocation38_spill] sm:$0xff] %v5846_v44  ;;  %1509 = vmatpush.bf16.msrb.mxu2 %v5537_v9 }
  0xef   :  { %v5849_v11 = vadd.f32 %v944_v51, %v916_v1  ;;  %1522 = vmatpush.bf16.msrb.mxu3 %v5481_v50 }
  0xf0   :  { %1484 = vmatpush.bf16.msrb.mxu0 %v5499_v58 }
  0xf1   :  { %1497 = vmatpush.bf16.msrb.mxu1 %v5505_v60 }
  0xf2   :  { %1510 = vmatpush.bf16.msrb.mxu2 %v5572_v23 }
  0xf3   :  { %1523 = vmatpush.bf16.msrb.mxu3 %v5523_v4 }
  0xf4   :  { %v5857_v41 = vpop.f32.mrf.mxu2  ;;  %v862_v1 = vpop.f32.mrf.mxu0  ;;  %1485 = vmatpush.bf16.msrb.mxu0 %v5539_v10 }
  0xf5   :  { %v5860_v36 = vpop.f32.mrf.mxu3  ;;  %v863_v51 = vadd.f32 %v862_v1, %v5696_v53  ;;  %v891_v0 = vpop.f32.mrf.mxu1  ;;  %1498 = vmatpush.bf16.msrb.mxu1 %v5548_v13 }
  0xf6   :  { %1511 = vmatpush.bf16.msrb.mxu2 %v5619_v57 }
  0xf7   :  { %v5866_v15 = vadd.f32 %v891_v0, %v863_v51  ;;  %1524 = vmatpush.bf16.msrb.mxu3 %v5566_v21 }
  0xf8   :  { %1486 = vmatpush.bf16.msrb.mxu0 %v5584_v25 }
  0xf9   :  { %6795 = vst [vmem:[#allocation39_spill] sm:$0xff] %v5866_v15  ;;  %1499 = vmatpush.bf16.msrb.mxu1 %v5590_v30 }
  0xfa   :  { %1512 = vmatpush.bf16.msrb.mxu2 %v5662_v46 }
  0xfb   :  { %1525 = vmatpush.bf16.msrb.mxu3 %v5608_v49 }
  0xfc   :  { %v920_v2 = vpop.f32.mrf.mxu2  ;;  %v5874_v38 = vpop.f32.mrf.mxu0  ;;  %1487 = vmatpush.bf16.msrb.mxu0 %v5621_v59 }
  0xfd   :  { %v921_v53 = vadd.f32 %v920_v2, %v5836_v34  ;;  %v949_v1 = vpop.f32.mrf.mxu3  ;;  %6796 = vst [vmem:[#allocation40_spill] sm:$0xff] %v5874_v38  ;;  %v5876_v29 = vpop.f32.mrf.mxu1  ;;  %1500 = vmatpush.bf16.msrb.mxu1 %v5630_v3 }
  0xfe   :  { %6797 = vst [vmem:[#allocation41_spill] sm:$0xff] %v5876_v29  ;;  %1513 = vmatpush.bf16.msrb.mxu2 %v5693_v48 }
  0xff   :  { %v950_v0 = vadd.f32 %v949_v1, %v921_v53  ;;  %1526 = vmatpush.bf16.msrb.mxu3 %v5656_v22 }
 0x100   :  { %1488 = vmatpush.bf16.msrb.mxu0 %v5674_v52 }
 0x101   :  { %1501 = vmatpush.bf16.msrb.mxu1 %v5680_v35 }
 0x102   :  { %1514 = vmatpush.bf16.msrb.mxu2 %v5733_v20 }
 0x103   :  { %1527 = vmatpush.bf16.msrb.mxu3 %v5711_v6 }
 0x104   :  { %v922_v2 = vpop.f32.mrf.mxu2  ;;  %v867_v28 = vpop.f32.mrf.mxu0  ;;  %1489 = vmatpush.bf16.msrb.mxu0 %v5722_v16 }
 0x105   :  { %v951_v51 = vpop.f32.mrf.mxu3  ;;  %v868_v19 = vadd.f32 %v867_v28, %v5776_v27  ;;  %v896_v53 = vpop.f32.mrf.mxu1  ;;  %1502 = vmatpush.bf16.msrb.mxu1 %v5724_v17 }
 0x106   :  { %1515 = vmatpush.bf16.msrb.mxu2 %v5756_v56 }
 0x107   :  { %v5890_v1 = vadd.f32 %v896_v53, %v868_v19  ;;  %1528 = vmatpush.bf16.msrb.mxu3 %v5758_v62 }
 0x109   :  { %6798 = vst [vmem:[#allocation42_spill] sm:$0xff] %v5890_v1 }
 0x10c   :  { %v925_v18 = vpop.f32.mrf.mxu2  ;;  %v5894_v24 = vpop.f32.mrf.mxu0 }
 0x10d   :  { %v926_v12 = vadd.f32 %v925_v18, %v5836_v34  ;;  %v954_v29 = vpop.f32.mrf.mxu3  ;;  %6799 = vst [vmem:[#allocation43_spill] sm:$0xff] %v5894_v24  ;;  %v5896_v55 = vpop.f32.mrf.mxu1 }
 0x10e   :  { %6800 = vst [vmem:[#allocation44_spill] sm:$0xff] %v5896_v55 }
 0x10f   :  { %v955_v27 = vadd.f32 %v954_v29, %v926_v12 }
 0x114   :  { %v927_v28 = vpop.f32.mrf.mxu2  ;;  %v872_v45 = vpop.f32.mrf.mxu0 }
 0x115   :  { %v956_v38 = vpop.f32.mrf.mxu3  ;;  %v873_v5 = vadd.f32 %v872_v45, %v5809_v63  ;;  %v901_v47 = vpop.f32.mrf.mxu1  ;;  %v5910_v45 = vperm.slane %v5512_v61, 3 }
 0x117   :  { %v5899_v8 = vadd.f32 %v901_v47, %v873_v5  ;;  %v918_v5 = vadd.f32 %v5857_v41, %v5836_v34 }
 0x119   :  { %6801 = vst [vmem:[#allocation45_spill] sm:$0xff] %v5899_v8  ;;  %v947_v63 = vadd.f32 %v5860_v36, %v918_v5  ;;  %v923_v5 = vadd.f32 %v922_v2, %v5836_v34 }
 0x11c   :  { %v930_v19 = vpop.f32.mrf.mxu2  ;;  %v5902_v15 = vpop.f32.mrf.mxu0 }
 0x11d   :  { %v931_v53 = vadd.f32 %v930_v19, %v5836_v34  ;;  %v959_v1 = vpop.f32.mrf.mxu3  ;;  %6802 = vst [vmem:[#allocation46_spill] sm:$0xff] %v5902_v15  ;;  %v5904_v18 = vpop.f32.mrf.mxu1 }
 0x11e   :  { %6803 = vst [vmem:[#allocation47_spill] sm:$0xff] %v5904_v18 }
 0x11f   :  { %v960_v24 = vadd.f32 %v959_v1, %v931_v53 }
 0x124   :  { %v932_v40 = vpop.f32.mrf.mxu2  ;;  %v973_v12 = vpop.f32.mrf.mxu0 }
 0x125   :  { %v961_v55 = vpop.f32.mrf.mxu3  ;;  %v5907_v29 = vadd.f32 %v973_v12, %v5849_v11  ;;  %v1002_v7 = vpop.f32.mrf.mxu1 }
 0x126   :  { %v1003_v47 = vadd.f32 %v1002_v7, %v5910_v45 }
 0x12c   :  { %v1031_v19 = vpop.f32.mrf.mxu2  ;;  %v975_v53 = vpop.f32.mrf.mxu0 }
 0x12d   :  { %v1032_v18 = vadd.f32 %v1031_v19, %v1003_v47  ;;  %v1060_v1 = vpop.f32.mrf.mxu3  ;;  %v5916_v15 = vadd.f32 %v975_v53, %v947_v63  ;;  %v1004_v8 = vpop.f32.mrf.mxu1  ;;  %v952_v47 = vadd.f32 %v951_v51, %v923_v5 }
 0x12e   :  { %v1005_v12 = vadd.f32 %v1004_v8, %v5910_v45 }
 0x12f   :  { %v5918_v11 = vadd.f32 %v1060_v1, %v1032_v18 }
 0x134   :  { %v1033_v61 = vpop.f32.mrf.mxu2  ;;  %v978_v14 = vpop.f32.mrf.mxu0 }
 0x135   :  { %v1034_v44 = vadd.f32 %v1033_v61, %v1005_v12  ;;  %v1062_v39 = vpop.f32.mrf.mxu3  ;;  %v5921_v41 = vadd.f32 %v978_v14, %v950_v0  ;;  %v1007_v7 = vpop.f32.mrf.mxu1 }
 0x136   :  { %v1008_v36 = vadd.f32 %v1007_v7, %v5910_v45 }
 0x137   :  { %6804 = vst [vmem:[#allocation48_spill] sm:$0xff] %v5921_v41  ;;  %v5923_v62 = vadd.f32 %v1062_v39, %v1034_v44 }
 0x13c   :  { %v1036_v63 = vpop.f32.mrf.mxu2  ;;  %v980_v1 = vpop.f32.mrf.mxu0 }
 0x13d   :  { %v1037_v19 = vadd.f32 %v1036_v63, %v1008_v36  ;;  %v1065_v18 = vpop.f32.mrf.mxu3  ;;  %v5927_v53 = vadd.f32 %v980_v1, %v952_v47  ;;  %v1009_v8 = vpop.f32.mrf.mxu1  ;;  %v928_v36 = vadd.f32 %v927_v28, %v5836_v34 }
 0x13e   :  { %v1010_v14 = vadd.f32 %v1009_v8, %v5910_v45 }
 0x13f   :  { %v5929_v12 = vadd.f32 %v1065_v18, %v1037_v19  ;;  %v957_v5 = vadd.f32 %v956_v38, %v928_v36 }
 0x144   :  { %v1038_v0 = vpop.f32.mrf.mxu2  ;;  %v983_v44 = vpop.f32.mrf.mxu0 }
 0x145   :  { %v1039_v61 = vadd.f32 %v1038_v0, %v1010_v14  ;;  %v1067_v39 = vpop.f32.mrf.mxu3  ;;  %v5932_v41 = vadd.f32 %v983_v44, %v955_v27  ;;  %v1012_v7 = vpop.f32.mrf.mxu1 }
 0x146   :  { %v1013_v51 = vadd.f32 %v1012_v7, %v5910_v45 }
 0x147   :  { %6805 = vst [vmem:[#allocation49_spill] sm:$0xff] %v5932_v41  ;;  %v5934_v2 = vadd.f32 %v1067_v39, %v1039_v61 }
 0x14c   :  { %v1041_v47 = vpop.f32.mrf.mxu2  ;;  %v985_v18 = vpop.f32.mrf.mxu0 }
 0x14d   :  { %v1042_v63 = vadd.f32 %v1041_v47, %v1013_v51  ;;  %v1070_v19 = vpop.f32.mrf.mxu3  ;;  %v5938_v1 = vadd.f32 %v985_v18, %v957_v5  ;;  %v1014_v8 = vpop.f32.mrf.mxu1  ;;  %v933_v51 = vadd.f32 %v932_v40, %v5836_v34 }
 0x14e   :  { %v1015_v27 = vadd.f32 %v1014_v8, %v5910_v45 }
 0x14f   :  { %v5940_v14 = vadd.f32 %v1070_v19, %v1042_v63  ;;  %v962_v36 = vadd.f32 %v961_v55, %v933_v51 }
 0x154   :  { %v1043_v0 = vpop.f32.mrf.mxu2  ;;  %v988_v39 = vpop.f32.mrf.mxu0 }
 0x155   :  { %v1044_v44 = vadd.f32 %v1043_v0, %v1015_v27  ;;  %v1072_v61 = vpop.f32.mrf.mxu3  ;;  %v5943_v41 = vadd.f32 %v988_v39, %v960_v24  ;;  %v1017_v7 = vpop.f32.mrf.mxu1 }
 0x156   :  { %v1018_v38 = vadd.f32 %v1017_v7, %v5910_v45 }
 0x157   :  { %6806 = vst [vmem:[#allocation50_spill] sm:$0xff] %v5943_v41  ;;  %v5945_v28 = vadd.f32 %v1072_v61, %v1044_v44 }
 0x15c   :  { %v1046_v5 = vpop.f32.mrf.mxu2  ;;  %v990_v19 = vpop.f32.mrf.mxu0 }
 0x15d   :  { %v1047_v47 = vadd.f32 %v1046_v5, %v1018_v38  ;;  %v1075_v63 = vpop.f32.mrf.mxu3  ;;  %v5949_v18 = vadd.f32 %v990_v19, %v962_v36  ;;  %v1019_v8 = vpop.f32.mrf.mxu1 }
 0x15e   :  { %v1020_v24 = vadd.f32 %v1019_v8, %v5910_v45 }
 0x15f   :  { %6807 = vst [vmem:[#allocation51_spill] sm:$0xff] %v5949_v18  ;;  %v5951_v27 = vadd.f32 %v1075_v63, %v1047_v47 }
 0x161   :  { %6808 = vst [vmem:[#allocation52_spill] sm:$0xff] %v5951_v27 }
 0x164   :  { %v1048_v0 = vpop.f32.mrf.mxu2  ;;  %v1249_v61 = vpop.f32.mrf.mxu0 }
 0x165   :  { %v1049_v39 = vadd.f32 %v1048_v0, %v1020_v24  ;;  %v1077_v44 = vpop.f32.mrf.mxu3  ;;  %v1292_v7 = vadd.f32 %v1249_v61, %v5592_v32  ;;  %v1262_v41 = vpop.f32.mrf.mxu1 }
 0x166   :  { %v1293_v55 = vadd.f32 %v1262_v41, %v5830_v26 }
 0x167   :  { %v5955_v40 = vadd.f32 %v1077_v44, %v1049_v39  ;;  %v4344_v34 = vmul.f32 -1.442695, %v1292_v7 }
 0x168   :  { %v4345_v38 = vmul.f32 -1.442695, %v1293_v55 }
 0x169   :  { %6809 = vst [vmem:[#allocation53_spill] sm:$0xff] %v5955_v40  ;;  %4889 = vpow2.f32 %v4344_v34 }
 0x16a   :  { %4891 = vpow2.f32 %v4345_v38 }
 0x16c   :  { %v1275_v51 = vpop.f32.mrf.mxu2  ;;  %v1251_v5 = vpop.f32.mrf.mxu0 }
 0x16d   :  { %v1288_v36 = vpop.f32.mrf.mxu3  ;;  %v1264_v47 = vpop.f32.mrf.mxu1  ;;  %v1294_v44 = vadd.f32 %v1275_v51, %v5907_v29 }
 0x16e   :  { %v1295_v45 = vadd.f32 %v1288_v36, %v5918_v11 }
 0x16f   :  { %v4890_v63 = vpop.eup %4889 }
 0x170   :  { %v4346_v19 = vmul.f32 -1.442695, %v1295_v45  ;;  %v4892_v8 = vpop.eup %4891  ;;  %v1299_v24 = vadd.f32 1.0, %v4890_v63 }
 0x171   :  { %v1318_v32 = vadd.f32 1.0, %v4892_v8 }
 0x172   :  { %4893 = vpow2.f32 %v4346_v19  ;;  %v1311_v36 = vand.u32 2147483648, %v1299_v24  ;;  %v1309_v47 = vand.u32 2147483647, %v1299_v24  ;;  %vm1305_vm2 = vweird.f32 %v1299_v24 }
 0x173   :  { %4895 = vrcp.f32 %v1299_v24  ;;  %v1330_v5 = vand.u32 2147483648, %v1318_v32  ;;  %v1328_v19 = vand.u32 2147483647, %v1318_v32  ;;  %vm1324_vm3 = vweird.f32 %v1318_v32 }
 0x174   :  { %4897 = vrcp.f32 %v1318_v32  ;;  %v1277_v0 = vpop.f32.mrf.mxu2  ;;  %v1312_v29 = vor.u32 1.1754944e-38, %v1311_v36  ;;  %vm1310_vm5 = vcmp.eq.f32.partialorder %v1309_v47, 8.507059e+37 }
 0x175   :  { %v1290_v26 = vpop.f32.mrf.mxu3  ;;  %vm1329_vm7 = vcmp.eq.f32.partialorder %v1328_v19, 8.507059e+37 }
 0x176   :  { %v1331_v26 = vor.u32 1.1754944e-38, %v1330_v5 }
 0x178   :  { %v4894_v41 = vpop.eup %4893 }
 0x179   :  { %v4896_v39 = vpop.eup %4895  ;;  %v1338_v61 = vadd.f32 1.0, %v4894_v41 }
 0x17a   :  { %v4898_v7 = vpop.eup %4897  ;;  %v1301_v55 = vmul.f32 %v4896_v39, %v1299_v24  ;;  %vm1306_vm0 = vweird.f32 %v4896_v39 }
 0x17b   :  { %v1320_v34 = vmul.f32 %v4898_v7, %v1318_v32  ;;  %4899 = vrcp.f32 %v1338_v61  ;;  %vm1325_vm1 = vweird.f32 %v4898_v7  ;;  %vm1307_vm4 = vmor %vm1305_vm2, %vm1306_vm0  ;;  %v1350_v36 = vand.u32 2147483648, %v1338_v61 }
 0x17c   :  { %v1302_v11 = vsub.f32 1.0, %v1301_v55  ;;  %4901 = vtanh.f32 %v1294_v44  ;;  %vm1326_vm6 = vmor %vm1324_vm3, %vm1325_vm1  ;;  %vm1344_vm9 = vweird.f32 %v1338_v61 }
 0x17d   :  { %v1321_v38 = vsub.f32 1.0, %v1320_v34  ;;  %v1351_v47 = vor.u32 1.1754944e-38, %v1350_v36 }
 0x17e   :  { %v1303_v45 = vmul.f32 %v4896_v39, %v1302_v11 }
 0x17f   :  { %v1322_v63 = vmul.f32 %v4898_v7, %v1321_v38 }
 0x180   :  { %v1304_v8 = vadd.f32 %v4896_v39, %v1303_v45 }
 0x181   :  { %v4900_v0 = vpop.eup %4899  ;;  %v1323_v51 = vadd.f32 %v4898_v7, %v1322_v63 }
 0x182   :  { %v1308_v41 = vsel %vm1307_vm4, %v4896_v39, %v1304_v8  ;;  %v1340_v55 = vmul.f32 %v4900_v0, %v1338_v61  ;;  %v4902_v44 = vpop.eup %4901  ;;  %vm1345_vm8 = vweird.f32 %v4900_v0  ;;  %v1348_v39 = vand.u32 2147483647, %v1338_v61  ;;  %v6813_v61 = vld [vmem:[#allocation37_spill] sm:$0xff] }
 0x183   :  { %v1313_v34 = vsel %vm1310_vm5, %v1312_v29, %v1308_v41  ;;  %v1327_v11 = vsel %vm1326_vm6, %v4898_v7, %v1323_v51  ;;  %vm1346_vm10 = vmor %vm1344_vm9, %vm1345_vm8  ;;  %v6815_v41 = vld [vmem:[#allocation19_spill] sm:$0xff] }
 0x184   :  { %v1332_v18 = vsel %vm1329_vm7, %v1331_v26, %v1327_v11  ;;  %v1355_v38 = vmul.f32 %v4902_v44, %v1313_v34  ;;  %v1341_v40 = vsub.f32 1.0, %v1340_v55  ;;  %vm1349_vm11 = vcmp.eq.f32.partialorder %v1348_v39, 8.507059e+37 }
 0x185   :  { %v1354_v27 = vmul.f32 0.0, %v1332_v18 }
 0x186   :  { %v1342_v45 = vmul.f32 %v4900_v0, %v1341_v40  ;;  %v6812_v40 = vld [vmem:[#allocation20_spill] sm:$0xff] }
 0x187   :  { %v5960_v24 = vadd.f32 %v1355_v38, %v1354_v27  ;;  %v6811_v27 = vld [vmem:[#allocation26_spill] sm:$0xff]  ;;  %v860_v8 = vadd.f32 %v6813_v61, %v6812_v40 }
 0x188   :  { %v1343_v32 = vadd.f32 %v4900_v0, %v1342_v45 }
 0x189   :  { %4903 = vtanh.f32 %v5960_v24 }
 0x18a   :  { %v1347_v5 = vsel %vm1346_vm10, %v4900_v0, %v1343_v32  ;;  %v6814_v0 = vld [vmem:[#allocation38_spill] sm:$0xff] }
 0x18b   :  { %v1352_v63 = vsel %vm1349_vm11, %v1351_v47, %v1347_v5  ;;  %v889_v29 = vadd.f32 %v6814_v0, %v860_v8 }
 0x18f   :  { %v4904_v7 = vpop.eup %4903 }
 0x190   :  { %v5963_v19 = vmul.f32 %v4904_v7, %v1352_v63 }
 0x192   :  { %6810 = vst [vmem:[#allocation54_spill] sm:$0xff] %v5963_v19  ;;  %v1360_v18 = vpack.c.bf16 %v5963_v19, %v5963_v19 }
 0x194   :  { %1369 = vmatmul.bf16.vlgmr.msra.gmra.mxu0 %v1360_v18  ;;  %1382 = vmatmul.bf16.vlgmr.msra.gmra.mxu1 %v1360_v18 }
 0x195   :  { %1395 = vmatmul.bf16.vlgmr.msra.gmra.mxu2 %v1360_v18  ;;  %1408 = vmatmul.bf16.vlgmr.msra.gmra.mxu3 %v1360_v18 }
 0x196   :  { %1603 = vmatpush.bf16.msra.mxu0 %v5433_v31  ;;  %1616 = vmatpush.bf16.msra.mxu1 %v5438_v33 }
 0x197   :  { %1629 = vmatpush.bf16.msra.mxu2 %v5487_v54  ;;  %1642 = vmatpush.bf16.msra.mxu3 %v5451_v37 }
 0x19a   :  { %1604 = vmatpush.bf16.msra.mxu0 %v5462_v42  ;;  %1617 = vmatpush.bf16.msra.mxu1 %v5464_v43 }
 0x19b   :  { %1630 = vmatpush.bf16.msra.mxu2 %v5537_v9  ;;  %1643 = vmatpush.bf16.msra.mxu3 %v5481_v50 }
 0x19e   :  { %1605 = vmatpush.bf16.msra.mxu0 %v5499_v58  ;;  %1618 = vmatpush.bf16.msra.mxu1 %v5505_v60 }
 0x19f   :  { %1631 = vmatpush.bf16.msra.mxu2 %v5572_v23  ;;  %1644 = vmatpush.bf16.msra.mxu3 %v5523_v4 }
 0x1a2   :  { %1606 = vmatpush.bf16.msra.mxu0 %v5539_v10  ;;  %1619 = vmatpush.bf16.msra.mxu1 %v5548_v13 }
 0x1a3   :  { %1632 = vmatpush.bf16.msra.mxu2 %v5619_v57  ;;  %1645 = vmatpush.bf16.msra.mxu3 %v5566_v21 }
 0x1a6   :  { %1607 = vmatpush.bf16.msra.mxu0 %v5584_v25  ;;  %1620 = vmatpush.bf16.msra.mxu1 %v5590_v30 }
 0x1a7   :  { %1633 = vmatpush.bf16.msra.mxu2 %v5662_v46  ;;  %1646 = vmatpush.bf16.msra.mxu3 %v5608_v49 }
 0x1aa   :  { %1608 = vmatpush.bf16.msra.mxu0 %v5621_v59  ;;  %1621 = vmatpush.bf16.msra.mxu1 %v5630_v3 }
 0x1ab   :  { %1634 = vmatpush.bf16.msra.mxu2 %v5693_v48  ;;  %1647 = vmatpush.bf16.msra.mxu3 %v5656_v22 }
 0x1ae   :  { %1609 = vmatpush.bf16.msra.mxu0 %v5674_v52  ;;  %1622 = vmatpush.bf16.msra.mxu1 %v5680_v35 }
 0x1af   :  { %1635 = vmatpush.bf16.msra.mxu2 %v5733_v20  ;;  %1648 = vmatpush.bf16.msra.mxu3 %v5711_v6 }
 0x1b2   :  { %1610 = vmatpush.bf16.msra.mxu0 %v5722_v16  ;;  %1623 = vmatpush.bf16.msra.mxu1 %v5724_v17 }
 0x1b3   :  { %1636 = vmatpush.bf16.msra.mxu2 %v5756_v56  ;;  %1649 = vmatpush.bf16.msra.mxu3 %v6811_v27 }
 0x211   :  { %v1370_v51 = vpop.f32.mrf.mxu0  ;;  %v1383_v26 = vpop.f32.mrf.mxu1 }
 0x212   :  { %v1413_v55 = vadd.f32 %v1370_v51, %v6815_v41  ;;  %v1414_v44 = vadd.f32 %v1383_v26, %v889_v29 }
 0x214   :  { %v4347_v34 = vmul.f32 -1.442695, %v1413_v55  ;;  %v4348_v11 = vmul.f32 -1.442695, %v1414_v44 }
 0x216   :  { %4905 = vpow2.f32 %v4347_v34 }
 0x217   :  { %4907 = vpow2.f32 %v4348_v11 }
 0x218   :  { %v1396_v38 = vpop.f32.mrf.mxu2  ;;  %v1409_v45 = vpop.f32.mrf.mxu3 }
 0x219   :  { %v1416_v32 = vadd.f32 %v1409_v45, %v5923_v62  ;;  %v1372_v36 = vpop.f32.mrf.mxu0  ;;  %v1385_v39 = vpop.f32.mrf.mxu1  ;;  %v1415_v51 = vadd.f32 %v1396_v38, %v5916_v15 }
 0x21b   :  { %v4349_v5 = vmul.f32 -1.442695, %v1416_v32 }
 0x21c   :  { %v4906_v47 = vpop.eup %4905 }
 0x21d   :  { %v4908_v7 = vpop.eup %4907  ;;  %v1420_v63 = vadd.f32 1.0, %v4906_v47  ;;  %4909 = vpow2.f32 %v4349_v5 }
 0x21e   :  { %v1439_v18 = vadd.f32 1.0, %v4908_v7 }
 0x21f   :  { %4911 = vrcp.f32 %v1420_v63  ;;  %v1432_v34 = vand.u32 2147483648, %v1420_v63  ;;  %v1430_v32 = vand.u32 2147483647, %v1420_v63  ;;  %vm1426_vm14 = vweird.f32 %v1420_v63 }
 0x220   :  { %4913 = vrcp.f32 %v1439_v18  ;;  %v1398_v40 = vpop.f32.mrf.mxu2  ;;  %v1411_v61 = vpop.f32.mrf.mxu3  ;;  %v1451_v11 = vand.u32 2147483648, %v1439_v18  ;;  %v1449_v39 = vand.u32 2147483647, %v1439_v18  ;;  %vm1445_vm15 = vweird.f32 %v1439_v18 }
 0x221   :  { %v1433_v15 = vor.u32 1.1754944e-38, %v1432_v34  ;;  %vm1431_vm2 = vcmp.eq.f32.partialorder %v1430_v32, 8.507059e+37 }
 0x222   :  { %v1452_v40 = vor.u32 1.1754944e-38, %v1451_v11  ;;  %vm1450_vm3 = vcmp.eq.f32.partialorder %v1449_v39, 8.507059e+37 }
 0x223   :  { %v4910_v8 = vpop.eup %4909 }
 0x224   :  { %v1459_v0 = vadd.f32 1.0, %v4910_v8 }
 0x225   :  { %v4912_v29 = vpop.eup %4911 }
 0x226   :  { %v4914_v26 = vpop.eup %4913  ;;  %v1422_v41 = vmul.f32 %v4912_v29, %v1420_v63  ;;  %4915 = vrcp.f32 %v1459_v0  ;;  %vm1427_vm12 = vweird.f32 %v4912_v29  ;;  %v1471_v34 = vand.u32 2147483648, %v1459_v0 }
 0x227   :  { %v1441_v62 = vmul.f32 %v4914_v26, %v1439_v18  ;;  %4917 = vtanh.f32 %v1415_v51  ;;  %vm1446_vm13 = vweird.f32 %v4914_v26  ;;  %vm1428_vm0 = vmor %vm1426_vm14, %vm1427_vm12  ;;  %vm1465_vm5 = vweird.f32 %v1459_v0 }
 0x228   :  { %v1423_v55 = vsub.f32 1.0, %v1422_v41  ;;  %vm1447_vm1 = vmor %vm1445_vm15, %vm1446_vm13  ;;  %v1472_v32 = vor.u32 1.1754944e-38, %v1471_v34 }
 0x229   :  { %v1442_v44 = vsub.f32 1.0, %v1441_v62 }
 0x22a   :  { %v1424_v45 = vmul.f32 %v4912_v29, %v1423_v55 }
 0x22b   :  { %v1443_v36 = vmul.f32 %v4914_v26, %v1442_v44 }
 0x22c   :  { %v4916_v5 = vpop.eup %4915  ;;  %v1425_v47 = vadd.f32 %v4912_v29, %v1424_v45 }
 0x22d   :  { %v1444_v38 = vadd.f32 %v4914_v26, %v1443_v36  ;;  %v1461_v7 = vmul.f32 %v4916_v5, %v1459_v0  ;;  %v4918_v8 = vpop.eup %4917  ;;  %vm1466_vm4 = vweird.f32 %v4916_v5 }
 0x22e   :  { %v1429_v61 = vsel %vm1428_vm0, %v4912_v29, %v1425_v47  ;;  %v1469_v29 = vand.u32 2147483647, %v1459_v0  ;;  %vm1467_vm6 = vmor %vm1465_vm5, %vm1466_vm4 }
 0x22f   :  { %v1434_v51 = vsel %vm1431_vm2, %v1433_v15, %v1429_v61  ;;  %v1448_v41 = vsel %vm1447_vm1, %v4914_v26, %v1444_v38  ;;  %v1462_v62 = vsub.f32 1.0, %v1461_v7  ;;  %v6817_v15 = vld [vmem:[#allocation39_spill] sm:$0xff] }
 0x230   :  { %v1453_v55 = vsel %vm1450_vm3, %v1452_v40, %v1448_v41  ;;  %v1476_v44 = vmul.f32 %v4918_v8, %v1434_v51  ;;  %vm1470_vm7 = vcmp.eq.f32.partialorder %v1469_v29, 8.507059e+37 }
 0x231   :  { %v1475_v19 = vmul.f32 %v1453_v55, %v5960_v24  ;;  %v1463_v45 = vmul.f32 %v4916_v5, %v1462_v62 }
 0x233   :  { %v6006_v63 = vadd.f32 %v1476_v44, %v1475_v19  ;;  %v1464_v18 = vadd.f32 %v4916_v5, %v1463_v45 }
 0x235   :  { %4919 = vtanh.f32 %v6006_v63  ;;  %v1468_v11 = vsel %vm1467_vm6, %v4916_v5, %v1464_v18  ;;  %v6816_v5 = vld [vmem:[#allocation21_spill] sm:$0xff] }
 0x236   :  { %v1473_v36 = vsel %vm1470_vm7, %v1472_v32, %v1468_v11 }
 0x23b   :  { %v4920_v26 = vpop.eup %4919 }
 0x23c   :  { %v6009_v39 = vmul.f32 %v4920_v26, %v1473_v36 }
 0x23e   :  { %v1481_v24 = vpack.c.bf16 %v6009_v39, %v6009_v39 }
 0x240   :  { %1490 = vmatmul.bf16.vlgmr.msrb.gmra.mxu0 %v1481_v24  ;;  %1503 = vmatmul.bf16.vlgmr.msrb.gmra.mxu1 %v1481_v24 }
 0x241   :  { %1516 = vmatmul.bf16.vlgmr.msrb.gmra.mxu2 %v1481_v24  ;;  %1529 = vmatmul.bf16.vlgmr.msrb.gmra.mxu3 %v1481_v24  ;;  %v6818_v24 = vld [vmem:[#allocation48_spill] sm:$0xff] }
 0x242   :  { %1724 = vmatpush.bf16.msrb.mxu0 %v5433_v31  ;;  %1737 = vmatpush.bf16.msrb.mxu1 %v5438_v33 }
 0x243   :  { %1750 = vmatpush.bf16.msrb.mxu2 %v5487_v54  ;;  %1763 = vmatpush.bf16.msrb.mxu3 %v5451_v37 }
 0x246   :  { %1725 = vmatpush.bf16.msrb.mxu0 %v5462_v42  ;;  %1738 = vmatpush.bf16.msrb.mxu1 %v5464_v43 }
 0x247   :  { %1751 = vmatpush.bf16.msrb.mxu2 %v5537_v9  ;;  %1764 = vmatpush.bf16.msrb.mxu3 %v5481_v50 }
 0x24a   :  { %1726 = vmatpush.bf16.msrb.mxu0 %v5499_v58  ;;  %1739 = vmatpush.bf16.msrb.mxu1 %v5505_v60 }
 0x24b   :  { %1752 = vmatpush.bf16.msrb.mxu2 %v5572_v23  ;;  %1765 = vmatpush.bf16.msrb.mxu3 %v5523_v4 }
 0x24e   :  { %1727 = vmatpush.bf16.msrb.mxu0 %v5539_v10  ;;  %1740 = vmatpush.bf16.msrb.mxu1 %v5548_v13 }
 0x24f   :  { %1753 = vmatpush.bf16.msrb.mxu2 %v5619_v57  ;;  %1766 = vmatpush.bf16.msrb.mxu3 %v5566_v21 }
 0x252   :  { %1728 = vmatpush.bf16.msrb.mxu0 %v5584_v25  ;;  %1741 = vmatpush.bf16.msrb.mxu1 %v5590_v30 }
 0x253   :  { %1754 = vmatpush.bf16.msrb.mxu2 %v5662_v46  ;;  %1767 = vmatpush.bf16.msrb.mxu3 %v5608_v49 }
 0x256   :  { %1729 = vmatpush.bf16.msrb.mxu0 %v5621_v59  ;;  %1742 = vmatpush.bf16.msrb.mxu1 %v5630_v3 }
 0x257   :  { %1755 = vmatpush.bf16.msrb.mxu2 %v5693_v48  ;;  %1768 = vmatpush.bf16.msrb.mxu3 %v5656_v22 }
 0x25a   :  { %1730 = vmatpush.bf16.msrb.mxu0 %v5674_v52  ;;  %1743 = vmatpush.bf16.msrb.mxu1 %v5680_v35 }
 0x25b   :  { %1756 = vmatpush.bf16.msrb.mxu2 %v5733_v20  ;;  %1769 = vmatpush.bf16.msrb.mxu3 %v5711_v6 }
 0x25e   :  { %1731 = vmatpush.bf16.msrb.mxu0 %v5722_v16  ;;  %1744 = vmatpush.bf16.msrb.mxu1 %v5724_v17 }
 0x25f   :  { %1757 = vmatpush.bf16.msrb.mxu2 %v5756_v56  ;;  %1770 = vmatpush.bf16.msrb.mxu3 %v6811_v27 }
 0x2bd   :  { %v1491_v19 = vpop.f32.mrf.mxu0  ;;  %v1504_v0 = vpop.f32.mrf.mxu1 }
 0x2be   :  { %v1534_v47 = vadd.f32 %v1491_v19, %v6816_v5  ;;  %v1535_v38 = vadd.f32 %v1504_v0, %v6817_v15 }
 0x2c0   :  { %v4350_v7 = vmul.f32 -1.442695, %v1534_v47  ;;  %v4351_v40 = vmul.f32 -1.442695, %v1535_v38 }
 0x2c2   :  { %4921 = vpow2.f32 %v4350_v7 }
 0x2c3   :  { %4923 = vpow2.f32 %v4351_v40 }
 0x2c4   :  { %v1517_v61 = vpop.f32.mrf.mxu2  ;;  %v1530_v8 = vpop.f32.mrf.mxu3 }
 0x2c5   :  { %v1537_v51 = vadd.f32 %v1530_v8, %v5929_v12  ;;  %v1493_v41 = vpop.f32.mrf.mxu0  ;;  %v1506_v62 = vpop.f32.mrf.mxu1  ;;  %v1536_v19 = vadd.f32 %v1517_v61, %v6818_v24 }
 0x2c7   :  { %v4352_v55 = vmul.f32 -1.442695, %v1537_v51 }
 0x2c8   :  { %v4922_v44 = vpop.eup %4921 }
 0x2c9   :  { %v4924_v45 = vpop.eup %4923  ;;  %v1541_v18 = vadd.f32 1.0, %v4922_v44  ;;  %4925 = vpow2.f32 %v4352_v55 }
 0x2ca   :  { %v1560_v34 = vadd.f32 1.0, %v4924_v45 }
 0x2cb   :  { %4927 = vrcp.f32 %v1541_v18  ;;  %v1553_v38 = vand.u32 2147483648, %v1541_v18  ;;  %v1551_v8 = vand.u32 2147483647, %v1541_v18  ;;  %vm1547_vm10 = vweird.f32 %v1541_v18 }
 0x2cc   :  { %4929 = vrcp.f32 %v1560_v34  ;;  %v1519_v29 = vpop.f32.mrf.mxu2  ;;  %v1532_v11 = vpop.f32.mrf.mxu3  ;;  %v1572_v7 = vand.u32 2147483648, %v1560_v34  ;;  %v1570_v41 = vand.u32 2147483647, %v1560_v34  ;;  %vm1566_vm11 = vweird.f32 %v1560_v34 }
 0x2cd   :  { %v1554_v61 = vor.u32 1.1754944e-38, %v1553_v38  ;;  %vm1552_vm14 = vcmp.eq.f32.partialorder %v1551_v8, 8.507059e+37 }
 0x2ce   :  { %v1573_v29 = vor.u32 1.1754944e-38, %v1572_v7  ;;  %vm1571_vm15 = vcmp.eq.f32.partialorder %v1570_v41, 8.507059e+37 }
 0x2cf   :  { %v4926_v32 = vpop.eup %4925 }
 0x2d0   :  { %v1580_v26 = vadd.f32 1.0, %v4926_v32 }
 0x2d1   :  { %v4928_v36 = vpop.eup %4927 }
 0x2d2   :  { %v4930_v0 = vpop.eup %4929  ;;  %v1543_v5 = vmul.f32 %v4928_v36, %v1541_v18  ;;  %4931 = vrcp.f32 %v1580_v26  ;;  %vm1548_vm8 = vweird.f32 %v4928_v36  ;;  %v1592_v38 = vand.u32 2147483648, %v1580_v26 }
 0x2d3   :  { %v1562_v12 = vmul.f32 %v4930_v0, %v1560_v34  ;;  %4933 = vtanh.f32 %v1536_v19  ;;  %vm1567_vm9 = vweird.f32 %v4930_v0  ;;  %vm1549_vm12 = vmor %vm1547_vm10, %vm1548_vm8  ;;  %vm1586_vm1 = vweird.f32 %v1580_v26 }
 0x2d4   :  { %v1544_v47 = vsub.f32 1.0, %v1543_v5  ;;  %vm1568_vm13 = vmor %vm1566_vm11, %vm1567_vm9  ;;  %v1593_v8 = vor.u32 1.1754944e-38, %v1592_v38 }
 0x2d5   :  { %v1563_v15 = vsub.f32 1.0, %v1562_v12 }
 0x2d6   :  { %v1545_v40 = vmul.f32 %v4928_v36, %v1544_v47 }
 0x2d7   :  { %v1564_v51 = vmul.f32 %v4930_v0, %v1563_v15 }
 0x2d8   :  { %v4932_v62 = vpop.eup %4931  ;;  %v1546_v55 = vadd.f32 %v4928_v36, %v1545_v40 }
 0x2d9   :  { %v1565_v44 = vadd.f32 %v4930_v0, %v1564_v51  ;;  %v1582_v45 = vmul.f32 %v4932_v62, %v1580_v26  ;;  %v4934_v32 = vpop.eup %4933  ;;  %vm1587_vm0 = vweird.f32 %v4932_v62 }
 0x2da   :  { %v1550_v11 = vsel %vm1549_vm12, %v4928_v36, %v1546_v55  ;;  %v1590_v36 = vand.u32 2147483647, %v1580_v26  ;;  %vm1588_vm2 = vmor %vm1586_vm1, %vm1587_vm0  ;;  %v6820_v26 = vld [vmem:[#allocation17_spill] sm:$0xff] }
 0x2db   :  { %v1555_v24 = vsel %vm1552_vm14, %v1554_v61, %v1550_v11  ;;  %v1569_v19 = vsel %vm1568_vm13, %v4930_v0, %v1565_v44  ;;  %v1583_v5 = vsub.f32 1.0, %v1582_v45  ;;  %v6822_v61 = vld [vmem:[#allocation18_spill] sm:$0xff]  ;;  %v6823_v44 = vld [vmem:[#allocation25_spill] sm:$0xff] }
 0x2dc   :  { %v1574_v12 = vsel %vm1571_vm15, %v1573_v29, %v1569_v19  ;;  %v1597_v47 = vmul.f32 %v4934_v32, %v1555_v24  ;;  %vm1591_vm3 = vcmp.eq.f32.partialorder %v1590_v36, 8.507059e+37  ;;  %v836_v45 = vadd.f32 %v6823_v44, %v6822_v61  ;;  %v6824_v29 = vld [vmem:[#allocation40_spill] sm:$0xff]  ;;  %v6825_v32 = vld [vmem:[#allocation23_spill] sm:$0xff] }
 0x2dd   :  { %v1596_v15 = vmul.f32 %v1574_v12, %v6006_v63  ;;  %v1584_v40 = vmul.f32 %v4932_v62, %v1583_v5  ;;  %v6826_v19 = vld [vmem:[#allocation24_spill] sm:$0xff]  ;;  %v6827_v12 = vld [vmem:[#allocation41_spill] sm:$0xff] }
 0x2de   :  { %v865_v11 = vadd.f32 %v6824_v29, %v836_v45 }
 0x2df   :  { %v6050_v18 = vadd.f32 %v1597_v47, %v1596_v15  ;;  %v1585_v34 = vadd.f32 %v4932_v62, %v1584_v40 }
 0x2e0   :  { %v894_v47 = vadd.f32 %v6827_v12, %v865_v11 }
 0x2e1   :  { %4935 = vtanh.f32 %v6050_v18  ;;  %v1589_v7 = vsel %vm1588_vm2, %v4932_v62, %v1585_v34  ;;  %v6821_v62 = vld [vmem:[#allocation22_spill] sm:$0xff] }
 0x2e2   :  { %v1594_v51 = vsel %vm1591_vm3, %v1593_v8, %v1589_v7  ;;  %v749_v55 = vadd.f32 %v6821_v62, %v6820_v26 }
 0x2e4   :  { %v778_v24 = vadd.f32 %v6825_v32, %v749_v55 }
 0x2e6   :  { %v807_v5 = vadd.f32 %v6826_v19, %v778_v24 }
 0x2e7   :  { %v4936_v0 = vpop.eup %4935 }
 0x2e8   :  { %v6053_v41 = vmul.f32 %v4936_v0, %v1594_v51 }
 0x2ea   :  { %6819 = vst [vmem:[#allocation26_spill] sm:$0xff] %v6053_v41  ;;  %v1602_v63 = vpack.c.bf16 %v6053_v41, %v6053_v41 }
 0x2ec   :  { %1611 = vmatmul.bf16.vlgmr.msra.gmra.mxu0 %v1602_v63  ;;  %1624 = vmatmul.bf16.vlgmr.msra.gmra.mxu1 %v1602_v63 }
 0x2ed   :  { %1637 = vmatmul.bf16.vlgmr.msra.gmra.mxu2 %v1602_v63  ;;  %1650 = vmatmul.bf16.vlgmr.msra.gmra.mxu3 %v1602_v63 }
 0x2ee   :  { %1845 = vmatpush.bf16.msra.mxu0 %v5433_v31  ;;  %1858 = vmatpush.bf16.msra.mxu1 %v5438_v33 }
 0x2ef   :  { %1871 = vmatpush.bf16.msra.mxu2 %v5487_v54  ;;  %1884 = vmatpush.bf16.msra.mxu3 %v5451_v37 }
 0x2f2   :  { %1846 = vmatpush.bf16.msra.mxu0 %v5462_v42  ;;  %1859 = vmatpush.bf16.msra.mxu1 %v5464_v43 }
 0x2f3   :  { %1872 = vmatpush.bf16.msra.mxu2 %v5537_v9  ;;  %1885 = vmatpush.bf16.msra.mxu3 %v5481_v50 }
 0x2f6   :  { %1847 = vmatpush.bf16.msra.mxu0 %v5499_v58  ;;  %1860 = vmatpush.bf16.msra.mxu1 %v5505_v60 }
 0x2f7   :  { %1873 = vmatpush.bf16.msra.mxu2 %v5572_v23  ;;  %1886 = vmatpush.bf16.msra.mxu3 %v5523_v4 }
 0x2fa   :  { %1848 = vmatpush.bf16.msra.mxu0 %v5539_v10  ;;  %1861 = vmatpush.bf16.msra.mxu1 %v5548_v13 }
 0x2fb   :  { %1874 = vmatpush.bf16.msra.mxu2 %v5619_v57  ;;  %1887 = vmatpush.bf16.msra.mxu3 %v5566_v21 }
 0x2fe   :  { %1849 = vmatpush.bf16.msra.mxu0 %v5584_v25  ;;  %1862 = vmatpush.bf16.msra.mxu1 %v5590_v30 }
 0x2ff   :  { %1875 = vmatpush.bf16.msra.mxu2 %v5662_v46  ;;  %1888 = vmatpush.bf16.msra.mxu3 %v5608_v49 }
 0x302   :  { %1850 = vmatpush.bf16.msra.mxu0 %v5621_v59  ;;  %1863 = vmatpush.bf16.msra.mxu1 %v5630_v3 }
 0x303   :  { %1876 = vmatpush.bf16.msra.mxu2 %v5693_v48  ;;  %1889 = vmatpush.bf16.msra.mxu3 %v5656_v22 }
 0x306   :  { %1851 = vmatpush.bf16.msra.mxu0 %v5674_v52  ;;  %1864 = vmatpush.bf16.msra.mxu1 %v5680_v35 }
 0x307   :  { %1877 = vmatpush.bf16.msra.mxu2 %v5733_v20  ;;  %1890 = vmatpush.bf16.msra.mxu3 %v5711_v6 }
 0x30a   :  { %1852 = vmatpush.bf16.msra.mxu0 %v5722_v16  ;;  %1865 = vmatpush.bf16.msra.mxu1 %v5724_v17 }
 0x30b   :  { %1878 = vmatpush.bf16.msra.mxu2 %v5756_v56  ;;  %1891 = vmatpush.bf16.msra.mxu3 %v6811_v27 }
 0x369   :  { %v1612_v15 = vpop.f32.mrf.mxu0  ;;  %v1625_v40 = vpop.f32.mrf.mxu1 }
 0x36a   :  { %v1655_v34 = vadd.f32 %v1612_v15, %v807_v5  ;;  %v1656_v38 = vadd.f32 %v1625_v40, %v894_v47 }
 0x36c   :  { %v4353_v36 = vmul.f32 -1.442695, %v1655_v34  ;;  %v4354_v7 = vmul.f32 -1.442695, %v1656_v38 }
 0x36e   :  { %4937 = vpow2.f32 %v4353_v36 }
 0x36f   :  { %4939 = vpow2.f32 %v4354_v7 }
 0x370   :  { %v1638_v8 = vpop.f32.mrf.mxu2  ;;  %v1651_v0 = vpop.f32.mrf.mxu3 }
 0x371   :  { %v1658_v51 = vadd.f32 %v1651_v0, %v5934_v2  ;;  %v1614_v63 = vpop.f32.mrf.mxu0  ;;  %v1627_v62 = vpop.f32.mrf.mxu1  ;;  %v1657_v47 = vadd.f32 %v1638_v8, %v5927_v53 }
 0x373   :  { %v4355_v44 = vmul.f32 -1.442695, %v1658_v51 }
 0x374   :  { %v4938_v55 = vpop.eup %4937 }
 0x375   :  { %v4940_v45 = vpop.eup %4939  ;;  %v1662_v29 = vadd.f32 1.0, %v4938_v55  ;;  %4941 = vpow2.f32 %v4355_v44 }
 0x376   :  { %v1681_v11 = vadd.f32 1.0, %v4940_v45 }
 0x377   :  { %4943 = vrcp.f32 %v1662_v29  ;;  %v1674_v36 = vand.u32 2147483648, %v1662_v29  ;;  %v1672_v51 = vand.u32 2147483647, %v1662_v29  ;;  %vm1668_vm6 = vweird.f32 %v1662_v29 }
 0x378   :  { %4945 = vrcp.f32 %v1681_v11  ;;  %v1640_v32 = vpop.f32.mrf.mxu2  ;;  %v1653_v24 = vpop.f32.mrf.mxu3  ;;  %v1693_v7 = vand.u32 2147483648, %v1681_v11  ;;  %v1691_v62 = vand.u32 2147483647, %v1681_v11  ;;  %vm1687_vm7 = vweird.f32 %v1681_v11 }
 0x379   :  { %v1675_v53 = vor.u32 1.1754944e-38, %v1674_v36  ;;  %vm1673_vm10 = vcmp.eq.f32.partialorder %v1672_v51, 8.507059e+37 }
 0x37a   :  { %v1694_v32 = vor.u32 1.1754944e-38, %v1693_v7  ;;  %vm1692_vm11 = vcmp.eq.f32.partialorder %v1691_v62, 8.507059e+37 }
 0x37b   :  { %v4942_v19 = vpop.eup %4941 }
 0x37c   :  { %v1701_v5 = vadd.f32 1.0, %v4942_v19 }
 0x37d   :  { %v4944_v12 = vpop.eup %4943 }
 0x37e   :  { %v4946_v15 = vpop.eup %4945  ;;  %v1664_v40 = vmul.f32 %v4944_v12, %v1662_v29  ;;  %4947 = vrcp.f32 %v1701_v5  ;;  %vm1669_vm4 = vweird.f32 %v4944_v12  ;;  %v1713_v36 = vand.u32 2147483648, %v1701_v5 }
 0x37f   :  { %v1683_v2 = vmul.f32 %v4946_v15, %v1681_v11  ;;  %4949 = vtanh.f32 %v1657_v47  ;;  %vm1688_vm5 = vweird.f32 %v4946_v15  ;;  %vm1670_vm8 = vmor %vm1668_vm6, %vm1669_vm4  ;;  %vm1707_vm13 = vweird.f32 %v1701_v5 }
 0x380   :  { %v1665_v34 = vsub.f32 1.0, %v1664_v40  ;;  %vm1689_vm9 = vmor %vm1687_vm7, %vm1688_vm5  ;;  %v1714_v51 = vor.u32 1.1754944e-38, %v1713_v36 }
 0x381   :  { %v1684_v38 = vsub.f32 1.0, %v1683_v2 }
 0x382   :  { %v1666_v0 = vmul.f32 %v4944_v12, %v1665_v34 }
 0x383   :  { %v1685_v63 = vmul.f32 %v4946_v15, %v1684_v38 }
 0x384   :  { %v4948_v44 = vpop.eup %4947  ;;  %v1667_v55 = vadd.f32 %v4944_v12, %v1666_v0 }
 0x385   :  { %v1686_v8 = vadd.f32 %v4946_v15, %v1685_v63  ;;  %v1703_v45 = vmul.f32 %v4948_v44, %v1701_v5  ;;  %v4950_v19 = vpop.eup %4949  ;;  %vm1708_vm12 = vweird.f32 %v4948_v44 }
 0x386   :  { %v1671_v24 = vsel %vm1670_vm8, %v4944_v12, %v1667_v55  ;;  %v1711_v12 = vand.u32 2147483647, %v1701_v5  ;;  %vm1709_vm14 = vmor %vm1707_vm13, %vm1708_vm12 }
 0x387   :  { %v1676_v47 = vsel %vm1673_vm10, %v1675_v53, %v1671_v24  ;;  %v1690_v40 = vsel %vm1689_vm9, %v4946_v15, %v1686_v8  ;;  %v1704_v2 = vsub.f32 1.0, %v1703_v45  ;;  %v6829_v53 = vld [vmem:[#allocation42_spill] sm:$0xff] }
 0x388   :  { %v1695_v34 = vsel %vm1692_vm11, %v1694_v32, %v1690_v40  ;;  %v1718_v38 = vmul.f32 %v4950_v19, %v1676_v47  ;;  %vm1712_vm15 = vcmp.eq.f32.partialorder %v1711_v12, 8.507059e+37 }
 0x389   :  { %v1717_v41 = vmul.f32 %v1695_v34, %v6050_v18  ;;  %v1705_v0 = vmul.f32 %v4948_v44, %v1704_v2 }
 0x38b   :  { %v6100_v29 = vadd.f32 %v1718_v38, %v1717_v41  ;;  %v1706_v11 = vadd.f32 %v4948_v44, %v1705_v0 }
 0x38d   :  { %4951 = vtanh.f32 %v6100_v29  ;;  %v1710_v7 = vsel %vm1709_vm14, %v4948_v44, %v1706_v11  ;;  %v6828_v44 = vld [vmem:[#allocation27_spill] sm:$0xff] }
 0x38e   :  { %v1715_v63 = vsel %vm1712_vm15, %v1714_v51, %v1710_v7 }
 0x393   :  { %v4952_v15 = vpop.eup %4951 }
 0x394   :  { %v6103_v62 = vmul.f32 %v4952_v15, %v1715_v63 }
 0x396   :  { %v1723_v18 = vpack.c.bf16 %v6103_v62, %v6103_v62 }
 0x398   :  { %1732 = vmatmul.bf16.vlgmr.msrb.gmra.mxu0 %v1723_v18  ;;  %1745 = vmatmul.bf16.vlgmr.msrb.gmra.mxu1 %v1723_v18 }
 0x399   :  { %1758 = vmatmul.bf16.vlgmr.msrb.gmra.mxu2 %v1723_v18  ;;  %1771 = vmatmul.bf16.vlgmr.msrb.gmra.mxu3 %v1723_v18  ;;  %v6830_v18 = vld [vmem:[#allocation49_spill] sm:$0xff] }
 0x39a   :  { %1966 = vmatpush.bf16.msrb.mxu0 %v5433_v31  ;;  %1979 = vmatpush.bf16.msrb.mxu1 %v5438_v33 }
 0x39b   :  { %1992 = vmatpush.bf16.msrb.mxu2 %v5487_v54  ;;  %2005 = vmatpush.bf16.msrb.mxu3 %v5451_v37 }
 0x39e   :  { %1967 = vmatpush.bf16.msrb.mxu0 %v5462_v42  ;;  %1980 = vmatpush.bf16.msrb.mxu1 %v5464_v43 }
 0x39f   :  { %1993 = vmatpush.bf16.msrb.mxu2 %v5537_v9  ;;  %2006 = vmatpush.bf16.msrb.mxu3 %v5481_v50 }
 0x3a2   :  { %1968 = vmatpush.bf16.msrb.mxu0 %v5499_v58  ;;  %1981 = vmatpush.bf16.msrb.mxu1 %v5505_v60 }
 0x3a3   :  { %1994 = vmatpush.bf16.msrb.mxu2 %v5572_v23  ;;  %2007 = vmatpush.bf16.msrb.mxu3 %v5523_v4 }
 0x3a6   :  { %1969 = vmatpush.bf16.msrb.mxu0 %v5539_v10  ;;  %1982 = vmatpush.bf16.msrb.mxu1 %v5548_v13 }
 0x3a7   :  { %1995 = vmatpush.bf16.msrb.mxu2 %v5619_v57  ;;  %2008 = vmatpush.bf16.msrb.mxu3 %v5566_v21 }
 0x3aa   :  { %1970 = vmatpush.bf16.msrb.mxu0 %v5584_v25  ;;  %1983 = vmatpush.bf16.msrb.mxu1 %v5590_v30 }
 0x3ab   :  { %1996 = vmatpush.bf16.msrb.mxu2 %v5662_v46  ;;  %2009 = vmatpush.bf16.msrb.mxu3 %v5608_v49 }
 0x3ae   :  { %1971 = vmatpush.bf16.msrb.mxu0 %v5621_v59  ;;  %1984 = vmatpush.bf16.msrb.mxu1 %v5630_v3 }
 0x3af   :  { %1997 = vmatpush.bf16.msrb.mxu2 %v5693_v48  ;;  %2010 = vmatpush.bf16.msrb.mxu3 %v5656_v22 }
 0x3b2   :  { %1972 = vmatpush.bf16.msrb.mxu0 %v5674_v52  ;;  %1985 = vmatpush.bf16.msrb.mxu1 %v5680_v35 }
 0x3b3   :  { %1998 = vmatpush.bf16.msrb.mxu2 %v5733_v20  ;;  %2011 = vmatpush.bf16.msrb.mxu3 %v5711_v6 }
 0x3b6   :  { %1973 = vmatpush.bf16.msrb.mxu0 %v5722_v16  ;;  %1986 = vmatpush.bf16.msrb.mxu1 %v5724_v17 }
 0x3b7   :  { %1999 = vmatpush.bf16.msrb.mxu2 %v5756_v56  ;;  %2012 = vmatpush.bf16.msrb.mxu3 %v6811_v27 }
 0x415   :  { %v1733_v41 = vpop.f32.mrf.mxu0  ;;  %v1746_v5 = vpop.f32.mrf.mxu1 }
 0x416   :  { %v1776_v55 = vadd.f32 %v1733_v41, %v6828_v44  ;;  %v1777_v8 = vadd.f32 %v1746_v5, %v6829_v53 }
 0x418   :  { %v4356_v45 = vmul.f32 -1.442695, %v1776_v55  ;;  %v4357_v32 = vmul.f32 -1.442695, %v1777_v8 }
 0x41a   :  { %4953 = vpow2.f32 %v4356_v45 }
 0x41b   :  { %4955 = vpow2.f32 %v4357_v32 }
 0x41c   :  { %v1759_v24 = vpop.f32.mrf.mxu2  ;;  %v1772_v19 = vpop.f32.mrf.mxu3 }
 0x41d   :  { %v1779_v47 = vadd.f32 %v1772_v19, %v5940_v14  ;;  %v1735_v40 = vpop.f32.mrf.mxu0  ;;  %v1748_v2 = vpop.f32.mrf.mxu1  ;;  %v1778_v41 = vadd.f32 %v1759_v24, %v6830_v18 }
 0x41f   :  { %v4358_v34 = vmul.f32 -1.442695, %v1779_v47 }
 0x420   :  { %v4954_v38 = vpop.eup %4953 }
 0x421   :  { %v4956_v0 = vpop.eup %4955  ;;  %v1783_v11 = vadd.f32 1.0, %v4954_v38  ;;  %4957 = vpow2.f32 %v4358_v34 }
 0x422   :  { %v1802_v36 = vadd.f32 1.0, %v4956_v0 }
 0x423   :  { %4959 = vrcp.f32 %v1783_v11  ;;  %v1795_v8 = vand.u32 2147483648, %v1783_v11  ;;  %v1793_v19 = vand.u32 2147483647, %v1783_v11  ;;  %vm1789_vm2 = vweird.f32 %v1783_v11 }
 0x424   :  { %4961 = vrcp.f32 %v1802_v36  ;;  %v1761_v12 = vpop.f32.mrf.mxu2  ;;  %v1774_v7 = vpop.f32.mrf.mxu3  ;;  %v1814_v45 = vand.u32 2147483648, %v1802_v36  ;;  %v1812_v40 = vand.u32 2147483647, %v1802_v36  ;;  %vm1808_vm3 = vweird.f32 %v1802_v36 }
 0x425   :  { %v1796_v24 = vor.u32 1.1754944e-38, %v1795_v8  ;;  %vm1794_vm6 = vcmp.eq.f32.partialorder %v1793_v19, 8.507059e+37 }
 0x426   :  { %v1815_v12 = vor.u32 1.1754944e-38, %v1814_v45  ;;  %vm1813_vm7 = vcmp.eq.f32.partialorder %v1812_v40, 8.507059e+37 }
 0x427   :  { %v4958_v51 = vpop.eup %4957 }
 0x428   :  { %v1822_v15 = vadd.f32 1.0, %v4958_v51 }
 0x429   :  { %v4960_v63 = vpop.eup %4959 }
 0x42a   :  { %v4962_v5 = vpop.eup %4961  ;;  %v1785_v44 = vmul.f32 %v4960_v63, %v1783_v11  ;;  %4963 = vrcp.f32 %v1822_v15  ;;  %vm1790_vm0 = vweird.f32 %v4960_v63  ;;  %v1834_v8 = vand.u32 2147483648, %v1822_v15 }
 0x42b   :  { %v1804_v14 = vmul.f32 %v4962_v5, %v1802_v36  ;;  %4965 = vtanh.f32 %v1778_v41  ;;  %vm1809_vm1 = vweird.f32 %v4962_v5  ;;  %vm1791_vm4 = vmor %vm1789_vm2, %vm1790_vm0  ;;  %vm1828_vm9 = vweird.f32 %v1822_v15 }
 0x42c   :  { %v1786_v55 = vsub.f32 1.0, %v1785_v44  ;;  %vm1810_vm5 = vmor %vm1808_vm3, %vm1809_vm1  ;;  %v1835_v19 = vor.u32 1.1754944e-38, %v1834_v8 }
 0x42d   :  { %v1805_v53 = vsub.f32 1.0, %v1804_v14 }
 0x42e   :  { %v1787_v32 = vmul.f32 %v4960_v63, %v1786_v55 }
 0x42f   :  { %v1806_v47 = vmul.f32 %v4962_v5, %v1805_v53 }
 0x430   :  { %v4964_v2 = vpop.eup %4963  ;;  %v1788_v34 = vadd.f32 %v4960_v63, %v1787_v32 }
 0x431   :  { %v1807_v38 = vadd.f32 %v4962_v5, %v1806_v47  ;;  %v1824_v0 = vmul.f32 %v4964_v2, %v1822_v15  ;;  %v4966_v51 = vpop.eup %4965  ;;  %vm1829_vm8 = vweird.f32 %v4964_v2 }
 0x432   :  { %v1792_v7 = vsel %vm1791_vm4, %v4960_v63, %v1788_v34  ;;  %v1832_v63 = vand.u32 2147483647, %v1822_v15  ;;  %vm1830_vm10 = vmor %vm1828_vm9, %vm1829_vm8 }
 0x433   :  { %v1797_v18 = vsel %vm1794_vm6, %v1796_v24, %v1792_v7  ;;  %v1811_v41 = vsel %vm1810_vm5, %v4962_v5, %v1807_v38  ;;  %v1825_v44 = vsub.f32 1.0, %v1824_v0 }
 0x434   :  { %v1816_v14 = vsel %vm1813_vm7, %v1815_v12, %v1811_v41  ;;  %v1839_v55 = vmul.f32 %v4966_v51, %v1797_v18  ;;  %vm1833_vm11 = vcmp.eq.f32.partialorder %v1832_v63, 8.507059e+37 }
 0x435   :  { %v1838_v53 = vmul.f32 %v1816_v14, %v6100_v29  ;;  %v1826_v32 = vmul.f32 %v4964_v2, %v1825_v44 }
 0x437   :  { %v6144_v11 = vadd.f32 %v1839_v55, %v1838_v53  ;;  %v1827_v36 = vadd.f32 %v4964_v2, %v1826_v32 }
 0x439   :  { %4967 = vtanh.f32 %v6144_v11  ;;  %v1831_v45 = vsel %vm1830_vm10, %v4964_v2, %v1827_v36 }
 0x43a   :  { %v1836_v47 = vsel %vm1833_vm11, %v1835_v19, %v1831_v45 }
 0x43f   :  { %v4968_v5 = vpop.eup %4967 }
 0x440   :  { %v6147_v40 = vmul.f32 %v4968_v5, %v1836_v47 }
 0x442   :  { %v1844_v29 = vpack.c.bf16 %v6147_v40, %v6147_v40 }
 0x444   :  { %1853 = vmatmul.bf16.vlgmr.msra.gmra.mxu0 %v1844_v29  ;;  %1866 = vmatmul.bf16.vlgmr.msra.gmra.mxu1 %v1844_v29 }
 0x445   :  { %1879 = vmatmul.bf16.vlgmr.msra.gmra.mxu2 %v1844_v29  ;;  %1892 = vmatmul.bf16.vlgmr.msra.gmra.mxu3 %v1844_v29 }
 0x446   :  { %2087 = vmatpush.bf16.msra.mxu0 %v5433_v31  ;;  %2100 = vmatpush.bf16.msra.mxu1 %v5438_v33  ;;  %v6831_v31 = vld [vmem:[#allocation28_spill] sm:$0xff] }
 0x447   :  { %2113 = vmatpush.bf16.msra.mxu2 %v5487_v54  ;;  %2126 = vmatpush.bf16.msra.mxu3 %v5451_v37  ;;  %v754_v33 = vadd.f32 %v6831_v31, %v6820_v26  ;;  %v6832_v37 = vld [vmem:[#allocation31_spill] sm:$0xff]  ;;  %v6834_v54 = vld [vmem:[#allocation29_spill] sm:$0xff] }
 0x44a   :  { %2088 = vmatpush.bf16.msra.mxu0 %v5462_v42  ;;  %2101 = vmatpush.bf16.msra.mxu1 %v5464_v43  ;;  %v841_v42 = vadd.f32 %v6832_v37, %v6822_v61  ;;  %v6833_v43 = vld [vmem:[#allocation43_spill] sm:$0xff] }
 0x44b   :  { %2114 = vmatpush.bf16.msra.mxu2 %v5537_v9  ;;  %2127 = vmatpush.bf16.msra.mxu3 %v5481_v50  ;;  %v6836_v9 = vld [vmem:[#allocation44_spill] sm:$0xff] }
 0x44c   :  { %v870_v50 = vadd.f32 %v6833_v43, %v841_v42 }
 0x44e   :  { %2089 = vmatpush.bf16.msra.mxu0 %v5499_v58  ;;  %2102 = vmatpush.bf16.msra.mxu1 %v5505_v60  ;;  %v783_v58 = vadd.f32 %v6834_v54, %v754_v33  ;;  %v6835_v60 = vld [vmem:[#allocation30_spill] sm:$0xff] }
 0x44f   :  { %2115 = vmatpush.bf16.msra.mxu2 %v5572_v23  ;;  %2128 = vmatpush.bf16.msra.mxu3 %v5523_v4 }
 0x450   :  { %v812_v4 = vadd.f32 %v6835_v60, %v783_v58 }
 0x452   :  { %2090 = vmatpush.bf16.msra.mxu0 %v5539_v10  ;;  %2103 = vmatpush.bf16.msra.mxu1 %v5548_v13  ;;  %v899_v10 = vadd.f32 %v6836_v9, %v870_v50 }
 0x453   :  { %2116 = vmatpush.bf16.msra.mxu2 %v5619_v57  ;;  %2129 = vmatpush.bf16.msra.mxu3 %v5566_v21 }
 0x456   :  { %2091 = vmatpush.bf16.msra.mxu0 %v5584_v25  ;;  %2104 = vmatpush.bf16.msra.mxu1 %v5590_v30 }
 0x457   :  { %2117 = vmatpush.bf16.msra.mxu2 %v5662_v46  ;;  %2130 = vmatpush.bf16.msra.mxu3 %v5608_v49 }
 0x45a   :  { %2092 = vmatpush.bf16.msra.mxu0 %v5621_v59  ;;  %2105 = vmatpush.bf16.msra.mxu1 %v5630_v3 }
 0x45b   :  { %2118 = vmatpush.bf16.msra.mxu2 %v5693_v48  ;;  %2131 = vmatpush.bf16.msra.mxu3 %v5656_v22 }
 0x45e   :  { %2093 = vmatpush.bf16.msra.mxu0 %v5674_v52  ;;  %2106 = vmatpush.bf16.msra.mxu1 %v5680_v35 }
 0x45f   :  { %2119 = vmatpush.bf16.msra.mxu2 %v5733_v20  ;;  %2132 = vmatpush.bf16.msra.mxu3 %v5711_v6 }
 0x462   :  { %2094 = vmatpush.bf16.msra.mxu0 %v5722_v16  ;;  %2107 = vmatpush.bf16.msra.mxu1 %v5724_v17 }
 0x463   :  { %2120 = vmatpush.bf16.msra.mxu2 %v5756_v56  ;;  %2133 = vmatpush.bf16.msra.mxu3 %v6811_v27 }
 0x4c1   :  { %v1854_v13 = vpop.f32.mrf.mxu0  ;;  %v1867_v21 = vpop.f32.mrf.mxu1 }
 0x4c2   :  { %v1897_v23 = vadd.f32 %v1854_v13, %v812_v4  ;;  %v1898_v25 = vadd.f32 %v1867_v21, %v899_v10  ;;  %v6837_v21 = vld [vmem:[#allocation32_spill] sm:$0xff] }
 0x4c4   :  { %v4359_v30 = vmul.f32 -1.442695, %v1897_v23  ;;  %v4360_v49 = vmul.f32 -1.442695, %v1898_v25  ;;  %v6838_v25 = vld [vmem:[#allocation45_spill] sm:$0xff] }
 0x4c6   :  { %4969 = vpow2.f32 %v4359_v30 }
 0x4c7   :  { %4971 = vpow2.f32 %v4360_v49 }
 0x4c8   :  { %v1880_v57 = vpop.f32.mrf.mxu2  ;;  %v1893_v59 = vpop.f32.mrf.mxu3 }
 0x4c9   :  { %v1900_v3 = vadd.f32 %v1893_v59, %v5945_v28  ;;  %v1856_v22 = vpop.f32.mrf.mxu0  ;;  %v1869_v46 = vpop.f32.mrf.mxu1  ;;  %v1899_v2 = vadd.f32 %v1880_v57, %v5938_v1 }
 0x4ca   :  { %v6839_v22 = vld [vmem:[#allocation52_spill] sm:$0xff] }
 0x4cb   :  { %v4361_v52 = vmul.f32 -1.442695, %v1900_v3 }
 0x4cc   :  { %v4970_v35 = vpop.eup %4969 }
 0x4cd   :  { %v4972_v48 = vpop.eup %4971  ;;  %v1904_v6 = vadd.f32 1.0, %v4970_v35  ;;  %4973 = vpow2.f32 %v4361_v52 }
 0x4ce   :  { %v1923_v16 = vadd.f32 1.0, %v4972_v48 }
 0x4cf   :  { %4975 = vrcp.f32 %v1904_v6  ;;  %v1916_v12 = vand.u32 2147483648, %v1904_v6  ;;  %v1914_v18 = vand.u32 2147483647, %v1904_v6  ;;  %vm1910_vm14 = vweird.f32 %v1904_v6 }
 0x4d0   :  { %4977 = vrcp.f32 %v1923_v16  ;;  %v1882_v17 = vpop.f32.mrf.mxu2  ;;  %v1895_v20 = vpop.f32.mrf.mxu3  ;;  %v1935_v7 = vand.u32 2147483648, %v1923_v16  ;;  %v1933_v44 = vand.u32 2147483647, %v1923_v16  ;;  %vm1929_vm15 = vweird.f32 %v1923_v16 }
 0x4d1   :  { %v1917_v1 = vor.u32 1.1754944e-38, %v1916_v12  ;;  %vm1915_vm2 = vcmp.eq.f32.partialorder %v1914_v18, 8.507059e+37 }
 0x4d2   :  { %v1936_v36 = vor.u32 1.1754944e-38, %v1935_v7  ;;  %vm1934_vm3 = vcmp.eq.f32.partialorder %v1933_v44, 8.507059e+37 }
 0x4d3   :  { %v4974_v56 = vpop.eup %4973 }
 0x4d4   :  { %v1943_v27 = vadd.f32 1.0, %v4974_v56 }
 0x4d5   :  { %v4976_v15 = vpop.eup %4975 }
 0x4d6   :  { %v4978_v34 = vpop.eup %4977  ;;  %v1906_v24 = vmul.f32 %v4976_v15, %v1904_v6  ;;  %4979 = vrcp.f32 %v1943_v27  ;;  %vm1911_vm12 = vweird.f32 %v4976_v15  ;;  %v1955_v43 = vand.u32 2147483648, %v1943_v27 }
 0x4d7   :  { %v1925_v28 = vmul.f32 %v4978_v34, %v1923_v16  ;;  %4981 = vtanh.f32 %v1899_v2  ;;  %vm1930_vm13 = vweird.f32 %v4978_v34  ;;  %vm1912_vm0 = vmor %vm1910_vm14, %vm1911_vm12  ;;  %vm1949_vm5 = vweird.f32 %v1943_v27 }
 0x4d8   :  { %v1907_v38 = vsub.f32 1.0, %v1906_v24  ;;  %vm1931_vm1 = vmor %vm1929_vm15, %vm1930_vm13  ;;  %v1953_v50 = vand.u32 2147483647, %v1943_v27  ;;  %v1956_v58 = vor.u32 1.1754944e-38, %v1955_v43  ;;  %v6840_v24 = vld [vmem:[#allocation50_spill] sm:$0xff] }
 0x4d9   :  { %v1926_v0 = vsub.f32 1.0, %v1925_v28 }
 0x4da   :  { %v1908_v51 = vmul.f32 %v4976_v15, %v1907_v38  ;;  %vm1954_vm7 = vcmp.eq.f32.partialorder %v1953_v50, 8.507059e+37 }
 0x4db   :  { %v1927_v41 = vmul.f32 %v4978_v34, %v1926_v0 }
 0x4dc   :  { %v4980_v14 = vpop.eup %4979  ;;  %v1909_v55 = vadd.f32 %v4976_v15, %v1908_v51 }
 0x4dd   :  { %v1928_v53 = vadd.f32 %v4978_v34, %v1927_v41  ;;  %v1945_v32 = vmul.f32 %v4980_v14, %v1943_v27  ;;  %v4982_v63 = vpop.eup %4981  ;;  %vm1950_vm4 = vweird.f32 %v4980_v14 }
 0x4de   :  { %v1913_v8 = vsel %vm1912_vm0, %v4976_v15, %v1909_v55  ;;  %vm1951_vm6 = vmor %vm1949_vm5, %vm1950_vm4 }
 0x4df   :  { %v1918_v45 = vsel %vm1915_vm2, %v1917_v1, %v1913_v8  ;;  %v1932_v19 = vsel %vm1931_vm1, %v4978_v34, %v1928_v53  ;;  %v1946_v5 = vsub.f32 1.0, %v1945_v32 }
 0x4e0   :  { %v1937_v47 = vsel %vm1934_vm3, %v1936_v36, %v1932_v19  ;;  %v1960_v29 = vmul.f32 %v4982_v63, %v1918_v45 }
 0x4e1   :  { %v1959_v31 = vmul.f32 %v1937_v47, %v6144_v11  ;;  %v1947_v33 = vmul.f32 %v4980_v14, %v1946_v5 }
 0x4e3   :  { %v6194_v37 = vadd.f32 %v1960_v29, %v1959_v31  ;;  %v1948_v42 = vadd.f32 %v4980_v14, %v1947_v33 }
 0x4e5   :  { %4983 = vtanh.f32 %v6194_v37  ;;  %v1952_v54 = vsel %vm1951_vm6, %v4980_v14, %v1948_v42 }
 0x4e6   :  { %v1957_v4 = vsel %vm1954_vm7, %v1956_v58, %v1952_v54 }
 0x4eb   :  { %v4984_v60 = vpop.eup %4983 }
 0x4ec   :  { %v6197_v9 = vmul.f32 %v4984_v60, %v1957_v4 }
 0x4ee   :  { %v1965_v11 = vpack.c.bf16 %v6197_v9, %v6197_v9 }
 0x4f0   :  { %1974 = vmatmul.bf16.vlgmr.msrb.gmra.mxu0 %v1965_v11  ;;  %1987 = vmatmul.bf16.vlgmr.msrb.gmra.mxu1 %v1965_v11 }
 0x4f1   :  { %2000 = vmatmul.bf16.vlgmr.msrb.gmra.mxu2 %v1965_v11  ;;  %2013 = vmatmul.bf16.vlgmr.msrb.gmra.mxu3 %v1965_v11 }
 0x56d   :  { %v1975_v10 = vpop.f32.mrf.mxu0  ;;  %v1988_v13 = vpop.f32.mrf.mxu1 }
 0x56e   :  { %v2018_v23 = vadd.f32 %v1975_v10, %v6837_v21  ;;  %v2019_v30 = vadd.f32 %v1988_v13, %v6838_v25  ;;  %v6841_v25 = vld [vmem:[#allocation33_spill] sm:$0xff] }
 0x570   :  { %v4362_v49 = vmul.f32 -1.442695, %v2018_v23  ;;  %v4363_v57 = vmul.f32 -1.442695, %v2019_v30  ;;  %v759_v30 = vadd.f32 %v6841_v25, %v6820_v26 }
 0x572   :  { %4985 = vpow2.f32 %v4362_v49  ;;  %v6842_v49 = vld [vmem:[#allocation36_spill] sm:$0xff] }
 0x573   :  { %4987 = vpow2.f32 %v4363_v57  ;;  %v846_v57 = vadd.f32 %v6842_v49, %v6822_v61 }
 0x574   :  { %v2001_v59 = vpop.f32.mrf.mxu2  ;;  %v2014_v3 = vpop.f32.mrf.mxu3 }
 0x575   :  { %v2021_v46 = vadd.f32 %v2014_v3, %v6839_v22  ;;  %v1977_v52 = vpop.f32.mrf.mxu0  ;;  %v1990_v35 = vpop.f32.mrf.mxu1  ;;  %v2020_v28 = vadd.f32 %v2001_v59, %v6840_v24  ;;  %v6843_v59 = vld [vmem:[#allocation46_spill] sm:$0xff] }
 0x576   :  { %v875_v3 = vadd.f32 %v6843_v59, %v846_v57  ;;  %v6844_v22 = vld [vmem:[#allocation34_spill] sm:$0xff]  ;;  %v6845_v52 = vld [vmem:[#allocation35_spill] sm:$0xff] }
 0x577   :  { %v4364_v48 = vmul.f32 -1.442695, %v2021_v46  ;;  %v788_v46 = vadd.f32 %v6844_v22, %v759_v30 }
 0x578   :  { %v4986_v6 = vpop.eup %4985 }
 0x579   :  { %v4988_v16 = vpop.eup %4987  ;;  %v2025_v17 = vadd.f32 1.0, %v4986_v6  ;;  %4989 = vpow2.f32 %v4364_v48  ;;  %v817_v35 = vadd.f32 %v6845_v52, %v788_v46  ;;  %v6846_v48 = vld [vmem:[#allocation47_spill] sm:$0xff] }
 0x57a   :  { %v2044_v20 = vadd.f32 1.0, %v4988_v16  ;;  %v904_v6 = vadd.f32 %v6846_v48, %v875_v3 }
 0x57b   :  { %4991 = vrcp.f32 %v2025_v17  ;;  %v2037_v18 = vand.u32 2147483648, %v2025_v17  ;;  %v2035_v14 = vand.u32 2147483647, %v2025_v17  ;;  %vm2031_vm10 = vweird.f32 %v2025_v17 }
 0x57c   :  { %4993 = vrcp.f32 %v2044_v20  ;;  %v2003_v56 = vpop.f32.mrf.mxu2  ;;  %v2016_v27 = vpop.f32.mrf.mxu3  ;;  %v2056_v41 = vand.u32 2147483648, %v2044_v20  ;;  %v2054_v1 = vand.u32 2147483647, %v2044_v20  ;;  %vm2050_vm11 = vweird.f32 %v2044_v20 }
 0x57d   :  { %v2038_v36 = vor.u32 1.1754944e-38, %v2037_v18  ;;  %vm2036_vm14 = vcmp.eq.f32.partialorder %v2035_v14, 8.507059e+37 }
 0x57e   :  { %v2057_v45 = vor.u32 1.1754944e-38, %v2056_v41  ;;  %vm2055_vm15 = vcmp.eq.f32.partialorder %v2054_v1, 8.507059e+37  ;;  %v6848_v1 = vld [vmem:[#allocation51_spill] sm:$0xff] }
 0x57f   :  { %v4990_v15 = vpop.eup %4989 }
 0x580   :  { %v2064_v2 = vadd.f32 1.0, %v4990_v15 }
 0x581   :  { %v4992_v34 = vpop.eup %4991 }
 0x582   :  { %v4994_v38 = vpop.eup %4993  ;;  %v2027_v0 = vmul.f32 %v4992_v34, %v2025_v17  ;;  %4995 = vrcp.f32 %v2064_v2  ;;  %vm2032_vm8 = vweird.f32 %v4992_v34  ;;  %v2076_v60 = vand.u32 2147483648, %v2064_v2 }
 0x583   :  { %v2046_v12 = vmul.f32 %v4994_v38, %v2044_v20  ;;  %4997 = vtanh.f32 %v2020_v28  ;;  %vm2051_vm9 = vweird.f32 %v4994_v38  ;;  %vm2033_vm12 = vmor %vm2031_vm10, %vm2032_vm8  ;;  %vm2070_vm1 = vweird.f32 %v2064_v2 }
 0x584   :  { %v2028_v7 = vsub.f32 1.0, %v2027_v0  ;;  %vm2052_vm13 = vmor %vm2050_vm11, %vm2051_vm9  ;;  %v2074_v4 = vand.u32 2147483647, %v2064_v2  ;;  %v2077_v10 = vor.u32 1.1754944e-38, %v2076_v60 }
 0x585   :  { %v2047_v51 = vsub.f32 1.0, %v2046_v12 }
 0x586   :  { %v2029_v44 = vmul.f32 %v4992_v34, %v2028_v7  ;;  %vm2075_vm3 = vcmp.eq.f32.partialorder %v2074_v4, 8.507059e+37 }
 0x587   :  { %v2048_v55 = vmul.f32 %v4994_v38, %v2047_v51 }
 0x588   :  { %v4996_v53 = vpop.eup %4995  ;;  %v2030_v32 = vadd.f32 %v4992_v34, %v2029_v44 }
 0x589   :  { %v2049_v8 = vadd.f32 %v4994_v38, %v2048_v55  ;;  %v2066_v63 = vmul.f32 %v4996_v53, %v2064_v2  ;;  %v4998_v5 = vpop.eup %4997  ;;  %vm2071_vm0 = vweird.f32 %v4996_v53 }
 0x58a   :  { %v2034_v19 = vsel %vm2033_vm12, %v4992_v34, %v2030_v32  ;;  %vm2072_vm2 = vmor %vm2070_vm1, %vm2071_vm0  ;;  %v6847_v34 = vld [vmem:[#allocation53_spill] sm:$0xff] }
 0x58b   :  { %v2039_v47 = vsel %vm2036_vm14, %v2038_v36, %v2034_v19  ;;  %v2053_v29 = vsel %vm2052_vm13, %v4994_v38, %v2049_v8  ;;  %v2067_v31 = vsub.f32 1.0, %v2066_v63 }
 0x58c   :  { %v2058_v33 = vsel %vm2055_vm15, %v2057_v45, %v2053_v29  ;;  %v2081_v42 = vmul.f32 %v4998_v5, %v2039_v47 }
 0x58d   :  { %v2080_v43 = vmul.f32 %v2058_v33, %v6194_v37  ;;  %v2068_v50 = vmul.f32 %v4996_v53, %v2067_v31 }
 0x58f   :  { %v6206_v54 = vadd.f32 %v2081_v42, %v2080_v43  ;;  %v2069_v58 = vadd.f32 %v4996_v53, %v2068_v50 }
 0x591   :  { %4999 = vtanh.f32 %v6206_v54  ;;  %v2073_v11 = vsel %vm2072_vm2, %v4996_v53, %v2069_v58 }
 0x592   :  { %v2078_v21 = vsel %vm2075_vm3, %v2077_v10, %v2073_v11 }
 0x597   :  { %v5000_v13 = vpop.eup %4999 }
 0x598   :  { %v6209_v23 = vmul.f32 %v5000_v13, %v2078_v21 }
 0x59a   :  { %v2086_v37 = vpack.c.bf16 %v6209_v23, %v6209_v23 }
 0x59c   :  { %2095 = vmatmul.bf16.vlgmr.msra.gmra.mxu0 %v2086_v37  ;;  %2108 = vmatmul.bf16.vlgmr.msra.gmra.mxu1 %v2086_v37 }
 0x59d   :  { %2121 = vmatmul.bf16.vlgmr.msra.gmra.mxu2 %v2086_v37  ;;  %2134 = vmatmul.bf16.vlgmr.msra.gmra.mxu3 %v2086_v37 }
 0x619   :  { %v2096_v16 = vpop.f32.mrf.mxu0  ;;  %v2109_v17 = vpop.f32.mrf.mxu1 }
 0x61a   :  { %v2139_v20 = vadd.f32 %v2096_v16, %v817_v35  ;;  %v2140_v56 = vadd.f32 %v2109_v17, %v904_v6 }
 0x61c   :  { %v4365_v27 = vmul.f32 -1.442695, %v2139_v20  ;;  %v4366_v15 = vmul.f32 -1.442695, %v2140_v56 }
 0x61e   :  { %5001 = vpow2.f32 %v4365_v27 }
 0x61f   :  { %5003 = vpow2.f32 %v4366_v15 }
 0x620   :  { %v2122_v26 = vpop.f32.mrf.mxu2  ;;  %v2135_v2 = vpop.f32.mrf.mxu3 }
 0x621   :  { %v2142_v61 = vadd.f32 %v2135_v2, %v6847_v34  ;;  %v2098_v24 = vpop.f32.mrf.mxu0  ;;  %v2111_v28 = vpop.f32.mrf.mxu1  ;;  %v2141_v53 = vadd.f32 %v2122_v26, %v6848_v1 }
 0x623   :  { %v4367_v38 = vmul.f32 -1.442695, %v2142_v61 }
 0x624   :  { %v5002_v0 = vpop.eup %5001 }
 0x625   :  { %v5004_v12 = vpop.eup %5003  ;;  %v2146_v7 = vadd.f32 1.0, %v5002_v0  ;;  %5005 = vpow2.f32 %v4367_v38 }
 0x626   :  { %v2165_v51 = vadd.f32 1.0, %v5004_v12 }
 0x627   :  { %5007 = vrcp.f32 %v2146_v7  ;;  %v2158_v19 = vand.u32 2147483648, %v2146_v7  ;;  %v2156_v29 = vand.u32 2147483647, %v2146_v7  ;;  %vm2152_vm6 = vweird.f32 %v2146_v7 }
 0x628   :  { %5009 = vrcp.f32 %v2165_v51  ;;  %v2124_v18 = vpop.f32.mrf.mxu2  ;;  %v2137_v41 = vpop.f32.mrf.mxu3  ;;  %v2177_v5 = vand.u32 2147483648, %v2165_v51  ;;  %v2175_v33 = vand.u32 2147483647, %v2165_v51  ;;  %vm2171_vm7 = vweird.f32 %v2165_v51 }
 0x629   :  { %v2159_v50 = vor.u32 1.1754944e-38, %v2158_v19  ;;  %vm2157_vm10 = vcmp.eq.f32.partialorder %v2156_v29, 8.507059e+37 }
 0x62a   :  { %v2178_v4 = vor.u32 1.1754944e-38, %v2177_v5  ;;  %vm2176_vm11 = vcmp.eq.f32.partialorder %v2175_v33, 8.507059e+37 }
 0x62b   :  { %v5006_v44 = vpop.eup %5005 }
 0x62c   :  { %v2185_v14 = vadd.f32 1.0, %v5006_v44 }
 0x62d   :  { %v5008_v55 = vpop.eup %5007 }
 0x62e   :  { %v5010_v32 = vpop.eup %5009  ;;  %v2148_v36 = vmul.f32 %v5008_v55, %v2146_v7  ;;  %5011 = vrcp.f32 %v2185_v14  ;;  %vm2153_vm4 = vweird.f32 %v5008_v55  ;;  %v2197_v22 = vand.u32 2147483648, %v2185_v14 }
 0x62f   :  { %v2167_v8 = vmul.f32 %v5010_v32, %v2165_v51  ;;  %5013 = vtanh.f32 %v2141_v53  ;;  %vm2172_vm5 = vweird.f32 %v5010_v32  ;;  %vm2154_vm8 = vmor %vm2152_vm6, %vm2153_vm4  ;;  %vm2191_vm13 = vweird.f32 %v2185_v14 }
 0x630   :  { %v2149_v63 = vsub.f32 1.0, %v2148_v36  ;;  %vm2173_vm9 = vmor %vm2171_vm7, %vm2172_vm5  ;;  %v2195_v46 = vand.u32 2147483647, %v2185_v14  ;;  %v2198_v35 = vor.u32 1.1754944e-38, %v2197_v22 }
 0x631   :  { %v2168_v45 = vsub.f32 1.0, %v2167_v8 }
 0x632   :  { %v2150_v47 = vmul.f32 %v5008_v55, %v2149_v63  ;;  %vm2196_vm15 = vcmp.eq.f32.partialorder %v2195_v46, 8.507059e+37 }
 0x633   :  { %v2169_v31 = vmul.f32 %v5010_v32, %v2168_v45 }
 0x634   :  { %v5012_v42 = vpop.eup %5011  ;;  %v2151_v43 = vadd.f32 %v5008_v55, %v2150_v47 }
 0x635   :  { %v2170_v58 = vadd.f32 %v5010_v32, %v2169_v31  ;;  %v2187_v60 = vmul.f32 %v5012_v42, %v2185_v14  ;;  %v5014_v10 = vpop.eup %5013  ;;  %vm2192_vm12 = vweird.f32 %v5012_v42 }
 0x636   :  { %v2155_v11 = vsel %vm2154_vm8, %v5008_v55, %v2151_v43  ;;  %vm2193_vm14 = vmor %vm2191_vm13, %vm2192_vm12 }
 0x637   :  { %v2160_v13 = vsel %vm2157_vm10, %v2159_v50, %v2155_v11  ;;  %v2174_v21 = vsel %vm2173_vm9, %v5010_v32, %v2170_v58  ;;  %v2188_v37 = vsub.f32 1.0, %v2187_v60 }
 0x638   :  { %v2179_v25 = vsel %vm2176_vm11, %v2178_v4, %v2174_v21  ;;  %v2202_v30 = vmul.f32 %v5014_v10, %v2160_v13 }
 0x639   :  { %v2201_v49 = vmul.f32 %v2179_v25, %v6206_v54  ;;  %v2189_v57 = vmul.f32 %v5012_v42, %v2188_v37 }
 0x63b   :  { %v2203_v59 = vadd.f32 %v2202_v30, %v2201_v49  ;;  %v2190_v3 = vadd.f32 %v5012_v42, %v2189_v57 }
 0x63d   :  { %5015 = vtanh.f32 %v2203_v59  ;;  %v2194_v52 = vsel %vm2193_vm14, %v5012_v42, %v2190_v3 }
 0x63e   :  { %v2199_v6 = vsel %vm2196_vm15, %v2198_v35, %v2194_v52 }
 0x643   :  { %v5016_v48 = vpop.eup %5015 }
 0x644   :  { %v6230_v16 = vmul.f32 %v5016_v48, %v2199_v6 }
 0x645   :  { %5226 = dma.done.wait [#allocation5], 4096 }
 0x646   :  { %5227 = vsyncadd [#allocation5], 4294963200 }
 0x647   :  { %5228 = dma.done.wait [#allocation5 + $0x1], 4096 }
 0x648   :  { %5229 = vsyncadd [#allocation5 + $0x1], 4294963200  ;;  %v4482_v54 = vld [vmem:[#allocation3 + $0xe0] sm:$0xf]  ;;  %v4840_v17 = vld [vmem:[#allocation3 + $0xec] sm:$0xf0] }
 0x649   :  { %v4838_v20 = vld [vmem:[#allocation3 + $0xe4] sm:$0xf]  ;;  %v4483_v56 = vor.u32 %v4840_v17, %v4482_v54  ;;  %v4484_v27 = vld [vmem:[#allocation3 + $0xf0] sm:$0xf0]  ;;  %v4490_v15 = vld [vmem:[#allocation3 + $0xe8] sm:$0xf] }
 0x64a   :  { %v4841_v26 = vld [vmem:[#allocation3 + $0xf4] sm:$0xf0]  ;;  %v4487_v2 = vor.u32 %v4838_v20, %v4484_v27  ;;  %v4839_v61 = vld [vmem:[#allocation3 + $0xec] sm:$0xf]  ;;  %v4492_v24 = vld [vmem:[#allocation3 + $0xf8] sm:$0xf0] }
 0x64b   :  { %v4491_v34 = vor.u32 %v4841_v26, %v4490_v15  ;;  %v4466_v28 = vld [vmem:[#allocation3 + $0xc0] sm:$0xf]  ;;  %2459 = vmatpush.bf16.msrb.mxu0 %v4483_v56  ;;  %v4495_v38 = vor.u32 %v4839_v61, %v4492_v24  ;;  %v4836_v0 = vld [vmem:[#allocation3 + $0xcc] sm:$0xf0]  ;;  %v4834_v12 = vld [vmem:[#allocation3 + $0xc4] sm:$0xf] }
 0x64c   :  { %v4468_v7 = vld [vmem:[#allocation3 + $0xd0] sm:$0xf0]  ;;  %2488 = vmatpush.bf16.msrb.mxu1 %v4487_v2  ;;  %v4467_v51 = vor.u32 %v4836_v0, %v4466_v28  ;;  %v4474_v41 = vld [vmem:[#allocation3 + $0xc8] sm:$0xf]  ;;  %v4837_v44 = vld [vmem:[#allocation3 + $0xd4] sm:$0xf0] }
 0x64d   :  { %2517 = vmatpush.bf16.msrb.mxu2 %v4491_v34  ;;  %v4471_v18 = vor.u32 %v4834_v12, %v4468_v7  ;;  %v4835_v14 = vld [vmem:[#allocation3 + $0xcc] sm:$0xf]  ;;  %2546 = vmatpush.bf16.msrb.mxu3 %v4495_v38  ;;  %v4475_v55 = vor.u32 %v4837_v44, %v4474_v41  ;;  %v4476_v1 = vld [vmem:[#allocation3 + $0xd8] sm:$0xf0]  ;;  %v4450_v53 = vld [vmem:[#allocation3 + $0xa0] sm:$0xf] }
 0x64e   :  { %v4832_v32 = vld [vmem:[#allocation3 + $0xac] sm:$0xf0]  ;;  %v4479_v36 = vor.u32 %v4835_v14, %v4476_v1  ;;  %v4830_v8 = vld [vmem:[#allocation3 + $0xa4] sm:$0xf]  ;;  %v4452_v63 = vld [vmem:[#allocation3 + $0xb0] sm:$0xf0] }
 0x64f   :  { %v4458_v45 = vld [vmem:[#allocation3 + $0xa8] sm:$0xf]  ;;  %2460 = vmatpush.bf16.msrb.mxu0 %v4467_v51  ;;  %v4451_v19 = vor.u32 %v4832_v32, %v4450_v53  ;;  %v4833_v5 = vld [vmem:[#allocation3 + $0xb4] sm:$0xf0]  ;;  %v4831_v47 = vld [vmem:[#allocation3 + $0xac] sm:$0xf]  ;;  %v4455_v31 = vor.u32 %v4830_v8, %v4452_v63 }
 0x650   :  { %v4460_v29 = vld [vmem:[#allocation3 + $0xb8] sm:$0xf0]  ;;  %2489 = vmatpush.bf16.msrb.mxu1 %v4471_v18  ;;  %v4459_v33 = vor.u32 %v4833_v5, %v4458_v45  ;;  %v4434_v42 = vld [vmem:[#allocation3 + $0x80] sm:$0xf]  ;;  %v4828_v43 = vld [vmem:[#allocation3 + $0x8c] sm:$0xf0] }
 0x651   :  { %2518 = vmatpush.bf16.msrb.mxu2 %v4475_v55  ;;  %v4826_v50 = vld [vmem:[#allocation3 + $0x84] sm:$0xf]  ;;  %2547 = vmatpush.bf16.msrb.mxu3 %v4479_v36  ;;  %v4463_v58 = vor.u32 %v4831_v47, %v4460_v29  ;;  %v4436_v60 = vld [vmem:[#allocation3 + $0x90] sm:$0xf0]  ;;  %v4442_v4 = vld [vmem:[#allocation3 + $0x88] sm:$0xf]  ;;  %v4435_v21 = vor.u32 %v4828_v43, %v4434_v42 }
 0x652   :  { %v4829_v11 = vld [vmem:[#allocation3 + $0x94] sm:$0xf0]  ;;  %v4827_v10 = vld [vmem:[#allocation3 + $0x8c] sm:$0xf]  ;;  %v4444_v13 = vld [vmem:[#allocation3 + $0x98] sm:$0xf0]  ;;  %v4439_v37 = vor.u32 %v4826_v50, %v4436_v60 }
 0x653   :  { %2461 = vmatpush.bf16.msrb.mxu0 %v4451_v19  ;;  %v4443_v25 = vor.u32 %v4829_v11, %v4442_v4  ;;  %v4418_v30 = vld [vmem:[#allocation3 + $0x60] sm:$0xf]  ;;  %v4824_v49 = vld [vmem:[#allocation3 + $0x6c] sm:$0xf0]  ;;  %v4822_v57 = vld [vmem:[#allocation3 + $0x64] sm:$0xf]  ;;  %v4447_v59 = vor.u32 %v4827_v10, %v4444_v13 }
 0x654   :  { %2490 = vmatpush.bf16.msrb.mxu1 %v4455_v31  ;;  %v4420_v3 = vld [vmem:[#allocation3 + $0x70] sm:$0xf0]  ;;  %v4426_v22 = vld [vmem:[#allocation3 + $0x68] sm:$0xf]  ;;  %v4825_v46 = vld [vmem:[#allocation3 + $0x74] sm:$0xf0]  ;;  %v4419_v48 = vor.u32 %v4824_v49, %v4418_v30 }
 0x655   :  { %2519 = vmatpush.bf16.msrb.mxu2 %v4459_v33  ;;  %2548 = vmatpush.bf16.msrb.mxu3 %v4463_v58  ;;  %v4823_v52 = vld [vmem:[#allocation3 + $0x6c] sm:$0xf]  ;;  %v4428_v35 = vld [vmem:[#allocation3 + $0x78] sm:$0xf0]  ;;  %v4423_v6 = vor.u32 %v4822_v57, %v4420_v3  ;;  %v4427_v54 = vor.u32 %v4825_v46, %v4426_v22  ;;  %v4402_v17 = vld [vmem:[#allocation3 + $0x40] sm:$0xf] }
 0x656   :  { %v4820_v20 = vld [vmem:[#allocation3 + $0x4c] sm:$0xf0]  ;;  %v4818_v56 = vld [vmem:[#allocation3 + $0x44] sm:$0xf]  ;;  %v4431_v27 = vor.u32 %v4823_v52, %v4428_v35  ;;  %v4404_v15 = vld [vmem:[#allocation3 + $0x50] sm:$0xf0] }
 0x657   :  { %2462 = vmatpush.bf16.msrb.mxu0 %v4435_v21  ;;  %v4410_v26 = vld [vmem:[#allocation3 + $0x48] sm:$0xf]  ;;  %v4821_v2 = vld [vmem:[#allocation3 + $0x54] sm:$0xf0]  ;;  %v4819_v34 = vld [vmem:[#allocation3 + $0x4c] sm:$0xf]  ;;  %v4403_v24 = vor.u32 %v4820_v20, %v4402_v17  ;;  %v4407_v28 = vor.u32 %v4818_v56, %v4404_v15 }
 0x658   :  { %2491 = vmatpush.bf16.msrb.mxu1 %v4439_v37  ;;  %v4412_v61 = vld [vmem:[#allocation3 + $0x58] sm:$0xf0]  ;;  %v4411_v38 = vor.u32 %v4821_v2, %v4410_v26  ;;  %v4386_v0 = vld [vmem:[#allocation3 + $0x20] sm:$0xf]  ;;  %v4816_v12 = vld [vmem:[#allocation3 + $0x2c] sm:$0xf0] }
 0x659   :  { %2520 = vmatpush.bf16.msrb.mxu2 %v4443_v25  ;;  %2549 = vmatpush.bf16.msrb.mxu3 %v4447_v59  ;;  %v4814_v7 = vld [vmem:[#allocation3 + $0x24] sm:$0xf]  ;;  %v4415_v51 = vor.u32 %v4819_v34, %v4412_v61  ;;  %v4388_v18 = vld [vmem:[#allocation3 + $0x30] sm:$0xf0]  ;;  %v4394_v41 = vld [vmem:[#allocation3 + $0x28] sm:$0xf]  ;;  %v4387_v1 = vor.u32 %v4816_v12, %v4386_v0 }
 0x65a   :  { %v4817_v44 = vld [vmem:[#allocation3 + $0x34] sm:$0xf0]  ;;  %v4815_v14 = vld [vmem:[#allocation3 + $0x2c] sm:$0xf]  ;;  %v4396_v55 = vld [vmem:[#allocation3 + $0x38] sm:$0xf0]  ;;  %v4391_v32 = vor.u32 %v4814_v7, %v4388_v18 }
 0x65b   :  { %2463 = vmatpush.bf16.msrb.mxu0 %v4419_v48  ;;  %v4370_v53 = vld [vmem:[#allocation3] sm:$0xf]  ;;  %v4395_v36 = vor.u32 %v4817_v44, %v4394_v41  ;;  %v4812_v8 = vld [vmem:[#allocation3 + $0xc] sm:$0xf0]  ;;  %v4810_v63 = vld [vmem:[#allocation3 + $0x4] sm:$0xf]  ;;  %v4399_v19 = vor.u32 %v4815_v14, %v4396_v55 }
 0x65c   :  { %2492 = vmatpush.bf16.msrb.mxu1 %v4423_v6  ;;  %v4372_v45 = vld [vmem:[#allocation3 + $0x10] sm:$0xf0]  ;;  %v4378_v5 = vld [vmem:[#allocation3 + $0x8] sm:$0xf]  ;;  %v4813_v47 = vld [vmem:[#allocation3 + $0x14] sm:$0xf0]  ;;  %v4371_v43 = vor.u32 %v4812_v8, %v4370_v53 }
 0x65d   :  { %2521 = vmatpush.bf16.msrb.mxu2 %v4427_v54  ;;  %2550 = vmatpush.bf16.msrb.mxu3 %v4431_v27  ;;  %v4811_v29 = vld [vmem:[#allocation3 + $0xc] sm:$0xf]  ;;  %v4380_v31 = vld [vmem:[#allocation3 + $0x18] sm:$0xf0]  ;;  %v4610_v33 = vld [vmem:[#allocation4 + $0xe0] sm:$0xf]  ;;  %v4375_v60 = vor.u32 %v4810_v63, %v4372_v45  ;;  %v4379_v4 = vor.u32 %v4813_v47, %v4378_v5 }
 0x65e   :  { %v4872_v42 = vld [vmem:[#allocation4 + $0xec] sm:$0xf0]  ;;  %v4870_v50 = vld [vmem:[#allocation4 + $0xe4] sm:$0xf]  ;;  %v4612_v58 = vld [vmem:[#allocation4 + $0xf0] sm:$0xf0]  ;;  %v4383_v10 = vor.u32 %v4811_v29, %v4380_v31 }
 0x65f   :  { %2464 = vmatpush.bf16.msrb.mxu0 %v4403_v24  ;;  %v4871_v11 = vld [vmem:[#allocation4 + $0xec] sm:$0xf]  ;;  %v6232_v13 = vor.u32 %v4872_v42, %v4610_v33  ;;  %v4620_v21 = vld [vmem:[#allocation4 + $0xf8] sm:$0xf0]  ;;  %v4618_v37 = vld [vmem:[#allocation4 + $0xe8] sm:$0xf]  ;;  %v6236_v57 = vor.u32 %v4870_v50, %v4612_v58 }
 0x660   :  { %2493 = vmatpush.bf16.msrb.mxu1 %v4407_v28  ;;  %v4873_v25 = vld [vmem:[#allocation4 + $0xf4] sm:$0xf0]  ;;  %v6849_v30 = vld [vmem:[#allocation54_spill] sm:$0xff]  ;;  %v4594_v59 = vld [vmem:[#allocation4 + $0xc0] sm:$0xf]  ;;  %v6241_v35 = vor.u32 %v4871_v11, %v4620_v21 }
 0x661   :  { %2522 = vmatpush.bf16.msrb.mxu2 %v4411_v38  ;;  %2551 = vmatpush.bf16.msrb.mxu3 %v4415_v51  ;;  %v2221_v49 = vpack.c.bf16 %v6009_v39, %v6849_v30  ;;  %v4868_v3 = vld [vmem:[#allocation4 + $0xcc] sm:$0xf0]  ;;  %v4866_v22 = vld [vmem:[#allocation4 + $0xc4] sm:$0xf]  ;;  %v4596_v46 = vld [vmem:[#allocation4 + $0xd0] sm:$0xf0]  ;;  %v6238_v52 = vor.u32 %v4873_v25, %v4618_v37 }
 0x662   :  { %v6243_v48 = vor.u32 %v4868_v3, %v4594_v59  ;;  %v4867_v6 = vld [vmem:[#allocation4 + $0xcc] sm:$0xf]  ;;  %v4602_v39 = vld [vmem:[#allocation4 + $0xc8] sm:$0xf]  ;;  %v4869_v54 = vld [vmem:[#allocation4 + $0xd4] sm:$0xf0]  ;;  %v6246_v17 = vor.u32 %v4866_v22, %v4596_v46 }
 0x663   :  { %2465 = vmatpush.bf16.msrb.mxu0 %v4387_v1  ;;  %v4604_v20 = vld [vmem:[#allocation4 + $0xd8] sm:$0xf0]  ;;  %v4578_v56 = vld [vmem:[#allocation4 + $0xa0] sm:$0xf]  ;;  %v4864_v27 = vld [vmem:[#allocation4 + $0xac] sm:$0xf0]  ;;  %v6249_v2 = vor.u32 %v4869_v54, %v4602_v39 }
 0x664   :  { %2494 = vmatpush.bf16.msrb.mxu1 %v4391_v32  ;;  %v4862_v15 = vld [vmem:[#allocation4 + $0xa4] sm:$0xf]  ;;  %v4580_v26 = vld [vmem:[#allocation4 + $0xb0] sm:$0xf0]  ;;  %v6253_v34 = vor.u32 %v4867_v6, %v4604_v20  ;;  %v6255_v61 = vor.u32 %v4864_v27, %v4578_v56  ;;  %v4863_v24 = vld [vmem:[#allocation4 + $0xac] sm:$0xf] }
 0x665   :  { %2523 = vmatpush.bf16.msrb.mxu2 %v4395_v36  ;;  %2552 = vmatpush.bf16.msrb.mxu3 %v4399_v19  ;;  %v4586_v28 = vld [vmem:[#allocation4 + $0xa8] sm:$0xf]  ;;  %v4865_v38 = vld [vmem:[#allocation4 + $0xb4] sm:$0xf0]  ;;  %v6258_v0 = vor.u32 %v4862_v15, %v4580_v26  ;;  %v4588_v12 = vld [vmem:[#allocation4 + $0xb8] sm:$0xf0] }
 0x666   :  { %v4562_v7 = vld [vmem:[#allocation4 + $0x80] sm:$0xf]  ;;  %v4860_v51 = vld [vmem:[#allocation4 + $0x8c] sm:$0xf0]  ;;  %v4858_v18 = vld [vmem:[#allocation4 + $0x84] sm:$0xf]  ;;  %v6261_v44 = vor.u32 %v4865_v38, %v4586_v28  ;;  %v6265_v14 = vor.u32 %v4863_v24, %v4588_v12 }
 0x667   :  { %2466 = vmatpush.bf16.msrb.mxu0 %v4371_v43  ;;  %v4564_v41 = vld [vmem:[#allocation4 + $0x90] sm:$0xf0]  ;;  %v6267_v55 = vor.u32 %v4860_v51, %v4562_v7  ;;  %v4859_v1 = vld [vmem:[#allocation4 + $0x8c] sm:$0xf]  ;;  %v4570_v53 = vld [vmem:[#allocation4 + $0x88] sm:$0xf] }
 0x668   :  { %2495 = vmatpush.bf16.msrb.mxu1 %v4375_v60  ;;  %v4861_v32 = vld [vmem:[#allocation4 + $0x94] sm:$0xf0]  ;;  %v6270_v36 = vor.u32 %v4858_v18, %v4564_v41  ;;  %v4572_v8 = vld [vmem:[#allocation4 + $0x98] sm:$0xf0]  ;;  %v4546_v63 = vld [vmem:[#allocation4 + $0x60] sm:$0xf] }
 0x669   :  { %2524 = vmatpush.bf16.msrb.mxu2 %v4379_v4  ;;  %2553 = vmatpush.bf16.msrb.mxu3 %v4383_v10  ;;  %v4856_v45 = vld [vmem:[#allocation4 + $0x6c] sm:$0xf0]  ;;  %v4854_v19 = vld [vmem:[#allocation4 + $0x64] sm:$0xf]  ;;  %v4548_v5 = vld [vmem:[#allocation4 + $0x70] sm:$0xf0]  ;;  %v6273_v47 = vor.u32 %v4861_v32, %v4570_v53  ;;  %v6277_v29 = vor.u32 %v4859_v1, %v4572_v8 }
 0x66a   :  { %2467 = vmatmul.bf16.vlgmr.msrb.gmra.mxu0 %v2221_v49  ;;  %v6279_v31 = vor.u32 %v4856_v45, %v4546_v63  ;;  %v4855_v33 = vld [vmem:[#allocation4 + $0x6c] sm:$0xf]  ;;  %v4554_v42 = vld [vmem:[#allocation4 + $0x68] sm:$0xf]  ;;  %v4857_v43 = vld [vmem:[#allocation4 + $0x74] sm:$0xf0]  ;;  %v6284_v60 = vor.u32 %v4854_v19, %v4548_v5 }
 0x66b   :  { %2735 = vmatpush.bf16.msra.mxu0 %v6232_v13  ;;  %2496 = vmatmul.bf16.vlgmr.msrb.gmra.mxu1 %v2221_v49  ;;  %v6850_v50 = vld [vmem:[#allocation26_spill] sm:$0xff]  ;;  %v4556_v4 = vld [vmem:[#allocation4 + $0x78] sm:$0xf0]  ;;  %v4530_v11 = vld [vmem:[#allocation4 + $0x40] sm:$0xf]  ;;  %v6287_v25 = vor.u32 %v4857_v43, %v4554_v42  ;;  %v2223_v43 = vpack.c.bf16 %v6197_v9, %v6147_v40  ;;  %v2224_v40 = vpack.c.bf16 %v6230_v16, %v6209_v23  ;;  %v6851_v9 = vmov 0  }
 0x66c   :  { %2748 = vmatpush.bf16.msra.mxu1 %v6236_v57  ;;  %2525 = vmatmul.bf16.vlgmr.msrb.gmra.mxu2 %v2221_v49  ;;  %v2222_v58 = vpack.c.bf16 %v6103_v62, %v6850_v50  ;;  %v4852_v10 = vld [vmem:[#allocation4 + $0x4c] sm:$0xf0]  ;;  %v4850_v21 = vld [vmem:[#allocation4 + $0x44] sm:$0xf]  ;;  %v4532_v37 = vld [vmem:[#allocation4 + $0x50] sm:$0xf0]  ;;  %v6291_v30 = vor.u32 %v4855_v33, %v4556_v4 }
 0x66d   :  { %2554 = vmatmul.bf16.vlgmr.msrb.gmra.mxu3 %v2221_v49  ;;  %2761 = vmatpush.bf16.msra.mxu2 %v6238_v52  ;;  %v6293_v62 = vor.u32 %v4852_v10, %v4530_v11  ;;  %v6296_v49 = vor.u32 %v4850_v21, %v4532_v37  ;;  %v4851_v59 = vld [vmem:[#allocation4 + $0x4c] sm:$0xf]  ;;  %v4540_v3 = vld [vmem:[#allocation4 + $0x58] sm:$0xf0]  ;;  %v4514_v22 = vld [vmem:[#allocation4 + $0x20] sm:$0xf] }
 0x66e   :  { %2774 = vmatpush.bf16.msra.mxu3 %v6241_v35  ;;  %v4848_v46 = vld [vmem:[#allocation4 + $0x2c] sm:$0xf0]  ;;  %v4846_v6 = vld [vmem:[#allocation4 + $0x24] sm:$0xf]  ;;  %v6301_v39 = vor.u32 %v4851_v59, %v4540_v3  ;;  %v4516_v20 = vld [vmem:[#allocation4 + $0x30] sm:$0xf0] }
 0x66f   :  { %2736 = vmatpush.bf16.msra.mxu0 %v6243_v48  ;;  %v6303_v54 = vor.u32 %v4848_v46, %v4514_v22  ;;  %v4538_v56 = vld [vmem:[#allocation4 + $0x48] sm:$0xf]  ;;  %v4853_v27 = vld [vmem:[#allocation4 + $0x54] sm:$0xf0]  ;;  %v6306_v15 = vor.u32 %v4846_v6, %v4516_v20  ;;  %v4847_v24 = vld [vmem:[#allocation4 + $0x2c] sm:$0xf] }
 0x670   :  { %2749 = vmatpush.bf16.msra.mxu1 %v6246_v17  ;;  %v6308_v26 = vor.u32 %v4853_v27, %v4538_v56  ;;  %v4524_v28 = vld [vmem:[#allocation4 + $0x38] sm:$0xf0]  ;;  %v4498_v38 = vld [vmem:[#allocation4] sm:$0xf]  ;;  %v4844_v12 = vld [vmem:[#allocation4 + $0xc] sm:$0xf0] }
 0x671   :  { %2762 = vmatpush.bf16.msra.mxu2 %v6249_v2  ;;  %v4842_v7 = vld [vmem:[#allocation4 + $0x4] sm:$0xf]  ;;  %v4500_v51 = vld [vmem:[#allocation4 + $0x10] sm:$0xf0]  ;;  %v4522_v18 = vld [vmem:[#allocation4 + $0x28] sm:$0xf]  ;;  %v6313_v1 = vor.u32 %v4847_v24, %v4524_v28  ;;  %v6315_v53 = vor.u32 %v4844_v12, %v4498_v38 }
 0x672   :  { %2775 = vmatpush.bf16.msra.mxu3 %v6253_v34  ;;  %v4849_v41 = vld [vmem:[#allocation4 + $0x34] sm:$0xf0]  ;;  %v4506_v8 = vld [vmem:[#allocation4 + $0x8] sm:$0xf]  ;;  %v6320_v45 = vor.u32 %v4842_v7, %v4500_v51  ;;  %v4843_v19 = vld [vmem:[#allocation4 + $0xc] sm:$0xf] }
 0x673   :  { %2737 = vmatpush.bf16.msra.mxu0 %v6255_v61  ;;  %v6317_v32 = vor.u32 %v4849_v41, %v4522_v18  ;;  %v4845_v63 = vld [vmem:[#allocation4 + $0x14] sm:$0xf0]  ;;  %v4508_v5 = vld [vmem:[#allocation4 + $0x18] sm:$0xf0]  ;;  %v2289_v50 = vld [vmem:[%s6757_s6] sm:$0xf] }
 0x674   :  { %2750 = vmatpush.bf16.msra.mxu1 %v6258_v0  ;;  %v6323_v33 = vor.u32 %v4845_v63, %v4506_v8  ;;  %v6327_v42 = vor.u32 %v4843_v19, %v4508_v5  ;;  %v2292_v4 = vperm.slane %v2289_v50, 1  ;;  %v6415_v59 = vperm.slane %v2289_v50, 2 }
 0x675   :  { %2763 = vmatpush.bf16.msra.mxu2 %v6261_v44  ;;  %v6417_v3 = vperm.slane %v2289_v50, 0  ;;  %v6419_v22 = vperm.slane %v2289_v50, 3 }
 0x676   :  { %2776 = vmatpush.bf16.msra.mxu3 %v6265_v14 }
 0x677   :  { %2738 = vmatpush.bf16.msra.mxu0 %v6267_v55 }
 0x678   :  { %2751 = vmatpush.bf16.msra.mxu1 %v6270_v36 }
 0x679   :  { %2764 = vmatpush.bf16.msra.mxu2 %v6273_v47 }
 0x67a   :  { %2777 = vmatpush.bf16.msra.mxu3 %v6277_v29  ;;  %2472 = vmatmul.bf16.gmra.mxu0 %v2222_v58 }
 0x67b   :  { %2739 = vmatpush.bf16.msra.mxu0 %v6279_v31  ;;  %2501 = vmatmul.bf16.gmra.mxu1 %v2222_v58 }
 0x67c   :  { %2752 = vmatpush.bf16.msra.mxu1 %v6284_v60  ;;  %2530 = vmatmul.bf16.gmra.mxu2 %v2222_v58 }
 0x67d   :  { %2559 = vmatmul.bf16.gmra.mxu3 %v2222_v58  ;;  %2765 = vmatpush.bf16.msra.mxu2 %v6287_v25 }
 0x67e   :  { %2778 = vmatpush.bf16.msra.mxu3 %v6291_v30 }
 0x67f   :  { %2740 = vmatpush.bf16.msra.mxu0 %v6293_v62 }
 0x680   :  { %2753 = vmatpush.bf16.msra.mxu1 %v6296_v49 }
 0x681   :  { %2766 = vmatpush.bf16.msra.mxu2 %v6308_v26 }
 0x682   :  { %2779 = vmatpush.bf16.msra.mxu3 %v6301_v39 }
 0x683   :  { %2741 = vmatpush.bf16.msra.mxu0 %v6303_v54 }
 0x684   :  { %2754 = vmatpush.bf16.msra.mxu1 %v6306_v15 }
 0x685   :  { %2767 = vmatpush.bf16.msra.mxu2 %v6317_v32 }
 0x686   :  { %2780 = vmatpush.bf16.msra.mxu3 %v6313_v1 }
 0x687   :  { %2742 = vmatpush.bf16.msra.mxu0 %v6315_v53 }
 0x688   :  { %2755 = vmatpush.bf16.msra.mxu1 %v6320_v45 }
 0x689   :  { %2768 = vmatpush.bf16.msra.mxu2 %v6323_v33 }
 0x68a   :  { %2781 = vmatpush.bf16.msra.mxu3 %v6327_v42  ;;  %2477 = vmatmul.bf16.gmra.mxu0 %v2223_v43 }
 0x68b   :  { %2855 = vmatpush.bf16.msrb.mxu0 %v6232_v13  ;;  %2506 = vmatmul.bf16.gmra.mxu1 %v2223_v43 }
 0x68c   :  { %2868 = vmatpush.bf16.msrb.mxu1 %v6236_v57  ;;  %2535 = vmatmul.bf16.gmra.mxu2 %v2223_v43 }
 0x68d   :  { %2881 = vmatpush.bf16.msrb.mxu2 %v6238_v52  ;;  %2564 = vmatmul.bf16.gmra.mxu3 %v2223_v43 }
 0x68e   :  { %2894 = vmatpush.bf16.msrb.mxu3 %v6241_v35 }
 0x68f   :  { %2856 = vmatpush.bf16.msrb.mxu0 %v6243_v48 }
 0x690   :  { %2869 = vmatpush.bf16.msrb.mxu1 %v6246_v17 }
 0x691   :  { %2882 = vmatpush.bf16.msrb.mxu2 %v6249_v2 }
 0x692   :  { %2895 = vmatpush.bf16.msrb.mxu3 %v6253_v34 }
 0x693   :  { %2857 = vmatpush.bf16.msrb.mxu0 %v6255_v61 }
 0x694   :  { %2870 = vmatpush.bf16.msrb.mxu1 %v6258_v0 }
 0x695   :  { %2883 = vmatpush.bf16.msrb.mxu2 %v6261_v44 }
 0x696   :  { %2896 = vmatpush.bf16.msrb.mxu3 %v6265_v14 }
 0x697   :  { %2858 = vmatpush.bf16.msrb.mxu0 %v6267_v55 }
 0x698   :  { %2871 = vmatpush.bf16.msrb.mxu1 %v6270_v36 }
 0x699   :  { %2884 = vmatpush.bf16.msrb.mxu2 %v6273_v47 }
 0x69a   :  { %2897 = vmatpush.bf16.msrb.mxu3 %v6277_v29  ;;  %2482 = vmatmul.bf16.gmra.mxu0 %v2224_v40 }
 0x69b   :  { %2859 = vmatpush.bf16.msrb.mxu0 %v6279_v31  ;;  %2511 = vmatmul.bf16.gmra.mxu1 %v2224_v40 }
 0x69c   :  { %2872 = vmatpush.bf16.msrb.mxu1 %v6284_v60  ;;  %2540 = vmatmul.bf16.gmra.mxu2 %v2224_v40 }
 0x69d   :  { %2885 = vmatpush.bf16.msrb.mxu2 %v6287_v25  ;;  %2569 = vmatmul.bf16.gmra.mxu3 %v2224_v40 }
 0x69e   :  { %2898 = vmatpush.bf16.msrb.mxu3 %v6291_v30 }
 0x69f   :  { %2860 = vmatpush.bf16.msrb.mxu0 %v6293_v62 }
 0x6a0   :  { %2873 = vmatpush.bf16.msrb.mxu1 %v6296_v49 }
 0x6a1   :  { %2886 = vmatpush.bf16.msrb.mxu2 %v6308_v26 }
 0x6a2   :  { %2899 = vmatpush.bf16.msrb.mxu3 %v6301_v39 }
 0x6a3   :  { %2861 = vmatpush.bf16.msrb.mxu0 %v6303_v54 }
 0x6a4   :  { %2874 = vmatpush.bf16.msrb.mxu1 %v6306_v15 }
 0x6a5   :  { %2887 = vmatpush.bf16.msrb.mxu2 %v6317_v32 }
 0x6a6   :  { %2900 = vmatpush.bf16.msrb.mxu3 %v6313_v1 }
 0x6a7   :  { %2862 = vmatpush.bf16.msrb.mxu0 %v6315_v53 }
 0x6a8   :  { %2875 = vmatpush.bf16.msrb.mxu1 %v6320_v45 }
 0x6a9   :  { %2888 = vmatpush.bf16.msrb.mxu2 %v6323_v33 }
 0x6aa   :  { %2901 = vmatpush.bf16.msrb.mxu3 %v6327_v42  ;;  %2743 = vmatmul.bf16.vlgmr.msra.gmra.mxu0 %v6851_v9 }
 0x6ab   :  { %2756 = vmatmul.bf16.vlgmr.msra.gmra.mxu1 %v6851_v9  ;;  %2975 = vmatpush.bf16.msra.mxu0 %v6232_v13 }
 0x6ac   :  { %2769 = vmatmul.bf16.vlgmr.msra.gmra.mxu2 %v6851_v9  ;;  %2988 = vmatpush.bf16.msra.mxu1 %v6236_v57 }
 0x6ad   :  { %2782 = vmatmul.bf16.vlgmr.msra.gmra.mxu3 %v6851_v9  ;;  %3001 = vmatpush.bf16.msra.mxu2 %v6238_v52 }
 0x6ae   :  { %3014 = vmatpush.bf16.msra.mxu3 %v6241_v35 }
 0x6af   :  { %2976 = vmatpush.bf16.msra.mxu0 %v6243_v48 }
 0x6b0   :  { %2989 = vmatpush.bf16.msra.mxu1 %v6246_v17 }
 0x6b1   :  { %3002 = vmatpush.bf16.msra.mxu2 %v6249_v2 }
 0x6b2   :  { %3015 = vmatpush.bf16.msra.mxu3 %v6253_v34 }
 0x6b3   :  { %2977 = vmatpush.bf16.msra.mxu0 %v6255_v61 }
 0x6b4   :  { %2990 = vmatpush.bf16.msra.mxu1 %v6258_v0 }
 0x6b5   :  { %3003 = vmatpush.bf16.msra.mxu2 %v6261_v44 }
 0x6b6   :  { %3016 = vmatpush.bf16.msra.mxu3 %v6265_v14 }
 0x6b7   :  { %2978 = vmatpush.bf16.msra.mxu0 %v6267_v55 }
 0x6b8   :  { %2991 = vmatpush.bf16.msra.mxu1 %v6270_v36 }
 0x6b9   :  { %3004 = vmatpush.bf16.msra.mxu2 %v6273_v47 }
 0x6ba   :  { %3017 = vmatpush.bf16.msra.mxu3 %v6277_v29 }
 0x6bb   :  { %2979 = vmatpush.bf16.msra.mxu0 %v6279_v31 }
 0x6bc   :  { %2992 = vmatpush.bf16.msra.mxu1 %v6284_v60 }
 0x6bd   :  { %3005 = vmatpush.bf16.msra.mxu2 %v6287_v25 }
 0x6be   :  { %3018 = vmatpush.bf16.msra.mxu3 %v6291_v30 }
 0x6bf   :  { %2980 = vmatpush.bf16.msra.mxu0 %v6293_v62 }
 0x6c0   :  { %2993 = vmatpush.bf16.msra.mxu1 %v6296_v49 }
 0x6c1   :  { %3006 = vmatpush.bf16.msra.mxu2 %v6308_v26 }
 0x6c2   :  { %3019 = vmatpush.bf16.msra.mxu3 %v6301_v39 }
 0x6c3   :  { %2981 = vmatpush.bf16.msra.mxu0 %v6303_v54 }
 0x6c4   :  { %2994 = vmatpush.bf16.msra.mxu1 %v6306_v15 }
 0x6c5   :  { %3007 = vmatpush.bf16.msra.mxu2 %v6317_v32 }
 0x6c6   :  { %3020 = vmatpush.bf16.msra.mxu3 %v6313_v1 }
 0x6c7   :  { %2982 = vmatpush.bf16.msra.mxu0 %v6315_v53 }
 0x6c8   :  { %2995 = vmatpush.bf16.msra.mxu1 %v6320_v45 }
 0x6c9   :  { %3008 = vmatpush.bf16.msra.mxu2 %v6323_v33 }
 0x6ca   :  { %3021 = vmatpush.bf16.msra.mxu3 %v6327_v42 }
 0x6e7   :  { %v2468_v23 = vpop.f32.mrf.mxu0 }
 0x6e8   :  { %v2497_v16 = vpop.f32.mrf.mxu1 }
 0x6ef   :  { %v6407_v58 = vpop.f32.mrf.mxu2  ;;  %v6411_v10 = vpop.f32.mrf.mxu0 }
 0x6f0   :  { %v6409_v11 = vpop.f32.mrf.mxu3  ;;  %v2499_v21 = vpop.f32.mrf.mxu1 }
 0x6f1   :  { %v6413_v37 = vadd.f32 %v2499_v21, %v2292_v4 }
 0x6f7   :  { %v2528_v46 = vpop.f32.mrf.mxu2  ;;  %v2473_v56 = vpop.f32.mrf.mxu0 }
 0x6f8   :  { %v6422_v6 = vadd.f32 %v2528_v46, %v6415_v59  ;;  %v2557_v20 = vpop.f32.mrf.mxu3  ;;  %v6428_v24 = vadd.f32 %v2473_v56, %v6417_v3  ;;  %v2502_v28 = vpop.f32.mrf.mxu1 }
 0x6f9   :  { %v6425_v27 = vadd.f32 %v2557_v20, %v6419_v22  ;;  %v6430_v38 = vadd.f32 %v2502_v28, %v2292_v4 }
 0x6ff   :  { %v2531_v12 = vpop.f32.mrf.mxu2  ;;  %v2475_v18 = vpop.f32.mrf.mxu0 }
 0x700   :  { %v6433_v7 = vadd.f32 %v2531_v12, %v6415_v59  ;;  %v2560_v51 = vpop.f32.mrf.mxu3  ;;  %v6439_v8 = vadd.f32 %v2475_v18, %v6417_v3  ;;  %v2504_v63 = vpop.f32.mrf.mxu1 }
 0x701   :  { %v6436_v41 = vadd.f32 %v2560_v51, %v6419_v22  ;;  %v6441_v19 = vadd.f32 %v2504_v63, %v2292_v4 }
 0x702   :  { %6852 = vst [vmem:[#allocation20_spill] sm:$0xff] %v6433_v7 }
 0x703   :  { %6853 = vst [vmem:[#allocation37_spill] sm:$0xff] %v6436_v41 }
 0x704   :  { %6854 = vst [vmem:[#allocation38_spill] sm:$0xff] %v6439_v8 }
 0x705   :  { %6855 = vst [vmem:[#allocation19_spill] sm:$0xff] %v6441_v19 }
 0x707   :  { %v2533_v5 = vpop.f32.mrf.mxu2  ;;  %v2478_v9 = vpop.f32.mrf.mxu0 }
 0x708   :  { %v6444_v43 = vadd.f32 %v2533_v5, %v6415_v59  ;;  %v2562_v40 = vpop.f32.mrf.mxu3  ;;  %v6450_v21 = vadd.f32 %v2478_v9, %v6417_v3  ;;  %v2507_v46 = vpop.f32.mrf.mxu1 }
 0x709   :  { %v6447_v50 = vadd.f32 %v2562_v40, %v6419_v22  ;;  %v6452_v20 = vadd.f32 %v2507_v46, %v2292_v4 }
 0x70a   :  { %6856 = vst [vmem:[#allocation21_spill] sm:$0xff] %v6444_v43 }
 0x70b   :  { %6857 = vst [vmem:[#allocation39_spill] sm:$0xff] %v6447_v50 }
 0x70c   :  { %6858 = vst [vmem:[#allocation48_spill] sm:$0xff] %v6450_v21 }
 0x70d   :  { %6859 = vst [vmem:[#allocation17_spill] sm:$0xff] %v6452_v20 }
 0x70f   :  { %v2536_v56 = vpop.f32.mrf.mxu2  ;;  %v2480_v51 = vpop.f32.mrf.mxu0 }
 0x710   :  { %v6455_v28 = vadd.f32 %v2536_v56, %v6415_v59  ;;  %v2565_v12 = vpop.f32.mrf.mxu3  ;;  %v6461_v63 = vadd.f32 %v2480_v51, %v6417_v3  ;;  %v2509_v5 = vpop.f32.mrf.mxu1 }
 0x711   :  { %v6458_v18 = vadd.f32 %v2565_v12, %v6419_v22  ;;  %v6463_v40 = vadd.f32 %v2509_v5, %v2292_v4 }
 0x712   :  { %6860 = vst [vmem:[#allocation22_spill] sm:$0xff] %v6455_v28 }
 0x713   :  { %6861 = vst [vmem:[#allocation18_spill] sm:$0xff] %v6458_v18 }
 0x714   :  { %6862 = vst [vmem:[#allocation25_spill] sm:$0xff] %v6461_v63 }
 0x715   :  { %6863 = vst [vmem:[#allocation40_spill] sm:$0xff] %v6463_v40 }
 0x717   :  { %v2538_v9 = vpop.f32.mrf.mxu2  ;;  %v2483_v20 = vpop.f32.mrf.mxu0 }
 0x718   :  { %v6466_v21 = vadd.f32 %v2538_v9, %v6415_v59  ;;  %v2567_v46 = vpop.f32.mrf.mxu3  ;;  %v6472_v28 = vadd.f32 %v2483_v20, %v6417_v3  ;;  %v2512_v12 = vpop.f32.mrf.mxu1  ;;  %v2469_v20 = vadd.f32 %v2468_v23, %v6417_v3  ;;  %v2556_v23 = vadd.f32 %v6409_v11, %v6419_v22 }
 0x719   :  { %v6469_v56 = vadd.f32 %v2567_v46, %v6419_v22  ;;  %v6474_v18 = vadd.f32 %v2512_v12, %v2292_v4  ;;  %v2498_v12 = vadd.f32 %v2497_v16, %v2292_v4 }
 0x71a   :  { %6864 = vst [vmem:[#allocation23_spill] sm:$0xff] %v6466_v21 }
 0x71b   :  { %6865 = vst [vmem:[#allocation24_spill] sm:$0xff] %v6469_v56 }
 0x71c   :  { %6866 = vst [vmem:[#allocation41_spill] sm:$0xff] %v6472_v28 }
 0x71d   :  { %6867 = vst [vmem:[#allocation27_spill] sm:$0xff] %v6474_v18 }
 0x71f   :  { %v2541_v51 = vpop.f32.mrf.mxu2  ;;  %v2485_v40 = vpop.f32.mrf.mxu0 }
 0x720   :  { %v6477_v63 = vadd.f32 %v2541_v51, %v6415_v59  ;;  %v2570_v5 = vpop.f32.mrf.mxu3  ;;  %v6483_v21 = vadd.f32 %v2485_v40, %v6417_v3  ;;  %v2514_v46 = vpop.f32.mrf.mxu1 }
 0x721   :  { %v6480_v9 = vadd.f32 %v2570_v5, %v6419_v22  ;;  %v6485_v56 = vadd.f32 %v2514_v46, %v2292_v4 }
 0x722   :  { %6868 = vst [vmem:[#allocation42_spill] sm:$0xff] %v6477_v63 }
 0x723   :  { %6869 = vst [vmem:[#allocation49_spill] sm:$0xff] %v6480_v9 }
 0x724   :  { %6870 = vst [vmem:[#allocation28_spill] sm:$0xff] %v6483_v21 }
 0x725   :  { %6871 = vst [vmem:[#allocation31_spill] sm:$0xff] %v6485_v56 }
 0x727   :  { %v2543_v28 = vpop.f32.mrf.mxu2  ;;  %v2744_v63 = vpop.f32.mrf.mxu0 }
 0x728   :  { %v6489_v18 = vadd.f32 %v2543_v28, %v6415_v59  ;;  %v2572_v51 = vpop.f32.mrf.mxu3  ;;  %v2787_v5 = vadd.f32 %v2744_v63, %v2469_v20  ;;  %v2757_v9 = vpop.f32.mrf.mxu1 }
 0x729   :  { %v6492_v43 = vadd.f32 %v2572_v51, %v6419_v22  ;;  %v2788_v50 = vadd.f32 %v2757_v9, %v2498_v12 }
 0x72a   :  { %6872 = vst [vmem:[#allocation43_spill] sm:$0xff] %v6489_v18  ;;  %v4624_v40 = vmul.f32 -1.442695, %v2787_v5 }
 0x72b   :  { %6873 = vst [vmem:[#allocation29_spill] sm:$0xff] %v6492_v43  ;;  %v4625_v21 = vmul.f32 -1.442695, %v2788_v50 }
 0x72c   :  { %5020 = vpow2.f32 %v4624_v40 }
 0x72d   :  { %5022 = vpow2.f32 %v4625_v21  ;;  %v2527_v21 = vadd.f32 %v6407_v58, %v6415_v59 }
 0x72f   :  { %v2770_v46 = vpop.f32.mrf.mxu2  ;;  %v2746_v4 = vpop.f32.mrf.mxu0 }
 0x730   :  { %v2783_v16 = vpop.f32.mrf.mxu3  ;;  %v2759_v18 = vpop.f32.mrf.mxu1  ;;  %v2789_v22 = vadd.f32 %v2770_v46, %v2527_v21 }
 0x731   :  { %v2790_v28 = vadd.f32 %v2783_v16, %v2556_v23 }
 0x732   :  { %v5021_v56 = vpop.eup %5020 }
 0x733   :  { %v4626_v19 = vmul.f32 -1.442695, %v2790_v28  ;;  %v5023_v8 = vpop.eup %5022  ;;  %v2794_v51 = vadd.f32 1.0, %v5021_v56 }
 0x734   :  { %v2813_v43 = vadd.f32 1.0, %v5023_v8 }
 0x735   :  { %5024 = vpow2.f32 %v4626_v19  ;;  %v2806_v56 = vand.u32 2147483648, %v2794_v51  ;;  %v2804_v16 = vand.u32 2147483647, %v2794_v51  ;;  %vm2800_vm2 = vweird.f32 %v2794_v51 }
 0x736   :  { %5026 = vrcp.f32 %v2794_v51  ;;  %v2825_v8 = vand.u32 2147483648, %v2813_v43  ;;  %v2823_v28 = vand.u32 2147483647, %v2813_v43  ;;  %vm2819_vm3 = vweird.f32 %v2813_v43 }
 0x737   :  { %5028 = vrcp.f32 %v2813_v43  ;;  %v2772_v63 = vpop.f32.mrf.mxu2  ;;  %v2807_v46 = vor.u32 1.1754944e-38, %v2806_v56  ;;  %vm2805_vm5 = vcmp.eq.f32.partialorder %v2804_v16, 8.507059e+37 }
 0x738   :  { %v2785_v50 = vpop.f32.mrf.mxu3  ;;  %vm2824_vm7 = vcmp.eq.f32.partialorder %v2823_v28, 8.507059e+37 }
 0x739   :  { %v2826_v50 = vor.u32 1.1754944e-38, %v2825_v8 }
 0x73b   :  { %v5025_v9 = vpop.eup %5024 }
 0x73c   :  { %v5027_v11 = vpop.eup %5026  ;;  %v2833_v20 = vadd.f32 1.0, %v5025_v9 }
 0x73d   :  { %v5029_v12 = vpop.eup %5028  ;;  %v2796_v5 = vmul.f32 %v5027_v11, %v2794_v51  ;;  %vm2801_vm0 = vweird.f32 %v5027_v11 }
 0x73e   :  { %v2815_v18 = vmul.f32 %v5029_v12, %v2813_v43  ;;  %5030 = vrcp.f32 %v2833_v20  ;;  %vm2820_vm1 = vweird.f32 %v5029_v12  ;;  %vm2802_vm4 = vmor %vm2800_vm2, %vm2801_vm0  ;;  %v2845_v56 = vand.u32 2147483648, %v2833_v20 }
 0x73f   :  { %v2797_v40 = vsub.f32 1.0, %v2796_v5  ;;  %5032 = vtanh.f32 %v2789_v22  ;;  %vm2821_vm6 = vmor %vm2819_vm3, %vm2820_vm1  ;;  %vm2839_vm9 = vweird.f32 %v2833_v20 }
 0x740   :  { %v2816_v23 = vsub.f32 1.0, %v2815_v18  ;;  %v2846_v16 = vor.u32 1.1754944e-38, %v2845_v56 }
 0x741   :  { %v2798_v19 = vmul.f32 %v5027_v11, %v2797_v40 }
 0x742   :  { %v2817_v4 = vmul.f32 %v5029_v12, %v2816_v23 }
 0x743   :  { %v2799_v58 = vadd.f32 %v5027_v11, %v2798_v19 }
 0x744   :  { %v5031_v59 = vpop.eup %5030  ;;  %v2818_v63 = vadd.f32 %v5029_v12, %v2817_v4 }
 0x745   :  { %v2803_v21 = vsel %vm2802_vm4, %v5027_v11, %v2799_v58  ;;  %v2835_v9 = vmul.f32 %v5031_v59, %v2833_v20  ;;  %v5033_v22 = vpop.eup %5032  ;;  %vm2840_vm8 = vweird.f32 %v5031_v59  ;;  %v2843_v11 = vand.u32 2147483647, %v2833_v20 }
 0x746   :  { %v2808_v5 = vsel %vm2805_vm5, %v2807_v46, %v2803_v21  ;;  %v2822_v18 = vsel %vm2821_vm6, %v5029_v12, %v2818_v63  ;;  %vm2841_vm10 = vmor %vm2839_vm9, %vm2840_vm8 }
 0x747   :  { %v2827_v40 = vsel %vm2824_vm7, %v2826_v50, %v2822_v18  ;;  %v2850_v23 = vmul.f32 %v5033_v22, %v2808_v5  ;;  %v2836_v7 = vsub.f32 1.0, %v2835_v9  ;;  %vm2844_vm11 = vcmp.eq.f32.partialorder %v2843_v11, 8.507059e+37 }
 0x748   :  { %v2849_v41 = vmul.f32 0.0, %v2827_v40 }
 0x749   :  { %v2837_v19 = vmul.f32 %v5031_v59, %v2836_v7  ;;  %v2471_v7 = vadd.f32 %v6411_v10, %v6417_v3 }
 0x74a   :  { %v6498_v51 = vadd.f32 %v2850_v23, %v2849_v41 }
 0x74b   :  { %v2838_v43 = vadd.f32 %v5031_v59, %v2837_v19 }
 0x74c   :  { %5034 = vtanh.f32 %v6498_v51 }
 0x74d   :  { %v2842_v8 = vsel %vm2841_vm10, %v5031_v59, %v2838_v43 }
 0x74e   :  { %v2847_v4 = vsel %vm2844_vm11, %v2846_v16, %v2842_v8 }
 0x752   :  { %v5035_v12 = vpop.eup %5034 }
 0x753   :  { %v2853_v28 = vmul.f32 %v5035_v12, %v2847_v4 }
 0x755   :  { %v2854_v58 = vpack.c.bf16 %v2853_v28, %v2853_v28 }
 0x757   :  { %2863 = vmatmul.bf16.vlgmr.msrb.gmra.mxu0 %v2854_v58  ;;  %2876 = vmatmul.bf16.vlgmr.msrb.gmra.mxu1 %v2854_v58 }
 0x758   :  { %2889 = vmatmul.bf16.vlgmr.msrb.gmra.mxu2 %v2854_v58  ;;  %2902 = vmatmul.bf16.vlgmr.msrb.gmra.mxu3 %v2854_v58 }
 0x759   :  { %3095 = vmatpush.bf16.msrb.mxu0 %v6232_v13  ;;  %3108 = vmatpush.bf16.msrb.mxu1 %v6236_v57 }
 0x75a   :  { %3121 = vmatpush.bf16.msrb.mxu2 %v6238_v52  ;;  %3134 = vmatpush.bf16.msrb.mxu3 %v6241_v35 }
 0x75d   :  { %3096 = vmatpush.bf16.msrb.mxu0 %v6243_v48  ;;  %3109 = vmatpush.bf16.msrb.mxu1 %v6246_v17 }
 0x75e   :  { %3122 = vmatpush.bf16.msrb.mxu2 %v6249_v2  ;;  %3135 = vmatpush.bf16.msrb.mxu3 %v6253_v34 }
 0x761   :  { %3097 = vmatpush.bf16.msrb.mxu0 %v6255_v61  ;;  %3110 = vmatpush.bf16.msrb.mxu1 %v6258_v0 }
 0x762   :  { %3123 = vmatpush.bf16.msrb.mxu2 %v6261_v44  ;;  %3136 = vmatpush.bf16.msrb.mxu3 %v6265_v14 }
 0x765   :  { %3098 = vmatpush.bf16.msrb.mxu0 %v6267_v55  ;;  %3111 = vmatpush.bf16.msrb.mxu1 %v6270_v36 }
 0x766   :  { %3124 = vmatpush.bf16.msrb.mxu2 %v6273_v47  ;;  %3137 = vmatpush.bf16.msrb.mxu3 %v6277_v29 }
 0x769   :  { %3099 = vmatpush.bf16.msrb.mxu0 %v6279_v31  ;;  %3112 = vmatpush.bf16.msrb.mxu1 %v6284_v60 }
 0x76a   :  { %3125 = vmatpush.bf16.msrb.mxu2 %v6287_v25  ;;  %3138 = vmatpush.bf16.msrb.mxu3 %v6291_v30 }
 0x76d   :  { %3100 = vmatpush.bf16.msrb.mxu0 %v6293_v62  ;;  %3113 = vmatpush.bf16.msrb.mxu1 %v6296_v49 }
 0x76e   :  { %3126 = vmatpush.bf16.msrb.mxu2 %v6308_v26  ;;  %3139 = vmatpush.bf16.msrb.mxu3 %v6301_v39 }
 0x771   :  { %3101 = vmatpush.bf16.msrb.mxu0 %v6303_v54  ;;  %3114 = vmatpush.bf16.msrb.mxu1 %v6306_v15 }
 0x772   :  { %3127 = vmatpush.bf16.msrb.mxu2 %v6317_v32  ;;  %3140 = vmatpush.bf16.msrb.mxu3 %v6313_v1 }
 0x775   :  { %3102 = vmatpush.bf16.msrb.mxu0 %v6315_v53  ;;  %3115 = vmatpush.bf16.msrb.mxu1 %v6320_v45 }
 0x776   :  { %3128 = vmatpush.bf16.msrb.mxu2 %v6323_v33  ;;  %3141 = vmatpush.bf16.msrb.mxu3 %v6327_v42 }
 0x7d4   :  { %v2864_v41 = vpop.f32.mrf.mxu0  ;;  %v2877_v20 = vpop.f32.mrf.mxu1 }
 0x7d5   :  { %v2907_v59 = vadd.f32 %v2864_v41, %v2471_v7  ;;  %v2908_v46 = vadd.f32 %v2877_v20, %v6413_v37 }
 0x7d7   :  { %v4627_v63 = vmul.f32 -1.442695, %v2907_v59  ;;  %v4628_v50 = vmul.f32 -1.442695, %v2908_v46 }
 0x7d9   :  { %5036 = vpow2.f32 %v4627_v63 }
 0x7da   :  { %5038 = vpow2.f32 %v4628_v50 }
 0x7db   :  { %v2890_v21 = vpop.f32.mrf.mxu2  ;;  %v2903_v9 = vpop.f32.mrf.mxu3 }
 0x7dc   :  { %v2910_v22 = vadd.f32 %v2903_v9, %v6425_v27  ;;  %v2866_v5 = vpop.f32.mrf.mxu0  ;;  %v2879_v18 = vpop.f32.mrf.mxu1  ;;  %v2909_v16 = vadd.f32 %v2890_v21, %v6422_v6 }
 0x7de   :  { %v4629_v40 = vmul.f32 -1.442695, %v2910_v22 }
 0x7df   :  { %v5037_v23 = vpop.eup %5036 }
 0x7e0   :  { %v5039_v19 = vpop.eup %5038  ;;  %v2914_v43 = vadd.f32 1.0, %v5037_v23  ;;  %5040 = vpow2.f32 %v4629_v40 }
 0x7e1   :  { %v2933_v10 = vadd.f32 1.0, %v5039_v19 }
 0x7e2   :  { %5042 = vrcp.f32 %v2914_v43  ;;  %v2926_v7 = vand.u32 2147483648, %v2914_v43  ;;  %v2924_v59 = vand.u32 2147483647, %v2914_v43  ;;  %vm2920_vm14 = vweird.f32 %v2914_v43 }
 0x7e3   :  { %5044 = vrcp.f32 %v2933_v10  ;;  %v2892_v3 = vpop.f32.mrf.mxu2  ;;  %v2905_v37 = vpop.f32.mrf.mxu3  ;;  %v2945_v41 = vand.u32 2147483648, %v2933_v10  ;;  %v2943_v63 = vand.u32 2147483647, %v2933_v10  ;;  %vm2939_vm15 = vweird.f32 %v2933_v10 }
 0x7e4   :  { %v2927_v6 = vor.u32 1.1754944e-38, %v2926_v7  ;;  %vm2925_vm2 = vcmp.eq.f32.partialorder %v2924_v59, 8.507059e+37 }
 0x7e5   :  { %v2946_v5 = vor.u32 1.1754944e-38, %v2945_v41  ;;  %vm2944_vm3 = vcmp.eq.f32.partialorder %v2943_v63, 8.507059e+37 }
 0x7e6   :  { %v5041_v56 = vpop.eup %5040 }
 0x7e7   :  { %v2953_v11 = vadd.f32 1.0, %v5041_v56 }
 0x7e8   :  { %v5043_v8 = vpop.eup %5042 }
 0x7e9   :  { %v5045_v12 = vpop.eup %5044  ;;  %v2916_v4 = vmul.f32 %v5043_v8, %v2914_v43  ;;  %5046 = vrcp.f32 %v2953_v11  ;;  %vm2921_vm12 = vweird.f32 %v5043_v8  ;;  %vm2959_vm5 = vweird.f32 %v2953_v11 }
 0x7ea   :  { %v2935_v27 = vmul.f32 %v5045_v12, %v2933_v10  ;;  %5048 = vtanh.f32 %v2909_v16  ;;  %vm2940_vm13 = vweird.f32 %v5045_v12  ;;  %vm2922_vm0 = vmor %vm2920_vm14, %vm2921_vm12 }
 0x7eb   :  { %v2917_v28 = vsub.f32 1.0, %v2916_v4  ;;  %vm2941_vm1 = vmor %vm2939_vm15, %vm2940_vm13 }
 0x7ec   :  { %v2936_v58 = vsub.f32 1.0, %v2935_v27  ;;  %v2965_v27 = vand.u32 2147483648, %v2953_v11 }
 0x7ed   :  { %v2918_v20 = vmul.f32 %v5043_v8, %v2917_v28 }
 0x7ee   :  { %v2937_v46 = vmul.f32 %v5045_v12, %v2936_v58  ;;  %v2966_v58 = vor.u32 1.1754944e-38, %v2965_v27 }
 0x7ef   :  { %v5047_v50 = vpop.eup %5046  ;;  %v2919_v9 = vadd.f32 %v5043_v8, %v2918_v20 }
 0x7f0   :  { %v2938_v21 = vadd.f32 %v5045_v12, %v2937_v46  ;;  %v2955_v22 = vmul.f32 %v5047_v50, %v2953_v11  ;;  %v5049_v40 = vpop.eup %5048  ;;  %vm2960_vm4 = vweird.f32 %v5047_v50 }
 0x7f1   :  { %v2923_v18 = vsel %vm2922_vm0, %v5043_v8, %v2919_v9  ;;  %v2963_v8 = vand.u32 2147483647, %v2953_v11  ;;  %vm2961_vm6 = vmor %vm2959_vm5, %vm2960_vm4 }
 0x7f2   :  { %v2928_v23 = vsel %vm2925_vm2, %v2927_v6, %v2923_v18  ;;  %v2942_v19 = vsel %vm2941_vm1, %v5045_v12, %v2938_v21  ;;  %v2956_v3 = vsub.f32 1.0, %v2955_v22  ;;  %v6874_v21 = vld [vmem:[#allocation37_spill] sm:$0xff] }
 0x7f3   :  { %v2947_v37 = vsel %vm2944_vm3, %v2946_v5, %v2942_v19  ;;  %v2970_v56 = vmul.f32 %v5049_v40, %v2928_v23  ;;  %vm2964_vm7 = vcmp.eq.f32.partialorder %v2963_v8, 8.507059e+37 }
 0x7f4   :  { %v2969_v16 = vmul.f32 %v2947_v37, %v6498_v51  ;;  %v2957_v4 = vmul.f32 %v5047_v50, %v2956_v3 }
 0x7f6   :  { %v6539_v43 = vadd.f32 %v2970_v56, %v2969_v16  ;;  %v2958_v10 = vadd.f32 %v5047_v50, %v2957_v4 }
 0x7f8   :  { %5050 = vtanh.f32 %v6539_v43  ;;  %v2962_v28 = vsel %vm2961_vm6, %v5047_v50, %v2958_v10  ;;  %v6875_v10 = vld [vmem:[#allocation20_spill] sm:$0xff] }
 0x7f9   :  { %v2967_v7 = vsel %vm2964_vm7, %v2966_v58, %v2962_v28 }
 0x7fe   :  { %v5051_v12 = vpop.eup %5050 }
 0x7ff   :  { %v2973_v41 = vmul.f32 %v5051_v12, %v2967_v7 }
 0x801   :  { %v2974_v20 = vpack.c.bf16 %v2973_v41, %v2973_v41 }
 0x803   :  { %2983 = vmatmul.bf16.vlgmr.msra.gmra.mxu0 %v2974_v20  ;;  %2996 = vmatmul.bf16.vlgmr.msra.gmra.mxu1 %v2974_v20 }
 0x804   :  { %3009 = vmatmul.bf16.vlgmr.msra.gmra.mxu2 %v2974_v20  ;;  %3022 = vmatmul.bf16.vlgmr.msra.gmra.mxu3 %v2974_v20 }
 0x805   :  { %3215 = vmatpush.bf16.msra.mxu0 %v6232_v13  ;;  %3228 = vmatpush.bf16.msra.mxu1 %v6236_v57 }
 0x806   :  { %3241 = vmatpush.bf16.msra.mxu2 %v6238_v52  ;;  %3254 = vmatpush.bf16.msra.mxu3 %v6241_v35 }
 0x809   :  { %3216 = vmatpush.bf16.msra.mxu0 %v6243_v48  ;;  %3229 = vmatpush.bf16.msra.mxu1 %v6246_v17 }
 0x80a   :  { %3242 = vmatpush.bf16.msra.mxu2 %v6249_v2  ;;  %3255 = vmatpush.bf16.msra.mxu3 %v6253_v34 }
 0x80d   :  { %3217 = vmatpush.bf16.msra.mxu0 %v6255_v61  ;;  %3230 = vmatpush.bf16.msra.mxu1 %v6258_v0 }
 0x80e   :  { %3243 = vmatpush.bf16.msra.mxu2 %v6261_v44  ;;  %3256 = vmatpush.bf16.msra.mxu3 %v6265_v14 }
 0x811   :  { %3218 = vmatpush.bf16.msra.mxu0 %v6267_v55  ;;  %3231 = vmatpush.bf16.msra.mxu1 %v6270_v36 }
 0x812   :  { %3244 = vmatpush.bf16.msra.mxu2 %v6273_v47  ;;  %3257 = vmatpush.bf16.msra.mxu3 %v6277_v29 }
 0x815   :  { %3219 = vmatpush.bf16.msra.mxu0 %v6279_v31  ;;  %3232 = vmatpush.bf16.msra.mxu1 %v6284_v60 }
 0x816   :  { %3245 = vmatpush.bf16.msra.mxu2 %v6287_v25  ;;  %3258 = vmatpush.bf16.msra.mxu3 %v6291_v30 }
 0x819   :  { %3220 = vmatpush.bf16.msra.mxu0 %v6293_v62  ;;  %3233 = vmatpush.bf16.msra.mxu1 %v6296_v49 }
 0x81a   :  { %3246 = vmatpush.bf16.msra.mxu2 %v6308_v26  ;;  %3259 = vmatpush.bf16.msra.mxu3 %v6301_v39 }
 0x81d   :  { %3221 = vmatpush.bf16.msra.mxu0 %v6303_v54  ;;  %3234 = vmatpush.bf16.msra.mxu1 %v6306_v15 }
 0x81e   :  { %3247 = vmatpush.bf16.msra.mxu2 %v6317_v32  ;;  %3260 = vmatpush.bf16.msra.mxu3 %v6313_v1 }
 0x821   :  { %3222 = vmatpush.bf16.msra.mxu0 %v6315_v53  ;;  %3235 = vmatpush.bf16.msra.mxu1 %v6320_v45 }
 0x822   :  { %3248 = vmatpush.bf16.msra.mxu2 %v6323_v33  ;;  %3261 = vmatpush.bf16.msra.mxu3 %v6327_v42 }
 0x880   :  { %v2984_v51 = vpop.f32.mrf.mxu0  ;;  %v2997_v11 = vpop.f32.mrf.mxu1 }
 0x881   :  { %v3027_v59 = vadd.f32 %v2984_v51, %v6428_v24  ;;  %v3028_v46 = vadd.f32 %v2997_v11, %v6430_v38 }
 0x883   :  { %v4630_v63 = vmul.f32 -1.442695, %v3027_v59  ;;  %v4631_v50 = vmul.f32 -1.442695, %v3028_v46 }
 0x885   :  { %5052 = vpow2.f32 %v4630_v63 }
 0x886   :  { %5054 = vpow2.f32 %v4631_v50 }
 0x887   :  { %v3010_v9 = vpop.f32.mrf.mxu2  ;;  %v3023_v6 = vpop.f32.mrf.mxu3 }
 0x888   :  { %v3030_v22 = vadd.f32 %v3023_v6, %v6874_v21  ;;  %v2986_v5 = vpop.f32.mrf.mxu0  ;;  %v2999_v18 = vpop.f32.mrf.mxu1  ;;  %v3029_v27 = vadd.f32 %v3010_v9, %v6875_v10 }
 0x88a   :  { %v4632_v40 = vmul.f32 -1.442695, %v3030_v22 }
 0x88b   :  { %v5053_v23 = vpop.eup %5052 }
 0x88c   :  { %v5055_v19 = vpop.eup %5054  ;;  %v3034_v3 = vadd.f32 1.0, %v5053_v23  ;;  %5056 = vpow2.f32 %v4632_v40 }
 0x88d   :  { %v3053_v37 = vadd.f32 1.0, %v5055_v19 }
 0x88e   :  { %5058 = vrcp.f32 %v3034_v3  ;;  %v3046_v41 = vand.u32 2147483648, %v3034_v3  ;;  %v3044_v11 = vand.u32 2147483647, %v3034_v3  ;;  %vm3040_vm10 = vweird.f32 %v3034_v3 }
 0x88f   :  { %5060 = vrcp.f32 %v3053_v37  ;;  %v3012_v24 = vpop.f32.mrf.mxu2  ;;  %v3025_v38 = vpop.f32.mrf.mxu3  ;;  %v3065_v20 = vand.u32 2147483648, %v3053_v37  ;;  %v3063_v46 = vand.u32 2147483647, %v3053_v37  ;;  %vm3059_vm11 = vweird.f32 %v3053_v37 }
 0x890   :  { %v3047_v9 = vor.u32 1.1754944e-38, %v3046_v41  ;;  %vm3045_vm14 = vcmp.eq.f32.partialorder %v3044_v11, 8.507059e+37  ;;  %v6877_v11 = vld [vmem:[#allocation19_spill] sm:$0xff] }
 0x891   :  { %v3066_v22 = vor.u32 1.1754944e-38, %v3065_v20  ;;  %vm3064_vm15 = vcmp.eq.f32.partialorder %v3063_v46, 8.507059e+37  ;;  %v6876_v20 = vld [vmem:[#allocation38_spill] sm:$0xff] }
 0x892   :  { %v5057_v56 = vpop.eup %5056 }
 0x893   :  { %v3073_v16 = vadd.f32 1.0, %v5057_v56 }
 0x894   :  { %v5059_v4 = vpop.eup %5058 }
 0x895   :  { %v5061_v8 = vpop.eup %5060  ;;  %v3036_v28 = vmul.f32 %v5059_v4, %v3034_v3  ;;  %5062 = vrcp.f32 %v3073_v16  ;;  %vm3041_vm8 = vweird.f32 %v5059_v4  ;;  %vm3079_vm1 = vweird.f32 %v3073_v16 }
 0x896   :  { %v3055_v58 = vmul.f32 %v5061_v8, %v3053_v37  ;;  %5064 = vtanh.f32 %v3029_v27  ;;  %vm3060_vm9 = vweird.f32 %v5061_v8  ;;  %vm3042_vm12 = vmor %vm3040_vm10, %vm3041_vm8  ;;  %v3085_v27 = vand.u32 2147483648, %v3073_v16 }
 0x897   :  { %v3037_v12 = vsub.f32 1.0, %v3036_v28  ;;  %vm3061_vm13 = vmor %vm3059_vm11, %vm3060_vm9 }
 0x898   :  { %v3056_v7 = vsub.f32 1.0, %v3055_v58  ;;  %v3086_v58 = vor.u32 1.1754944e-38, %v3085_v27 }
 0x899   :  { %v3038_v51 = vmul.f32 %v5059_v4, %v3037_v12 }
 0x89a   :  { %v3057_v59 = vmul.f32 %v5061_v8, %v3056_v7 }
 0x89b   :  { %v5063_v63 = vpop.eup %5062  ;;  %v3039_v50 = vadd.f32 %v5059_v4, %v3038_v51 }
 0x89c   :  { %v3058_v6 = vadd.f32 %v5061_v8, %v3057_v59  ;;  %v3075_v21 = vmul.f32 %v5063_v63, %v3073_v16  ;;  %v5065_v18 = vpop.eup %5064  ;;  %vm3080_vm0 = vweird.f32 %v5063_v63 }
 0x89d   :  { %v3043_v5 = vsel %vm3042_vm12, %v5059_v4, %v3039_v50  ;;  %v3083_v4 = vand.u32 2147483647, %v3073_v16  ;;  %vm3081_vm2 = vmor %vm3079_vm1, %vm3080_vm0 }
 0x89e   :  { %v3048_v40 = vsel %vm3045_vm14, %v3047_v9, %v3043_v5  ;;  %v3062_v23 = vsel %vm3061_vm13, %v5061_v8, %v3058_v6  ;;  %v3076_v19 = vsub.f32 1.0, %v3075_v21  ;;  %v6878_v6 = vld [vmem:[#allocation39_spill] sm:$0xff] }
 0x89f   :  { %v3067_v24 = vsel %vm3064_vm15, %v3066_v22, %v3062_v23  ;;  %v3090_v38 = vmul.f32 %v5065_v18, %v3048_v40  ;;  %vm3084_vm3 = vcmp.eq.f32.partialorder %v3083_v4, 8.507059e+37  ;;  %v6879_v4 = vld [vmem:[#allocation21_spill] sm:$0xff] }
 0x8a0   :  { %v3089_v56 = vmul.f32 %v3067_v24, %v6539_v43  ;;  %v3077_v10 = vmul.f32 %v5063_v63, %v3076_v19 }
 0x8a2   :  { %v6579_v3 = vadd.f32 %v3090_v38, %v3089_v56  ;;  %v3078_v37 = vadd.f32 %v5063_v63, %v3077_v10 }
 0x8a4   :  { %5066 = vtanh.f32 %v6579_v3  ;;  %v3082_v28 = vsel %vm3081_vm2, %v5063_v63, %v3078_v37 }
 0x8a5   :  { %v3087_v12 = vsel %vm3084_vm3, %v3086_v58, %v3082_v28 }
 0x8aa   :  { %v5067_v8 = vpop.eup %5066 }
 0x8ab   :  { %v3093_v7 = vmul.f32 %v5067_v8, %v3087_v12 }
 0x8ad   :  { %v3094_v41 = vpack.c.bf16 %v3093_v7, %v3093_v7 }
 0x8af   :  { %3103 = vmatmul.bf16.vlgmr.msrb.gmra.mxu0 %v3094_v41  ;;  %3116 = vmatmul.bf16.vlgmr.msrb.gmra.mxu1 %v3094_v41 }
 0x8b0   :  { %3129 = vmatmul.bf16.vlgmr.msrb.gmra.mxu2 %v3094_v41  ;;  %3142 = vmatmul.bf16.vlgmr.msrb.gmra.mxu3 %v3094_v41 }
 0x8b1   :  { %3335 = vmatpush.bf16.msrb.mxu0 %v6232_v13  ;;  %3348 = vmatpush.bf16.msrb.mxu1 %v6236_v57 }
 0x8b2   :  { %3361 = vmatpush.bf16.msrb.mxu2 %v6238_v52  ;;  %3374 = vmatpush.bf16.msrb.mxu3 %v6241_v35 }
 0x8b5   :  { %3336 = vmatpush.bf16.msrb.mxu0 %v6243_v48  ;;  %3349 = vmatpush.bf16.msrb.mxu1 %v6246_v17 }
 0x8b6   :  { %3362 = vmatpush.bf16.msrb.mxu2 %v6249_v2  ;;  %3375 = vmatpush.bf16.msrb.mxu3 %v6253_v34 }
 0x8b9   :  { %3337 = vmatpush.bf16.msrb.mxu0 %v6255_v61  ;;  %3350 = vmatpush.bf16.msrb.mxu1 %v6258_v0 }
 0x8ba   :  { %3363 = vmatpush.bf16.msrb.mxu2 %v6261_v44  ;;  %3376 = vmatpush.bf16.msrb.mxu3 %v6265_v14 }
 0x8bd   :  { %3338 = vmatpush.bf16.msrb.mxu0 %v6267_v55  ;;  %3351 = vmatpush.bf16.msrb.mxu1 %v6270_v36 }
 0x8be   :  { %3364 = vmatpush.bf16.msrb.mxu2 %v6273_v47  ;;  %3377 = vmatpush.bf16.msrb.mxu3 %v6277_v29 }
 0x8c1   :  { %3339 = vmatpush.bf16.msrb.mxu0 %v6279_v31  ;;  %3352 = vmatpush.bf16.msrb.mxu1 %v6284_v60 }
 0x8c2   :  { %3365 = vmatpush.bf16.msrb.mxu2 %v6287_v25  ;;  %3378 = vmatpush.bf16.msrb.mxu3 %v6291_v30 }
 0x8c5   :  { %3340 = vmatpush.bf16.msrb.mxu0 %v6293_v62  ;;  %3353 = vmatpush.bf16.msrb.mxu1 %v6296_v49 }
 0x8c6   :  { %3366 = vmatpush.bf16.msrb.mxu2 %v6308_v26  ;;  %3379 = vmatpush.bf16.msrb.mxu3 %v6301_v39 }
 0x8c9   :  { %3341 = vmatpush.bf16.msrb.mxu0 %v6303_v54  ;;  %3354 = vmatpush.bf16.msrb.mxu1 %v6306_v15 }
 0x8ca   :  { %3367 = vmatpush.bf16.msrb.mxu2 %v6317_v32  ;;  %3380 = vmatpush.bf16.msrb.mxu3 %v6313_v1 }
 0x8cd   :  { %3342 = vmatpush.bf16.msrb.mxu0 %v6315_v53  ;;  %3355 = vmatpush.bf16.msrb.mxu1 %v6320_v45 }
 0x8ce   :  { %3368 = vmatpush.bf16.msrb.mxu2 %v6323_v33  ;;  %3381 = vmatpush.bf16.msrb.mxu3 %v6327_v42 }
 0x92c   :  { %v3104_v43 = vpop.f32.mrf.mxu0  ;;  %v3117_v16 = vpop.f32.mrf.mxu1 }
 0x92d   :  { %v3147_v51 = vadd.f32 %v3104_v43, %v6876_v20  ;;  %v3148_v59 = vadd.f32 %v3117_v16, %v6877_v11 }
 0x92f   :  { %v4633_v46 = vmul.f32 -1.442695, %v3147_v51  ;;  %v4634_v63 = vmul.f32 -1.442695, %v3148_v59 }
 0x931   :  { %5068 = vpow2.f32 %v4633_v46 }
 0x932   :  { %5070 = vpow2.f32 %v4634_v63 }
 0x933   :  { %v3130_v50 = vpop.f32.mrf.mxu2  ;;  %v3143_v9 = vpop.f32.mrf.mxu3 }
 0x934   :  { %v3150_v21 = vadd.f32 %v3143_v9, %v6878_v6  ;;  %v3106_v22 = vpop.f32.mrf.mxu0  ;;  %v3119_v5 = vpop.f32.mrf.mxu1  ;;  %v3149_v28 = vadd.f32 %v3130_v50, %v6879_v4 }
 0x936   :  { %v4635_v18 = vmul.f32 -1.442695, %v3150_v21 }
 0x937   :  { %v5069_v40 = vpop.eup %5068 }
 0x938   :  { %v5071_v23 = vpop.eup %5070  ;;  %v3154_v19 = vadd.f32 1.0, %v5069_v40  ;;  %5072 = vpow2.f32 %v4635_v18 }
 0x939   :  { %v3173_v24 = vadd.f32 1.0, %v5071_v23 }
 0x93a   :  { %5074 = vrcp.f32 %v3154_v19  ;;  %v3166_v43 = vand.u32 2147483648, %v3154_v19  ;;  %v3164_v51 = vand.u32 2147483647, %v3154_v19  ;;  %vm3160_vm6 = vweird.f32 %v3154_v19 }
 0x93b   :  { %5076 = vrcp.f32 %v3173_v24  ;;  %v3132_v38 = vpop.f32.mrf.mxu2  ;;  %v3145_v56 = vpop.f32.mrf.mxu3  ;;  %v3185_v16 = vand.u32 2147483648, %v3173_v24  ;;  %v3183_v59 = vand.u32 2147483647, %v3173_v24  ;;  %vm3179_vm7 = vweird.f32 %v3173_v24 }
 0x93c   :  { %v3167_v50 = vor.u32 1.1754944e-38, %v3166_v43  ;;  %vm3165_vm10 = vcmp.eq.f32.partialorder %v3164_v51, 8.507059e+37  ;;  %v6881_v51 = vld [vmem:[#allocation17_spill] sm:$0xff] }
 0x93d   :  { %v3186_v21 = vor.u32 1.1754944e-38, %v3185_v16  ;;  %vm3184_vm11 = vcmp.eq.f32.partialorder %v3183_v59, 8.507059e+37  ;;  %v6880_v16 = vld [vmem:[#allocation48_spill] sm:$0xff] }
 0x93e   :  { %v5073_v10 = vpop.eup %5072 }
 0x93f   :  { %v3193_v37 = vadd.f32 1.0, %v5073_v10 }
 0x940   :  { %v5075_v27 = vpop.eup %5074 }
 0x941   :  { %v5077_v58 = vpop.eup %5076  ;;  %v3156_v8 = vmul.f32 %v5075_v27, %v3154_v19  ;;  %5078 = vrcp.f32 %v3193_v37  ;;  %vm3161_vm4 = vweird.f32 %v5075_v27  ;;  %vm3199_vm13 = vweird.f32 %v3193_v37 }
 0x942   :  { %v3175_v12 = vmul.f32 %v5077_v58, %v3173_v24  ;;  %5080 = vtanh.f32 %v3149_v28  ;;  %vm3180_vm5 = vweird.f32 %v5077_v58  ;;  %vm3162_vm8 = vmor %vm3160_vm6, %vm3161_vm4  ;;  %v3205_v28 = vand.u32 2147483648, %v3193_v37 }
 0x943   :  { %v3157_v7 = vsub.f32 1.0, %v3156_v8  ;;  %vm3181_vm9 = vmor %vm3179_vm7, %vm3180_vm5 }
 0x944   :  { %v3176_v41 = vsub.f32 1.0, %v3175_v12  ;;  %v3206_v12 = vor.u32 1.1754944e-38, %v3205_v28 }
 0x945   :  { %v3158_v20 = vmul.f32 %v5075_v27, %v3157_v7 }
 0x946   :  { %v3177_v11 = vmul.f32 %v5077_v58, %v3176_v41 }
 0x947   :  { %v5079_v46 = vpop.eup %5078  ;;  %v3159_v63 = vadd.f32 %v5075_v27, %v3158_v20 }
 0x948   :  { %v3178_v9 = vadd.f32 %v5077_v58, %v3177_v11  ;;  %v3195_v6 = vmul.f32 %v5079_v46, %v3193_v37  ;;  %v5081_v5 = vpop.eup %5080  ;;  %vm3200_vm12 = vweird.f32 %v5079_v46 }
 0x949   :  { %v3163_v22 = vsel %vm3162_vm8, %v5075_v27, %v3159_v63  ;;  %v3203_v27 = vand.u32 2147483647, %v3193_v37  ;;  %vm3201_vm14 = vmor %vm3199_vm13, %vm3200_vm12 }
 0x94a   :  { %v3168_v18 = vsel %vm3165_vm10, %v3167_v50, %v3163_v22  ;;  %v3182_v40 = vsel %vm3181_vm9, %v5077_v58, %v3178_v9  ;;  %v3196_v23 = vsub.f32 1.0, %v3195_v6  ;;  %v6882_v9 = vld [vmem:[#allocation18_spill] sm:$0xff] }
 0x94b   :  { %v3187_v38 = vsel %vm3184_vm11, %v3186_v21, %v3182_v40  ;;  %v3210_v56 = vmul.f32 %v5081_v5, %v3168_v18  ;;  %vm3204_vm15 = vcmp.eq.f32.partialorder %v3203_v27, 8.507059e+37  ;;  %v6883_v27 = vld [vmem:[#allocation22_spill] sm:$0xff] }
 0x94c   :  { %v3209_v10 = vmul.f32 %v3187_v38, %v6579_v3  ;;  %v3197_v4 = vmul.f32 %v5079_v46, %v3196_v23 }
 0x94e   :  { %v6619_v19 = vadd.f32 %v3210_v56, %v3209_v10  ;;  %v3198_v24 = vadd.f32 %v5079_v46, %v3197_v4 }
 0x950   :  { %5082 = vtanh.f32 %v6619_v19  ;;  %v3202_v8 = vsel %vm3201_vm14, %v5079_v46, %v3198_v24 }
 0x951   :  { %v3207_v7 = vsel %vm3204_vm15, %v3206_v12, %v3202_v8 }
 0x956   :  { %v5083_v58 = vpop.eup %5082 }
 0x957   :  { %v3213_v41 = vmul.f32 %v5083_v58, %v3207_v7 }
 0x959   :  { %v3214_v43 = vpack.c.bf16 %v3213_v41, %v3213_v41 }
 0x95b   :  { %3223 = vmatmul.bf16.vlgmr.msra.gmra.mxu0 %v3214_v43  ;;  %3236 = vmatmul.bf16.vlgmr.msra.gmra.mxu1 %v3214_v43 }
 0x95c   :  { %3249 = vmatmul.bf16.vlgmr.msra.gmra.mxu2 %v3214_v43  ;;  %3262 = vmatmul.bf16.vlgmr.msra.gmra.mxu3 %v3214_v43 }
 0x95d   :  { %3455 = vmatpush.bf16.msra.mxu0 %v6232_v13  ;;  %3468 = vmatpush.bf16.msra.mxu1 %v6236_v57 }
 0x95e   :  { %3481 = vmatpush.bf16.msra.mxu2 %v6238_v52  ;;  %3494 = vmatpush.bf16.msra.mxu3 %v6241_v35 }
 0x961   :  { %3456 = vmatpush.bf16.msra.mxu0 %v6243_v48  ;;  %3469 = vmatpush.bf16.msra.mxu1 %v6246_v17 }
 0x962   :  { %3482 = vmatpush.bf16.msra.mxu2 %v6249_v2  ;;  %3495 = vmatpush.bf16.msra.mxu3 %v6253_v34 }
 0x965   :  { %3457 = vmatpush.bf16.msra.mxu0 %v6255_v61  ;;  %3470 = vmatpush.bf16.msra.mxu1 %v6258_v0 }
 0x966   :  { %3483 = vmatpush.bf16.msra.mxu2 %v6261_v44  ;;  %3496 = vmatpush.bf16.msra.mxu3 %v6265_v14 }
 0x969   :  { %3458 = vmatpush.bf16.msra.mxu0 %v6267_v55  ;;  %3471 = vmatpush.bf16.msra.mxu1 %v6270_v36 }
 0x96a   :  { %3484 = vmatpush.bf16.msra.mxu2 %v6273_v47  ;;  %3497 = vmatpush.bf16.msra.mxu3 %v6277_v29 }
 0x96d   :  { %3459 = vmatpush.bf16.msra.mxu0 %v6279_v31  ;;  %3472 = vmatpush.bf16.msra.mxu1 %v6284_v60 }
 0x96e   :  { %3485 = vmatpush.bf16.msra.mxu2 %v6287_v25  ;;  %3498 = vmatpush.bf16.msra.mxu3 %v6291_v30 }
 0x971   :  { %3460 = vmatpush.bf16.msra.mxu0 %v6293_v62  ;;  %3473 = vmatpush.bf16.msra.mxu1 %v6296_v49 }
 0x972   :  { %3486 = vmatpush.bf16.msra.mxu2 %v6308_v26  ;;  %3499 = vmatpush.bf16.msra.mxu3 %v6301_v39 }
 0x975   :  { %3461 = vmatpush.bf16.msra.mxu0 %v6303_v54  ;;  %3474 = vmatpush.bf16.msra.mxu1 %v6306_v15 }
 0x976   :  { %3487 = vmatpush.bf16.msra.mxu2 %v6317_v32  ;;  %3500 = vmatpush.bf16.msra.mxu3 %v6313_v1 }
 0x979   :  { %3462 = vmatpush.bf16.msra.mxu0 %v6315_v53  ;;  %3475 = vmatpush.bf16.msra.mxu1 %v6320_v45 }
 0x97a   :  { %3488 = vmatpush.bf16.msra.mxu2 %v6323_v33  ;;  %3501 = vmatpush.bf16.msra.mxu3 %v6327_v42 }
 0x9d8   :  { %v3224_v3 = vpop.f32.mrf.mxu0  ;;  %v3237_v37 = vpop.f32.mrf.mxu1 }
 0x9d9   :  { %v3267_v20 = vadd.f32 %v3224_v3, %v6880_v16  ;;  %v3268_v11 = vadd.f32 %v3237_v37, %v6881_v51 }
 0x9db   :  { %v4636_v59 = vmul.f32 -1.442695, %v3267_v20  ;;  %v4637_v46 = vmul.f32 -1.442695, %v3268_v11 }
 0x9dd   :  { %5084 = vpow2.f32 %v4636_v59 }
 0x9de   :  { %5086 = vpow2.f32 %v4637_v46 }
 0x9df   :  { %v3250_v63 = vpop.f32.mrf.mxu2  ;;  %v3263_v50 = vpop.f32.mrf.mxu3 }
 0x9e0   :  { %v3270_v6 = vadd.f32 %v3263_v50, %v6882_v9  ;;  %v3226_v21 = vpop.f32.mrf.mxu0  ;;  %v3239_v22 = vpop.f32.mrf.mxu1  ;;  %v3269_v8 = vadd.f32 %v3250_v63, %v6883_v27 }
 0x9e2   :  { %v4638_v5 = vmul.f32 -1.442695, %v3270_v6 }
 0x9e3   :  { %v5085_v18 = vpop.eup %5084 }
 0x9e4   :  { %v5087_v40 = vpop.eup %5086  ;;  %v3274_v23 = vadd.f32 1.0, %v5085_v18  ;;  %5088 = vpow2.f32 %v4638_v5 }
 0x9e5   :  { %v3293_v38 = vadd.f32 1.0, %v5087_v40 }
 0x9e6   :  { %5090 = vrcp.f32 %v3274_v23  ;;  %v3286_v3 = vand.u32 2147483648, %v3274_v23  ;;  %v3284_v20 = vand.u32 2147483647, %v3274_v23  ;;  %vm3280_vm2 = vweird.f32 %v3274_v23 }
 0x9e7   :  { %5092 = vrcp.f32 %v3293_v38  ;;  %v3252_v56 = vpop.f32.mrf.mxu2  ;;  %v3265_v10 = vpop.f32.mrf.mxu3  ;;  %v3305_v37 = vand.u32 2147483648, %v3293_v38  ;;  %v3303_v11 = vand.u32 2147483647, %v3293_v38  ;;  %vm3299_vm3 = vweird.f32 %v3293_v38 }
 0x9e8   :  { %v3287_v63 = vor.u32 1.1754944e-38, %v3286_v3  ;;  %vm3285_vm6 = vcmp.eq.f32.partialorder %v3284_v20, 8.507059e+37 }
 0x9e9   :  { %v3306_v6 = vor.u32 1.1754944e-38, %v3305_v37  ;;  %vm3304_vm7 = vcmp.eq.f32.partialorder %v3303_v11, 8.507059e+37 }
 0x9ea   :  { %v5089_v4 = vpop.eup %5088 }
 0x9eb   :  { %v3313_v24 = vadd.f32 1.0, %v5089_v4 }
 0x9ec   :  { %v5091_v28 = vpop.eup %5090 }
 0x9ed   :  { %v5093_v12 = vpop.eup %5092  ;;  %v3276_v58 = vmul.f32 %v5091_v28, %v3274_v23  ;;  %5094 = vrcp.f32 %v3313_v24  ;;  %vm3281_vm0 = vweird.f32 %v5091_v28  ;;  %vm3319_vm9 = vweird.f32 %v3313_v24 }
 0x9ee   :  { %v3295_v7 = vmul.f32 %v5093_v12, %v3293_v38  ;;  %5096 = vtanh.f32 %v3269_v8  ;;  %vm3300_vm1 = vweird.f32 %v5093_v12  ;;  %vm3282_vm4 = vmor %vm3280_vm2, %vm3281_vm0  ;;  %v3325_v8 = vand.u32 2147483648, %v3313_v24 }
 0x9ef   :  { %v3277_v41 = vsub.f32 1.0, %v3276_v58  ;;  %vm3301_vm5 = vmor %vm3299_vm3, %vm3300_vm1 }
 0x9f0   :  { %v3296_v43 = vsub.f32 1.0, %v3295_v7  ;;  %v3326_v7 = vor.u32 1.1754944e-38, %v3325_v8 }
 0x9f1   :  { %v3278_v16 = vmul.f32 %v5091_v28, %v3277_v41 }
 0x9f2   :  { %v3297_v51 = vmul.f32 %v5093_v12, %v3296_v43 }
 0x9f3   :  { %v5095_v59 = vpop.eup %5094  ;;  %v3279_v46 = vadd.f32 %v5091_v28, %v3278_v16 }
 0x9f4   :  { %v3298_v50 = vadd.f32 %v5093_v12, %v3297_v51  ;;  %v3315_v9 = vmul.f32 %v5095_v59, %v3313_v24  ;;  %v5097_v22 = vpop.eup %5096  ;;  %vm3320_vm8 = vweird.f32 %v5095_v59 }
 0x9f5   :  { %v3283_v21 = vsel %vm3282_vm4, %v5091_v28, %v3279_v46  ;;  %v3323_v28 = vand.u32 2147483647, %v3313_v24  ;;  %vm3321_vm10 = vmor %vm3319_vm9, %vm3320_vm8 }
 0x9f6   :  { %v3288_v5 = vsel %vm3285_vm6, %v3287_v63, %v3283_v21  ;;  %v3302_v18 = vsel %vm3301_vm5, %v5093_v12, %v3298_v50  ;;  %v3316_v40 = vsub.f32 1.0, %v3315_v9 }
 0x9f7   :  { %v3307_v56 = vsel %vm3304_vm7, %v3306_v6, %v3302_v18  ;;  %v3330_v10 = vmul.f32 %v5097_v22, %v3288_v5  ;;  %vm3324_vm11 = vcmp.eq.f32.partialorder %v3323_v28, 8.507059e+37 }
 0x9f8   :  { %v3329_v4 = vmul.f32 %v3307_v56, %v6619_v19  ;;  %v3317_v27 = vmul.f32 %v5095_v59, %v3316_v40 }
 0x9fa   :  { %v6659_v23 = vadd.f32 %v3330_v10, %v3329_v4  ;;  %v3318_v38 = vadd.f32 %v5095_v59, %v3317_v27 }
 0x9fc   :  { %5098 = vtanh.f32 %v6659_v23  ;;  %v3322_v58 = vsel %vm3321_vm10, %v5095_v59, %v3318_v38 }
 0x9fd   :  { %v3327_v41 = vsel %vm3324_vm11, %v3326_v7, %v3322_v58 }
 0xa02   :  { %v5099_v12 = vpop.eup %5098 }
 0xa03   :  { %v3333_v43 = vmul.f32 %v5099_v12, %v3327_v41 }
 0xa05   :  { %v3334_v3 = vpack.c.bf16 %v3333_v43, %v3333_v43 }
 0xa07   :  { %3343 = vmatmul.bf16.vlgmr.msrb.gmra.mxu0 %v3334_v3  ;;  %3356 = vmatmul.bf16.vlgmr.msrb.gmra.mxu1 %v3334_v3 }
 0xa08   :  { %3369 = vmatmul.bf16.vlgmr.msrb.gmra.mxu2 %v3334_v3  ;;  %3382 = vmatmul.bf16.vlgmr.msrb.gmra.mxu3 %v3334_v3 }
 0xa09   :  { %3575 = vmatpush.bf16.msrb.mxu0 %v6232_v13  ;;  %3588 = vmatpush.bf16.msrb.mxu1 %v6236_v57 }
 0xa0a   :  { %3601 = vmatpush.bf16.msrb.mxu2 %v6238_v52  ;;  %3614 = vmatpush.bf16.msrb.mxu3 %v6241_v35  ;;  %v6884_v52 = vld [vmem:[#allocation25_spill] sm:$0xff] }
 0xa0d   :  { %3576 = vmatpush.bf16.msrb.mxu0 %v6243_v48  ;;  %3589 = vmatpush.bf16.msrb.mxu1 %v6246_v17  ;;  %v6885_v48 = vld [vmem:[#allocation40_spill] sm:$0xff] }
 0xa0e   :  { %3602 = vmatpush.bf16.msrb.mxu2 %v6249_v2  ;;  %3615 = vmatpush.bf16.msrb.mxu3 %v6253_v34 }
 0xa11   :  { %3577 = vmatpush.bf16.msrb.mxu0 %v6255_v61  ;;  %3590 = vmatpush.bf16.msrb.mxu1 %v6258_v0 }
 0xa12   :  { %3603 = vmatpush.bf16.msrb.mxu2 %v6261_v44  ;;  %3616 = vmatpush.bf16.msrb.mxu3 %v6265_v14  ;;  %v6886_v44 = vld [vmem:[#allocation24_spill] sm:$0xff] }
 0xa15   :  { %3578 = vmatpush.bf16.msrb.mxu0 %v6267_v55  ;;  %3591 = vmatpush.bf16.msrb.mxu1 %v6270_v36 }
 0xa16   :  { %3604 = vmatpush.bf16.msrb.mxu2 %v6273_v47  ;;  %3617 = vmatpush.bf16.msrb.mxu3 %v6277_v29 }
 0xa19   :  { %3579 = vmatpush.bf16.msrb.mxu0 %v6279_v31  ;;  %3592 = vmatpush.bf16.msrb.mxu1 %v6284_v60 }
 0xa1a   :  { %3605 = vmatpush.bf16.msrb.mxu2 %v6287_v25  ;;  %3618 = vmatpush.bf16.msrb.mxu3 %v6291_v30 }
 0xa1d   :  { %3580 = vmatpush.bf16.msrb.mxu0 %v6293_v62  ;;  %3593 = vmatpush.bf16.msrb.mxu1 %v6296_v49 }
 0xa1e   :  { %3606 = vmatpush.bf16.msrb.mxu2 %v6308_v26  ;;  %3619 = vmatpush.bf16.msrb.mxu3 %v6301_v39 }
 0xa21   :  { %3581 = vmatpush.bf16.msrb.mxu0 %v6303_v54  ;;  %3594 = vmatpush.bf16.msrb.mxu1 %v6306_v15  ;;  %v6887_v15 = vld [vmem:[#allocation23_spill] sm:$0xff] }
 0xa22   :  { %3607 = vmatpush.bf16.msrb.mxu2 %v6317_v32  ;;  %3620 = vmatpush.bf16.msrb.mxu3 %v6313_v1 }
 0xa25   :  { %3582 = vmatpush.bf16.msrb.mxu0 %v6315_v53  ;;  %3595 = vmatpush.bf16.msrb.mxu1 %v6320_v45 }
 0xa26   :  { %3608 = vmatpush.bf16.msrb.mxu2 %v6323_v33  ;;  %3621 = vmatpush.bf16.msrb.mxu3 %v6327_v42 }
 0xa84   :  { %v3344_v13 = vpop.f32.mrf.mxu0  ;;  %v3357_v57 = vpop.f32.mrf.mxu1 }
 0xa85   :  { %v3387_v35 = vadd.f32 %v3344_v13, %v6884_v52  ;;  %v3388_v17 = vadd.f32 %v3357_v57, %v6885_v48  ;;  %v6888_v13 = vld [vmem:[#allocation41_spill] sm:$0xff]  ;;  %v6889_v52 = vld [vmem:[#allocation27_spill] sm:$0xff] }
 0xa87   :  { %v4639_v2 = vmul.f32 -1.442695, %v3387_v35  ;;  %v4640_v34 = vmul.f32 -1.442695, %v3388_v17 }
 0xa89   :  { %5100 = vpow2.f32 %v4639_v2 }
 0xa8a   :  { %5102 = vpow2.f32 %v4640_v34 }
 0xa8b   :  { %v3370_v61 = vpop.f32.mrf.mxu2  ;;  %v3383_v0 = vpop.f32.mrf.mxu3 }
 0xa8c   :  { %v3390_v14 = vadd.f32 %v3383_v0, %v6886_v44  ;;  %v3346_v55 = vpop.f32.mrf.mxu0  ;;  %v3359_v36 = vpop.f32.mrf.mxu1  ;;  %v3389_v26 = vadd.f32 %v3370_v61, %v6887_v15  ;;  %v6890_v61 = vld [vmem:[#allocation49_spill] sm:$0xff] }
 0xa8e   :  { %v4641_v47 = vmul.f32 -1.442695, %v3390_v14 }
 0xa8f   :  { %v5101_v29 = vpop.eup %5100 }
 0xa90   :  { %v5103_v31 = vpop.eup %5102  ;;  %v3394_v60 = vadd.f32 1.0, %v5101_v29  ;;  %5104 = vpow2.f32 %v4641_v47 }
 0xa91   :  { %v3413_v25 = vadd.f32 1.0, %v5103_v31 }
 0xa92   :  { %5106 = vrcp.f32 %v3394_v60  ;;  %v3406_v42 = vand.u32 2147483648, %v3394_v60  ;;  %v3404_v37 = vand.u32 2147483647, %v3394_v60  ;;  %vm3400_vm14 = vweird.f32 %v3394_v60 }
 0xa93   :  { %5108 = vrcp.f32 %v3413_v25  ;;  %v3372_v30 = vpop.f32.mrf.mxu2  ;;  %v3385_v62 = vpop.f32.mrf.mxu3  ;;  %v3425_v19 = vand.u32 2147483648, %v3413_v25  ;;  %v3423_v20 = vand.u32 2147483647, %v3413_v25  ;;  %vm3419_vm15 = vweird.f32 %v3413_v25 }
 0xa94   :  { %v3407_v59 = vor.u32 1.1754944e-38, %v3406_v42  ;;  %vm3405_vm2 = vcmp.eq.f32.partialorder %v3404_v37, 8.507059e+37 }
 0xa95   :  { %v3426_v50 = vor.u32 1.1754944e-38, %v3425_v19  ;;  %vm3424_vm3 = vcmp.eq.f32.partialorder %v3423_v20, 8.507059e+37 }
 0xa96   :  { %v5105_v49 = vpop.eup %5104 }
 0xa97   :  { %v3433_v39 = vadd.f32 1.0, %v5105_v49 }
 0xa98   :  { %v5107_v54 = vpop.eup %5106 }
 0xa99   :  { %v5109_v1 = vpop.eup %5108  ;;  %v3396_v53 = vmul.f32 %v5107_v54, %v3394_v60  ;;  %5110 = vrcp.f32 %v3433_v39  ;;  %vm3401_vm12 = vweird.f32 %v5107_v54  ;;  %v3445_v38 = vand.u32 2147483648, %v3433_v39 }
 0xa9a   :  { %v3415_v32 = vmul.f32 %v5109_v1, %v3413_v25  ;;  %5112 = vtanh.f32 %v3389_v26  ;;  %vm3420_vm13 = vweird.f32 %v5109_v1  ;;  %vm3402_vm0 = vmor %vm3400_vm14, %vm3401_vm12  ;;  %vm3439_vm5 = vweird.f32 %v3433_v39 }
 0xa9b   :  { %v3397_v45 = vsub.f32 1.0, %v3396_v53  ;;  %vm3421_vm1 = vmor %vm3419_vm15, %vm3420_vm13  ;;  %v3443_v8 = vand.u32 2147483647, %v3433_v39  ;;  %v3446_v58 = vor.u32 1.1754944e-38, %v3445_v38 }
 0xa9c   :  { %v3416_v33 = vsub.f32 1.0, %v3415_v32 }
 0xa9d   :  { %v3398_v24 = vmul.f32 %v5107_v54, %v3397_v45  ;;  %vm3444_vm7 = vcmp.eq.f32.partialorder %v3443_v8, 8.507059e+37 }
 0xa9e   :  { %v3417_v16 = vmul.f32 %v5109_v1, %v3416_v33 }
 0xa9f   :  { %v5111_v51 = vpop.eup %5110  ;;  %v3399_v11 = vadd.f32 %v5107_v54, %v3398_v24 }
 0xaa0   :  { %v3418_v46 = vadd.f32 %v5109_v1, %v3417_v16  ;;  %v3435_v63 = vmul.f32 %v5111_v51, %v3433_v39  ;;  %v5113_v6 = vpop.eup %5112  ;;  %vm3440_vm4 = vweird.f32 %v5111_v51  ;;  %v6891_v39 = vld [vmem:[#allocation42_spill] sm:$0xff] }
 0xaa1   :  { %v3403_v9 = vsel %vm3402_vm0, %v5107_v54, %v3399_v11  ;;  %vm3441_vm6 = vmor %vm3439_vm5, %vm3440_vm4 }
 0xaa2   :  { %v3408_v21 = vsel %vm3405_vm2, %v3407_v59, %v3403_v9  ;;  %v3422_v22 = vsel %vm3421_vm1, %v5109_v1, %v3418_v46  ;;  %v3436_v5 = vsub.f32 1.0, %v3435_v63 }
 0xaa3   :  { %v3427_v18 = vsel %vm3424_vm3, %v3426_v50, %v3422_v22  ;;  %v3450_v40 = vmul.f32 %v5113_v6, %v3408_v21 }
 0xaa4   :  { %v3449_v56 = vmul.f32 %v3427_v18, %v6659_v23  ;;  %v3437_v10 = vmul.f32 %v5111_v51, %v3436_v5 }
 0xaa6   :  { %v6699_v4 = vadd.f32 %v3450_v40, %v3449_v56  ;;  %v3438_v27 = vadd.f32 %v5111_v51, %v3437_v10 }
 0xaa8   :  { %5114 = vtanh.f32 %v6699_v4  ;;  %v3442_v28 = vsel %vm3441_vm6, %v5111_v51, %v3438_v27 }
 0xaa9   :  { %v3447_v12 = vsel %vm3444_vm7, %v3446_v58, %v3442_v28 }
 0xaae   :  { %v5115_v7 = vpop.eup %5114 }
 0xaaf   :  { %v3453_v41 = vmul.f32 %v5115_v7, %v3447_v12 }
 0xab1   :  { %v3454_v43 = vpack.c.bf16 %v3453_v41, %v3453_v41 }
 0xab3   :  { %3463 = vmatmul.bf16.vlgmr.msra.gmra.mxu0 %v3454_v43  ;;  %3476 = vmatmul.bf16.vlgmr.msra.gmra.mxu1 %v3454_v43 }
 0xab4   :  { %3489 = vmatmul.bf16.vlgmr.msra.gmra.mxu2 %v3454_v43  ;;  %3502 = vmatmul.bf16.vlgmr.msra.gmra.mxu3 %v3454_v43 }
 0xb30   :  { %v3464_v23 = vpop.f32.mrf.mxu0  ;;  %v3477_v3 = vpop.f32.mrf.mxu1 }
 0xb31   :  { %v3507_v57 = vadd.f32 %v3464_v23, %v6888_v13  ;;  %v3508_v35 = vadd.f32 %v3477_v3, %v6889_v52  ;;  %v6892_v23 = vld [vmem:[#allocation28_spill] sm:$0xff]  ;;  %v6893_v13 = vld [vmem:[#allocation31_spill] sm:$0xff] }
 0xb33   :  { %v4642_v48 = vmul.f32 -1.442695, %v3507_v57  ;;  %v4643_v17 = vmul.f32 -1.442695, %v3508_v35 }
 0xb35   :  { %5116 = vpow2.f32 %v4642_v48 }
 0xb36   :  { %5118 = vpow2.f32 %v4643_v17 }
 0xb37   :  { %v3490_v2 = vpop.f32.mrf.mxu2  ;;  %v3503_v34 = vpop.f32.mrf.mxu3 }
 0xb38   :  { %v3510_v0 = vadd.f32 %v3503_v34, %v6890_v61  ;;  %v3466_v44 = vpop.f32.mrf.mxu0  ;;  %v3479_v14 = vpop.f32.mrf.mxu1  ;;  %v3509_v54 = vadd.f32 %v3490_v2, %v6891_v39  ;;  %v6894_v2 = vld [vmem:[#allocation29_spill] sm:$0xff] }
 0xb3a   :  { %v4644_v55 = vmul.f32 -1.442695, %v3510_v0 }
 0xb3b   :  { %v5117_v36 = vpop.eup %5116 }
 0xb3c   :  { %v5119_v47 = vpop.eup %5118  ;;  %v3514_v29 = vadd.f32 1.0, %v5117_v36  ;;  %5120 = vpow2.f32 %v4644_v55 }
 0xb3d   :  { %v3533_v31 = vadd.f32 1.0, %v5119_v47 }
 0xb3e   :  { %5122 = vrcp.f32 %v3514_v29  ;;  %v3526_v45 = vand.u32 2147483648, %v3514_v29  ;;  %v3524_v19 = vand.u32 2147483647, %v3514_v29  ;;  %vm3520_vm10 = vweird.f32 %v3514_v29 }
 0xb3f   :  { %5124 = vrcp.f32 %v3533_v31  ;;  %v3492_v60 = vpop.f32.mrf.mxu2  ;;  %v3505_v25 = vpop.f32.mrf.mxu3  ;;  %v3545_v33 = vand.u32 2147483648, %v3533_v31  ;;  %v3543_v37 = vand.u32 2147483647, %v3533_v31  ;;  %vm3539_vm11 = vweird.f32 %v3533_v31 }
 0xb40   :  { %v3527_v51 = vor.u32 1.1754944e-38, %v3526_v45  ;;  %vm3525_vm14 = vcmp.eq.f32.partialorder %v3524_v19, 8.507059e+37 }
 0xb41   :  { %v3546_v46 = vor.u32 1.1754944e-38, %v3545_v33  ;;  %vm3544_vm15 = vcmp.eq.f32.partialorder %v3543_v37, 8.507059e+37 }
 0xb42   :  { %v5121_v30 = vpop.eup %5120 }
 0xb43   :  { %v3553_v62 = vadd.f32 1.0, %v5121_v30 }
 0xb44   :  { %v5123_v49 = vpop.eup %5122 }
 0xb45   :  { %v5125_v15 = vpop.eup %5124  ;;  %v3516_v26 = vmul.f32 %v5123_v49, %v3514_v29  ;;  %5126 = vrcp.f32 %v3553_v62  ;;  %vm3521_vm8 = vweird.f32 %v5123_v49  ;;  %v3565_v27 = vand.u32 2147483648, %v3553_v62 }
 0xb46   :  { %v3535_v1 = vmul.f32 %v5125_v15, %v3533_v31  ;;  %5128 = vtanh.f32 %v3509_v54  ;;  %vm3540_vm9 = vweird.f32 %v5125_v15  ;;  %vm3522_vm12 = vmor %vm3520_vm10, %vm3521_vm8  ;;  %vm3559_vm1 = vweird.f32 %v3553_v62 }
 0xb47   :  { %v3517_v53 = vsub.f32 1.0, %v3516_v26  ;;  %vm3541_vm13 = vmor %vm3539_vm11, %vm3540_vm9  ;;  %v3563_v38 = vand.u32 2147483647, %v3553_v62  ;;  %v3566_v28 = vor.u32 1.1754944e-38, %v3565_v27 }
 0xb48   :  { %v3536_v32 = vsub.f32 1.0, %v3535_v1 }
 0xb49   :  { %v3518_v42 = vmul.f32 %v5123_v49, %v3517_v53  ;;  %vm3564_vm3 = vcmp.eq.f32.partialorder %v3563_v38, 8.507059e+37 }
 0xb4a   :  { %v3537_v24 = vmul.f32 %v5125_v15, %v3536_v32 }
 0xb4b   :  { %v5127_v16 = vpop.eup %5126  ;;  %v3519_v20 = vadd.f32 %v5123_v49, %v3518_v42 }
 0xb4c   :  { %v3538_v11 = vadd.f32 %v5125_v15, %v3537_v24  ;;  %v3555_v59 = vmul.f32 %v5127_v16, %v3553_v62  ;;  %v5129_v50 = vpop.eup %5128  ;;  %vm3560_vm0 = vweird.f32 %v5127_v16  ;;  %v6895_v62 = vld [vmem:[#allocation43_spill] sm:$0xff] }
 0xb4d   :  { %v3523_v63 = vsel %vm3522_vm12, %v5123_v49, %v3519_v20  ;;  %vm3561_vm2 = vmor %vm3559_vm1, %vm3560_vm0 }
 0xb4e   :  { %v3528_v9 = vsel %vm3525_vm14, %v3527_v51, %v3523_v63  ;;  %v3542_v6 = vsel %vm3541_vm13, %v5125_v15, %v3538_v11  ;;  %v3556_v21 = vsub.f32 1.0, %v3555_v59 }
 0xb4f   :  { %v3547_v22 = vsel %vm3544_vm15, %v3546_v46, %v3542_v6  ;;  %v3570_v5 = vmul.f32 %v5129_v50, %v3528_v9 }
 0xb50   :  { %v3569_v18 = vmul.f32 %v3547_v22, %v6699_v4  ;;  %v3557_v40 = vmul.f32 %v5127_v16, %v3556_v21 }
 0xb52   :  { %v6707_v56 = vadd.f32 %v3570_v5, %v3569_v18  ;;  %v3558_v10 = vadd.f32 %v5127_v16, %v3557_v40 }
 0xb54   :  { %5130 = vtanh.f32 %v6707_v56  ;;  %v3562_v8 = vsel %vm3561_vm2, %v5127_v16, %v3558_v10 }
 0xb55   :  { %v3567_v7 = vsel %vm3564_vm3, %v3566_v28, %v3562_v8 }
 0xb5a   :  { %v5131_v58 = vpop.eup %5130 }
 0xb5b   :  { %v3573_v12 = vmul.f32 %v5131_v58, %v3567_v7 }
 0xb5d   :  { %v3574_v41 = vpack.c.bf16 %v3573_v12, %v3573_v12  ;;  %v5236_v12 = vmov 128.0  }
 0xb5f   :  { %3583 = vmatmul.bf16.vlgmr.msrb.gmra.mxu0 %v3574_v41  ;;  %3596 = vmatmul.bf16.vlgmr.msrb.gmra.mxu1 %v3574_v41 }
 0xb60   :  { %3609 = vmatmul.bf16.vlgmr.msrb.gmra.mxu2 %v3574_v41  ;;  %3622 = vmatmul.bf16.vlgmr.msrb.gmra.mxu3 %v3574_v41 }
 0xbdc   :  { %v3584_v4 = vpop.f32.mrf.mxu0  ;;  %v3597_v43 = vpop.f32.mrf.mxu1 }
 0xbdd   :  { %v3627_v3 = vadd.f32 %v3584_v4, %v6892_v23  ;;  %v3628_v57 = vadd.f32 %v3597_v43, %v6893_v13 }
 0xbdf   :  { %v4645_v52 = vmul.f32 -1.442695, %v3627_v3  ;;  %v4646_v35 = vmul.f32 -1.442695, %v3628_v57 }
 0xbe1   :  { %5132 = vpow2.f32 %v4645_v52 }
 0xbe2   :  { %5134 = vpow2.f32 %v4646_v35 }
 0xbe3   :  { %v3610_v48 = vpop.f32.mrf.mxu2  ;;  %v3623_v17 = vpop.f32.mrf.mxu3 }
 0xbe4   :  { %v3630_v34 = vadd.f32 %v3623_v17, %v6894_v2  ;;  %v3586_v61 = vpop.f32.mrf.mxu0  ;;  %v3599_v0 = vpop.f32.mrf.mxu1  ;;  %v3629_v49 = vadd.f32 %v3610_v48, %v6895_v62  ;;  %v4880_v17 = vld [vmem:[%s6760_s9 + $0x30] sm:$0xff]  ;;  %v4879_v2 = vld [vmem:[%s6760_s9 + $0x28] sm:$0xff] }
 0xbe5   :  { %v4877_v61 = vld [vmem:[%s6760_s9 + $0x18] sm:$0xff]  ;;  %v4876_v0 = vld [vmem:[%s6760_s9 + $0x10] sm:$0xff] }
 0xbe6   :  { %v4647_v44 = vmul.f32 -1.442695, %v3630_v34  ;;  %v4878_v34 = vld [vmem:[%s6760_s9 + $0x20] sm:$0xff] }
 0xbe7   :  { %v5133_v14 = vpop.eup %5132 }
 0xbe8   :  { %v5135_v55 = vpop.eup %5134  ;;  %v3634_v36 = vadd.f32 1.0, %v5133_v14  ;;  %5136 = vpow2.f32 %v4647_v44  ;;  %v4875_v44 = vld [vmem:[%s6760_s9 + $0x8] sm:$0xff]  ;;  %v4874_v14 = vld [vmem:[%s6760_s9] sm:$0xff] }
 0xbe9   :  { %v3653_v47 = vadd.f32 1.0, %v5135_v55 }
 0xbea   :  { %5138 = vrcp.f32 %v3634_v36  ;;  %v3646_v53 = vand.u32 2147483648, %v3634_v36  ;;  %v3644_v33 = vand.u32 2147483647, %v3634_v36  ;;  %vm3640_vm6 = vweird.f32 %v3634_v36 }
 0xbeb   :  { %5140 = vrcp.f32 %v3653_v47  ;;  %v3612_v29 = vpop.f32.mrf.mxu2  ;;  %v3625_v31 = vpop.f32.mrf.mxu3  ;;  %v3665_v32 = vand.u32 2147483648, %v3653_v47  ;;  %v3663_v19 = vand.u32 2147483647, %v3653_v47  ;;  %vm3659_vm7 = vweird.f32 %v3653_v47 }
 0xbec   :  { %v3647_v16 = vor.u32 1.1754944e-38, %v3646_v53  ;;  %vm3645_vm9 = vcmp.eq.f32.partialorder %v3644_v33, 8.507059e+37 }
 0xbed   :  { %v3666_v11 = vor.u32 1.1754944e-38, %v3665_v32  ;;  %vm3664_vm11 = vcmp.eq.f32.partialorder %v3663_v19, 8.507059e+37  ;;  %v5019_v32 = vld [vmem:[%s6761_s10] ss:$0 sm:$0xff] }
 0xbee   :  { %v5137_v60 = vpop.eup %5136 }
 0xbef   :  { %v3673_v25 = vadd.f32 1.0, %v5137_v60 }
 0xbf0   :  { %v5139_v30 = vpop.eup %5138 }
 0xbf1   :  { %v5141_v39 = vpop.eup %5140  ;;  %v3636_v54 = vmul.f32 %v5139_v30, %v3634_v36  ;;  %5142 = vrcp.f32 %v3673_v25  ;;  %vm3641_vm4 = vweird.f32 %v5139_v30  ;;  %v3685_v10 = vand.u32 2147483648, %v3673_v25 }
 0xbf2   :  { %v3655_v15 = vmul.f32 %v5141_v39, %v3653_v47  ;;  %5144 = vtanh.f32 %v3629_v49  ;;  %vm3660_vm5 = vweird.f32 %v5141_v39  ;;  %vm3642_vm8 = vmor %vm3640_vm6, %vm3641_vm4  ;;  %vm3679_vm13 = vweird.f32 %v3673_v25  ;;  %v5017_v49 = vld [vmem:[%s6758_s7] ss:$0 sm:$0xff] }
 0xbf3   :  { %v3637_v26 = vsub.f32 1.0, %v3636_v54  ;;  %vm3661_vm10 = vmor %vm3659_vm7, %vm3660_vm5  ;;  %v3683_v27 = vand.u32 2147483647, %v3673_v25  ;;  %v3686_v8 = vor.u32 1.1754944e-38, %v3685_v10 }
 0xbf4   :  { %v3656_v1 = vsub.f32 1.0, %v3655_v15  ;;  %v5018_v15 = vld [vmem:[%s6759_s8] ss:$0 sm:$0xff] }
 0xbf5   :  { %v3638_v45 = vmul.f32 %v5139_v30, %v3637_v26  ;;  %vm3684_vm15 = vcmp.eq.f32.partialorder %v3683_v27, 8.507059e+37 }
 0xbf6   :  { %v3657_v42 = vmul.f32 %v5141_v39, %v3656_v1 }
 0xbf7   :  { %v5143_v24 = vpop.eup %5142  ;;  %v3639_v37 = vadd.f32 %v5139_v30, %v3638_v45 }
 0xbf8   :  { %v3658_v20 = vadd.f32 %v5141_v39, %v3657_v42  ;;  %v3675_v51 = vmul.f32 %v5143_v24, %v3673_v25  ;;  %v5145_v46 = vpop.eup %5144  ;;  %vm3680_vm12 = vweird.f32 %v5143_v24 }
 0xbf9   :  { %v3643_v59 = vsel %vm3642_vm8, %v5139_v30, %v3639_v37  ;;  %vm3681_vm14 = vmor %vm3679_vm13, %vm3680_vm12 }
 0xbfa   :  { %v3648_v63 = vsel %vm3645_vm9, %v3647_v16, %v3643_v59  ;;  %v3662_v50 = vsel %vm3661_vm10, %v5141_v39, %v3658_v20  ;;  %v3676_v9 = vsub.f32 1.0, %v3675_v51 }
 0xbfb   :  { %v3690_v6 = vmul.f32 %v5145_v46, %v3648_v63  ;;  %v3667_v21 = vsel %vm3664_vm11, %v3666_v11, %v3662_v50 }
 0xbfc   :  { %v3677_v22 = vmul.f32 %v5143_v24, %v3676_v9  ;;  %v3689_v5 = vmul.f32 %v3667_v21, %v6707_v56  ;;  %v4881_v56 = vld [vmem:[%s6760_s9 + $0x38] sm:$0xff] }
 0xbfd   :  { %3800 = vmatpush.bf16.msra.mxu0 %v4881_v56 }
 0xbfe   :  { %v3691_v18 = vadd.f32 %v3690_v6, %v3689_v5  ;;  %v3678_v40 = vadd.f32 %v5143_v24, %v3677_v22 }
 0xc00   :  { %5146 = vtanh.f32 %v3691_v18  ;;  %v3682_v38 = vsel %vm3681_vm14, %v5143_v24, %v3678_v40 }
 0xc01   :  { %v3687_v58 = vsel %vm3684_vm15, %v3686_v8, %v3682_v38  ;;  %5148 = vrcp.f32 %v5236_v12  ;;  %3801 = vmatpush.bf16.msra.mxu0 %v4880_v17 }
 0xc05   :  { %3802 = vmatpush.bf16.msra.mxu0 %v4879_v2 }
 0xc06   :  { %v5147_v28 = vpop.eup %5146 }
 0xc07   :  { %v3693_v7 = vmul.f32 %v5147_v28, %v3687_v58  ;;  %v5149_v41 = vpop.eup %5148 }
 0xc08   :  { %v3697_v4 = vmul.f32 128.0, %v5149_v41  ;;  %vm3701_vm0 = vweird.f32 %v5149_v41 }
 0xc09   :  { %3694 = vadd.xlane.f32.xlu0 %v3693_v7  ;;  %3803 = vmatpush.bf16.msra.mxu0 %v4878_v34 }
 0xc0a   :  { %v3698_v43 = vsub.f32 1.0, %v3697_v4 }
 0xc0c   :  { %v3699_v23 = vmul.f32 %v5149_v41, %v3698_v43 }
 0xc0d   :  { %3804 = vmatpush.bf16.msra.mxu0 %v4877_v61 }
 0xc0e   :  { %v3700_v3 = vadd.f32 %v5149_v41, %v3699_v23 }
 0xc10   :  { %v3702_v13 = vsel %vm3701_vm0, %v5149_v41, %v3700_v3 }
 0xc11   :  { %3805 = vmatpush.bf16.msra.mxu0 %v4876_v0 }
 0xc15   :  { %3806 = vmatpush.bf16.msra.mxu0 %v4875_v44 }
 0xc19   :  { %3807 = vmatpush.bf16.msra.mxu0 %v4874_v14 }
 0xc7c   :  { %v3695_v57 = vpop.xlane.xlu0 %3694 }
 0xc7d   :  { %v3703_v52 = vmul.f32 %v3702_v13, %v3695_v57 }
 0xc7f   :  { %v3704_v35 = vsub.f32 %v3693_v7, %v3703_v52 }
 0xc81   :  { %v3705_v48 = vmul.f32 %v3704_v35, %v3704_v35 }
 0xc83   :  { %3706 = vadd.xlane.f32.xlu0 %v3705_v48 }
 0xcf6   :  { %v3707_v55 = vpop.xlane.xlu0 %3706 }
 0xcf7   :  { %v3708_v36 = vmul.f32 %v3707_v55, %v3702_v13 }
 0xcf9   :  { %v3709_v47 = vadd.f32 1e-05, %v3708_v36 }
 0xcfb   :  { %5150 = vrsqrt.f32 %v3709_v47  ;;  %vm3716_vm2 = vweird.f32 %v3709_v47 }
 0xd01   :  { %v5151_v29 = vpop.eup %5150 }
 0xd02   :  { %v3711_v31 = vmul.f32 %v5151_v29, %v3709_v47  ;;  %vm3717_vm1 = vweird.f32 %v5151_v29 }
 0xd03   :  { %vm3718_vm3 = vmor %vm3716_vm2, %vm3717_vm1 }
 0xd04   :  { %v3712_v60 = vmul.f32 %v5151_v29, %v3711_v31 }
 0xd06   :  { %v3713_v25 = vmul.f32 0.5, %v3712_v60 }
 0xd08   :  { %v3714_v30 = vsub.f32 1.5, %v3713_v25 }
 0xd0a   :  { %v3715_v62 = vmul.f32 %v5151_v29, %v3714_v30 }
 0xd0c   :  { %v3719_v39 = vsel %vm3718_vm3, %v5151_v29, %v3715_v62 }
 0xd0d   :  { %v3720_v54 = vmul.f32 %v3719_v39, %v3704_v35 }
 0xd0f   :  { %v3725_v26 = vmul.f32 %v5017_v49, %v3720_v54 }
 0xd11   :  { %v3730_v1 = vadd.f32 %v5018_v15, %v3725_v26 }
 0xd13   :  { %v3731_v53 = vpack.c.bf16 %v3730_v1, %v3730_v1 }
 0xd15   :  { %3808 = vmatmul.bf16.vlgmr.msra.gmra.mxu0 %v3731_v53 }
 0xd92   :  { %v3809_v45 = vpop.f32.mrf.mxu0 }
 0xd93   :  { %v3810_v33 = vadd.f32 %v5019_v32, %v3809_v45 }
 0xd95   :  { %3813 = vst [vmem:[%s6762_s11] sm:$0xff] %v3810_v33 }
 0xd9a   :  { %v3811_v42 = vpop.f32.mrf.mxu0 }
 0xd9b   :  { %3818 = vsyncpa [#allocation7], 1 }
 0xd9c   :  { %3819 = vsyncmov [#allocation5] }
 0xd9f   :  { %s3820_s7 = vpop.sfrf %3819 }
 0xda0   :  { %p4680_p0 = scmp.ne.s32.totalorder %s3820_s7, 0 }
 0xda2   :  { %3824 = shalt.err (%p4680_p0)  }
 0xda3   :  { %3826 = vsyncmov [#allocation5 + $0x1] }
 0xda6   :  { %s3827_s8 = vpop.sfrf %3826 }
 0xda7   :  { %p4681_p1 = scmp.ne.s32.totalorder %s3827_s8, 0 }
 0xda9   :  { %3831 = shalt.err (%p4681_p1)  }

</bundles_post_ra>
